<compile_context>
chip_gen: v7x
topology: tpu7x:2x2x1
jax: 0.10.0
libtpu: 0.0.40
codegen_flags: <defaults>
</compile_context>

<pallas_src>
import math
import jax
import jax.numpy as jnp
from jax.experimental import pallas as pl
from jax.experimental.pallas import tpu as pltpu

# ---------------- configuration (module hyper-params) ----------------
C_M = 32        # c_m : MSA channel dim (LayerNorm dim)
C_HIDDEN = 32   # c   : per-head hidden dim (module default c=32)
N_HEAD = 1      # N_head (module default 1)
N_SEQ = 8       # number of MSA sequences (attention axis, attn_dim=-3)
N_RES = 16      # number of residue columns
LN_EPS = 1e-5   # torch.nn.LayerNorm default eps

BATCH = 4       # independent MSA instances (leading batch dims of the module)
TILE_INST = 2   # instances packed per grid step: 2 -> 256-row tiles (v6e/v7x);
                # set 1 for exact 128x128 MXU tiles on v5e.

D_QKV = C_HIDDEN * N_HEAD
ROWS_PER_INST = N_SEQ * N_RES            # 128 flattened (s, r) rows per instance
TILE_ROWS = TILE_INST * ROWS_PER_INST    # rows per grid step (256 by default)
MXU_DTYPE = jnp.float32   # bf16 on v6e/v7x only after re-validating the 1e-4 tolerance

# The kernel below specialises N_HEAD == 1 (module default).  For N_HEAD > 1,
# make heads a dot_general batch dim (never a Python slice loop over heads).
assert N_HEAD == 1
assert BATCH % TILE_INST == 0


def _msa_col_attn_kernel(m_ref, w_ref, b_ref, wo_ref, bo_ref, mask_ref, out_ref):
    x = m_ref[...].astype(jnp.float32)                        # (TILE_ROWS, C_M)

    # ---- LayerNorm statistics (affine folded into the fused projection) ----
    mu = jnp.mean(x, axis=-1, keepdims=True)
    xc = x - mu
    var = jnp.mean(xc * xc, axis=-1, keepdims=True)
    xhat = xc * jax.lax.rsqrt(var + LN_EPS)                   # (TILE_ROWS, C_M)

    # ---- fused q/k/v/gate projection: one (TILE_ROWS,32)@(32,128) MXU pass ----
    # W already contains diag(gamma) @ [Wq/sqrt(c) | Wk | Wv | Wg];
    # b contains beta @ W_qkvg + [0 | 0 | 0 | bg].
    proj = jnp.dot(xhat.astype(MXU_DTYPE), w_ref[...].astype(MXU_DTYPE),
                   preferred_element_type=jnp.float32)
    proj = proj + b_ref[...]                                   # (TILE_ROWS, 4*D)

    q = proj[:, 0 * D_QKV:1 * D_QKV]
    k = proj[:, 1 * D_QKV:2 * D_QKV]
    v = proj[:, 2 * D_QKV:3 * D_QKV]
    g = jax.nn.sigmoid(proj[:, 3 * D_QKV:4 * D_QKV])

    # ---- attention over the sequence axis, batched over residues/instances ----
    # Rows/cols enumerate flattened (instance, seq, res).  The precomputed
    # additive mask (0 on "same instance & same residue", -1e30 elsewhere)
    # turns one lane-dense TILE_ROWS x TILE_ROWS scores matmul into the
    # independent per-residue SxS attentions — no in-kernel iota/select, no
    # transposes, no micro-batched dots.
    scores = jax.lax.dot_general(
        q.astype(MXU_DTYPE), k.astype(MXU_DTYPE),
        dimension_numbers=(((1,), (1,)), ((), ())),
        preferred_element_type=jnp.float32)                    # (TILE_ROWS, TILE_ROWS)
    scores = scores + mask_ref[...]

    scores = scores - jnp.max(scores, axis=-1, keepdims=True)
    p = jnp.exp(scores)                                        # masked entries underflow to 0
    denom = jnp.sum(p, axis=-1, keepdims=True)
    # approx=True would route 1/x to the EUP, but its relaxed precision can
    # exceed the 1e-4 f32 reference tolerance; keep the exact reciprocal.
    p = p * pl.reciprocal(denom, approx=False)

    o = jnp.dot(p.astype(MXU_DTYPE), v.astype(MXU_DTYPE),
                preferred_element_type=jnp.float32)            # (TILE_ROWS, D_QKV)

    # ---- gating + output projection back to c_m ----
    og = g * o
    y = jnp.dot(og.astype(MXU_DTYPE), wo_ref[...].astype(MXU_DTYPE),
                preferred_element_type=jnp.float32) + bo_ref[...]

    # TODO(synk): the c_m=32 output store is a masked (quarter-lane) vst;
    # pack 4 instances along the minor dim if outputs ever grow large.
    out_ref[...] = y.astype(out_ref.dtype)


def fuse_params(params):
    """One-time parameter prep: fuse q/k/v/gate weights, fold qk scale + LN affine."""
    (gamma, beta, wq, wk, wv, wg, bg, wo, bo) = params
    scale = 1.0 / math.sqrt(C_HIDDEN)
    w_qkvg = jnp.concatenate([wq * scale, wk, wv, wg], axis=1)            # (C_M, 4*D)
    b_qkvg = jnp.concatenate(
        [jnp.zeros((1, 3 * D_QKV), wq.dtype), bg], axis=1)                # (1, 4*D)
    # Fold LayerNorm affine:  (xhat*gamma + beta) @ W + b
    #                       =  xhat @ (diag(gamma) @ W) + (beta @ W + b)
    w_fused = gamma.reshape(C_M, 1) * w_qkvg                              # (C_M, 4*D)
    b_fused = beta @ w_qkvg + b_qkvg                                      # (1, 4*D)
    return (w_fused, b_fused, wo, bo)


def make_mask_bias():
    """Additive 0 / -1e30 bias for the flattened (instance, seq, res) tile rows."""
    idx = jnp.arange(TILE_ROWS)
    inst = idx // ROWS_PER_INST
    res = idx % N_RES
    same = (inst[:, None] == inst[None, :]) & (res[:, None] == res[None, :])
    return jnp.where(same, 0.0, -1e30).astype(jnp.float32)    # (TILE_ROWS, TILE_ROWS)


def msa_column_attention(m, fused_params, mask_bias):
    """m: (B, N_seq, N_res, c_m) float32. Returns same shape."""
    w_fused, b_fused, w_o, b_o = fused_params
    B, S, R, Cm = m.shape
    assert (S, R, Cm) == (N_SEQ, N_RES, C_M)
    assert B % TILE_INST == 0

    # Free row-major reshape (no transpose): rows of m2 enumerate (b, s, r).
    rows_total = B * S * R
    m2 = m.reshape(rows_total, Cm)
    n_tiles = B // TILE_INST

    const = lambda shape: pl.BlockSpec(shape, lambda i: tuple(0 for _ in shape))

    out2 = pl.pallas_call(
        _msa_col_attn_kernel,
        out_shape=jax.ShapeDtypeStruct((rows_total, Cm), m.dtype),
        grid_spec=pltpu.PrefetchScalarGridSpec(
            num_scalar_prefetch=0,
            grid=(n_tiles,),                     # pipelined over instance groups
            in_specs=[
                pl.BlockSpec((TILE_ROWS, Cm), lambda i: (i, 0)),   # m tile
                const((Cm, 4 * D_QKV)),          # fused diag(gamma)@[Wq/sqrt(c)|Wk|Wv|Wg]
                const((1, 4 * D_QKV)),           # fused beta@W + [0|0|0|bg]
                const((D_QKV, Cm)),              # Wo
                const((1, Cm)),                  # bo
                const((TILE_ROWS, TILE_ROWS)),   # additive mask bias (DMA'd once)
            ],
            out_specs=pl.BlockSpec((TILE_ROWS, Cm), lambda i: (i, 0)),
        ),
        compiler_params=pltpu.CompilerParams(
            dimension_semantics=("parallel",)),  # lets v7x use both TensorCores
    )(m2, w_fused, b_fused, w_o, b_o, mask_bias)

    return out2.reshape(B, S, R, Cm)             # free row-major reshape back


def reference(m, params):
    """Pure-JAX reference matching the PyTorch module semantics (N_head=1)."""
    (gamma, beta, wq, wk, wv, wg, bg, wo, bo) = params
    mu = jnp.mean(m, axis=-1, keepdims=True)
    var = jnp.mean((m - mu) ** 2, axis=-1, keepdims=True)
    xn = (m - mu) / jnp.sqrt(var + LN_EPS) * gamma[0] + beta[0]

    x = jnp.moveaxis(xn, -3, -2)                 # attn_dim=-3 -> position -2
    q = (x @ wq) / math.sqrt(C_HIDDEN)
    k = x @ wk
    v = x @ wv
    a = jnp.einsum('...qc,...kc->...qk', q, k)
    a = jax.nn.softmax(a, axis=-1)
    o = jnp.einsum('...qk,...kc->...qc', a, v)
    g = jax.nn.sigmoid(x @ wg + bg[0])
    y = (g * o) @ wo + bo[0]
    return jnp.moveaxis(y, -2, -3)


if __name__ == "__main__":
    key = jax.random.PRNGKey(0)
    ks = jax.random.split(key, 10)

    m = jax.random.normal(ks[0], (BATCH, N_SEQ, N_RES, C_M), jnp.float32)

    # deterministic synthetic parameters (shapes follow the module's __init__)
    gamma = 1.0 + 0.05 * jax.random.normal(ks[1], (1, C_M), jnp.float32)
    beta = 0.05 * jax.random.normal(ks[2], (1, C_M), jnp.float32)
    wq = 0.1 * jax.random.normal(ks[3], (C_M, D_QKV), jnp.float32)
    wk = 0.1 * jax.random.normal(ks[4], (C_M, D_QKV), jnp.float32)
    wv = 0.1 * jax.random.normal(ks[5], (C_M, D_QKV), jnp.float32)
    wg = 0.1 * jax.random.normal(ks[6], (C_M, D_QKV), jnp.float32)
    bg = 0.1 * jax.random.normal(ks[7], (1, D_QKV), jnp.float32)
    wo = 0.1 * jax.random.normal(ks[8], (D_QKV, C_M), jnp.float32)
    bo = 0.1 * jax.random.normal(ks[9], (1, C_M), jnp.float32)

    params = (gamma, beta, wq, wk, wv, wg, bg, wo, bo)
    fused = fuse_params(params)                  # once, outside the kernel call path
    mask_bias = make_mask_bias()                 # once, outside the kernel call path

    out = msa_column_attention(m, fused, mask_bias)
    out = jax.block_until_ready(out)

    ref = reference(m, params)
    assert out.shape == (BATCH, N_SEQ, N_RES, C_M)
    assert jnp.allclose(out, ref, atol=1e-4, rtol=1e-4), "mismatch vs reference"

    print("KERNEL_OK")
</pallas_src>

<mosaic_0001>
module attributes {stable_mosaic.version = 11 : i64} {
  func.func @_msa_col_attn_kernel(%arg0: i32, %arg1: memref<256x32xf32, #tpu.memory_space<vmem>>, %arg2: memref<32x128xf32, #tpu.memory_space<vmem>>, %arg3: memref<1x128xf32, #tpu.memory_space<vmem>>, %arg4: memref<32x32xf32, #tpu.memory_space<vmem>>, %arg5: memref<1x32xf32, #tpu.memory_space<vmem>>, %arg6: memref<256x256xf32, #tpu.memory_space<vmem>>, %arg7: memref<256x32xf32, #tpu.memory_space<vmem>>) attributes {dimension_semantics = [#tpu.dimension_semantics<parallel>], iteration_bounds = array<i64: 2>, scalar_prefetch = 0 : i64, scratch_operands = 0 : i64, tpu.core_type = #tpu.core_type<tc>, window_params = [{transform_indices = @transform_0, window_bounds = array<i64: 256, 32>}, {pipeline_mode = #tpu.pipeline_mode<synchronous>, transform_indices = @transform_1, window_bounds = array<i64: 32, 128>}, {pipeline_mode = #tpu.pipeline_mode<synchronous>, transform_indices = @transform_2, window_bounds = array<i64: 1, 128>}, {pipeline_mode = #tpu.pipeline_mode<synchronous>, transform_indices = @transform_3, window_bounds = array<i64: 32, 32>}, {pipeline_mode = #tpu.pipeline_mode<synchronous>, transform_indices = @transform_4, window_bounds = array<i64: 1, 32>}, {pipeline_mode = #tpu.pipeline_mode<synchronous>, transform_indices = @transform_5, window_bounds = array<i64: 256, 256>}, {transform_indices = @transform_6, window_bounds = array<i64: 256, 32>}]} {
    %c0 = arith.constant 0 : index
    %c0_0 = arith.constant 0 : index
    %0 = vector.load %arg1[%c0, %c0_0] : memref<256x32xf32, #tpu.memory_space<vmem>>, vector<256x32xf32>
    %cst = arith.constant dense<0.000000e+00> : vector<256xf32>
    %1 = vector.multi_reduction <add>, %0, %cst [1] : vector<256x32xf32> to vector<256xf32>
    %2 = vector.shape_cast %1 : vector<256xf32> to vector<256x1xf32>
    %cst_1 = arith.constant 3.200000e+01 : f32
    %3 = vector.broadcast %cst_1 : f32 to vector<256x1xf32>
    %4 = arith.divf %2, %3 : vector<256x1xf32>
    %5 = vector.broadcast %4 : vector<256x1xf32> to vector<256x32xf32>
    %6 = arith.subf %0, %5 : vector<256x32xf32>
    %7 = arith.mulf %6, %6 : vector<256x32xf32>
    %cst_2 = arith.constant dense<0.000000e+00> : vector<256xf32>
    %8 = vector.multi_reduction <add>, %7, %cst_2 [1] : vector<256x32xf32> to vector<256xf32>
    %9 = vector.shape_cast %8 : vector<256xf32> to vector<256x1xf32>
    %cst_3 = arith.constant 3.200000e+01 : f32
    %10 = vector.broadcast %cst_3 : f32 to vector<256x1xf32>
    %11 = arith.divf %9, %10 : vector<256x1xf32>
    %cst_4 = arith.constant 9.99999974E-6 : f32
    %12 = vector.broadcast %cst_4 : f32 to vector<256x1xf32>
    %13 = arith.addf %11, %12 : vector<256x1xf32>
    %14 = math.rsqrt %13 : vector<256x1xf32>
    %15 = vector.broadcast %14 : vector<256x1xf32> to vector<256x32xf32>
    %16 = arith.mulf %6, %15 : vector<256x32xf32>
    %c0_5 = arith.constant 0 : index
    %c0_6 = arith.constant 0 : index
    %17 = vector.load %arg2[%c0_5, %c0_6] : memref<32x128xf32, #tpu.memory_space<vmem>>, vector<32x128xf32>
    %cst_7 = arith.constant dense<0.000000e+00> : vector<256x128xf32>
    %18 = tpu.matmul %16, %17, %cst_7 {dimension_numbers = #tpu.dot_dimension_numbers<[1], [0], [0], [1], [0, 0, 1, 1], [], []>} : vector<256x32xf32>, vector<32x128xf32>, vector<256x128xf32> -> vector<256x128xf32>
    %c0_8 = arith.constant 0 : index
    %c0_9 = arith.constant 0 : index
    %19 = vector.load %arg3[%c0_8, %c0_9] : memref<1x128xf32, #tpu.memory_space<vmem>>, vector<1x128xf32>
    %20 = vector.broadcast %19 : vector<1x128xf32> to vector<256x128xf32>
    %21 = arith.addf %18, %20 : vector<256x128xf32>
    %22 = vector.extract_strided_slice %21 {offsets = [0, 0], sizes = [256, 32], strides = [1, 1]} : vector<256x128xf32> to vector<256x32xf32>
    %23 = vector.extract_strided_slice %21 {offsets = [0, 32], sizes = [256, 32], strides = [1, 1]} : vector<256x128xf32> to vector<256x32xf32>
    %24 = vector.extract_strided_slice %21 {offsets = [0, 64], sizes = [256, 32], strides = [1, 1]} : vector<256x128xf32> to vector<256x32xf32>
    %25 = vector.extract_strided_slice %21 {offsets = [0, 96], sizes = [256, 32], strides = [1, 1]} : vector<256x128xf32> to vector<256x32xf32>
    %26 = arith.negf %25 : vector<256x32xf32>
    %27 = math.exp %26 : vector<256x32xf32>
    %cst_10 = arith.constant 1.000000e+00 : f32
    %28 = vector.broadcast %cst_10 : f32 to vector<256x32xf32>
    %29 = arith.addf %28, %27 : vector<256x32xf32>
    %30 = arith.divf %28, %29 : vector<256x32xf32>
    %cst_11 = arith.constant dense<0.000000e+00> : vector<256x256xf32>
    %31 = tpu.matmul %22, %23, %cst_11 {dimension_numbers = #tpu.dot_dimension_numbers<[1], [1], [0], [0], [0, 0, 1, 0], [], []>} : vector<256x32xf32>, vector<256x32xf32>, vector<256x256xf32> -> vector<256x256xf32>
    %c0_12 = arith.constant 0 : index
    %c0_13 = arith.constant 0 : index
    %32 = vector.load %arg6[%c0_12, %c0_13] : memref<256x256xf32, #tpu.memory_space<vmem>>, vector<256x256xf32>
    %33 = arith.addf %31, %32 : vector<256x256xf32>
    %cst_14 = arith.constant dense<0xFF800000> : vector<256xf32>
    %34 = vector.multi_reduction <maximumf>, %33, %cst_14 [1] : vector<256x256xf32> to vector<256xf32>
    %35 = vector.shape_cast %34 : vector<256xf32> to vector<256x1xf32>
    %36 = vector.broadcast %35 : vector<256x1xf32> to vector<256x256xf32>
    %37 = arith.subf %33, %36 : vector<256x256xf32>
    %38 = math.exp %37 : vector<256x256xf32>
    %cst_15 = arith.constant dense<0.000000e+00> : vector<256xf32>
    %39 = vector.multi_reduction <add>, %38, %cst_15 [1] : vector<256x256xf32> to vector<256xf32>
    %40 = vector.shape_cast %39 : vector<256xf32> to vector<256x1xf32>
    %41 = tpu.reciprocal %40 : vector<256x1xf32> -> vector<256x1xf32>
    %42 = vector.broadcast %41 : vector<256x1xf32> to vector<256x256xf32>
    %43 = arith.mulf %38, %42 : vector<256x256xf32>
    %cst_16 = arith.constant dense<0.000000e+00> : vector<256x32xf32>
    %44 = tpu.matmul %43, %24, %cst_16 {dimension_numbers = #tpu.dot_dimension_numbers<[1], [0], [0], [1], [0, 0, 1, 1], [], []>} : vector<256x256xf32>, vector<256x32xf32>, vector<256x32xf32> -> vector<256x32xf32>
    %45 = arith.mulf %30, %44 : vector<256x32xf32>
    %c0_17 = arith.constant 0 : index
    %c0_18 = arith.constant 0 : index
    %46 = vector.load %arg4[%c0_17, %c0_18] : memref<32x32xf32, #tpu.memory_space<vmem>>, vector<32x32xf32>
    %cst_19 = arith.constant dense<0.000000e+00> : vector<256x32xf32>
    %47 = tpu.matmul %45, %46, %cst_19 {dimension_numbers = #tpu.dot_dimension_numbers<[1], [0], [0], [1], [0, 0, 1, 1], [], []>} : vector<256x32xf32>, vector<32x32xf32>, vector<256x32xf32> -> vector<256x32xf32>
    %c0_20 = arith.constant 0 : index
    %c0_21 = arith.constant 0 : index
    %48 = vector.load %arg5[%c0_20, %c0_21] : memref<1x32xf32, #tpu.memory_space<vmem>>, vector<1x32xf32>
    %49 = vector.broadcast %48 : vector<1x32xf32> to vector<256x32xf32>
    %50 = arith.addf %47, %49 : vector<256x32xf32>
    %c0_22 = arith.constant 0 : index
    %c0_23 = arith.constant 0 : index
    %51 = vector.load %arg7[%c0_22, %c0_23] : memref<256x32xf32, #tpu.memory_space<vmem>>, vector<256x32xf32>
    tpu.vector_store %arg7[%c0_22, %c0_23], %50 {strides = array<i32>} : memref<256x32xf32, #tpu.memory_space<vmem>>, vector<256x32xf32>,
    return
  }
  func.func @transform_0(%arg0: i32) -> (i32, i32) {
    %c0_i32 = arith.constant 0 : i32
    %c0_i32_0 = arith.constant 0 : i32
    return %arg0, %c0_i32 : i32, i32
  }
  func.func @transform_1(%arg0: i32) -> (i32, i32) {
    %c0_i32 = arith.constant 0 : i32
    %c0_i32_0 = arith.constant 0 : i32
    %c0_i32_1 = arith.constant 0 : i32
    return %c0_i32, %c0_i32_0 : i32, i32
  }
  func.func @transform_2(%arg0: i32) -> (i32, i32) {
    %c0_i32 = arith.constant 0 : i32
    %c0_i32_0 = arith.constant 0 : i32
    %c0_i32_1 = arith.constant 0 : i32
    return %c0_i32, %c0_i32_0 : i32, i32
  }
  func.func @transform_3(%arg0: i32) -> (i32, i32) {
    %c0_i32 = arith.constant 0 : i32
    %c0_i32_0 = arith.constant 0 : i32
    %c0_i32_1 = arith.constant 0 : i32
    return %c0_i32, %c0_i32_0 : i32, i32
  }
  func.func @transform_4(%arg0: i32) -> (i32, i32) {
    %c0_i32 = arith.constant 0 : i32
    %c0_i32_0 = arith.constant 0 : i32
    %c0_i32_1 = arith.constant 0 : i32
    return %c0_i32, %c0_i32_0 : i32, i32
  }
  func.func @transform_5(%arg0: i32) -> (i32, i32) {
    %c0_i32 = arith.constant 0 : i32
    %c0_i32_0 = arith.constant 0 : i32
    %c0_i32_1 = arith.constant 0 : i32
    return %c0_i32, %c0_i32_0 : i32, i32
  }
  func.func @transform_6(%arg0: i32) -> (i32, i32) {
    %c0_i32 = arith.constant 0 : i32
    %c0_i32_0 = arith.constant 0 : i32
    return %arg0, %c0_i32 : i32, i32
  }
}

</mosaic_0001>

<bundles_post_ra>
// kernel: tpu_custom_call.1
= control target key start
LH: loop header
LB: loop body
LE: loop exit
PB: predicated region body
PF: predicated region fallthrough
CT: control target
= control target key end

     0   :  { %s4391_s21 = smov 0   ;;  %s6215_s0 = inlined_call_operand.vmem [shape: f32[512,32], index: 0, kind: input, shape index: {}]   ;;  %s6216_s1 = inlined_call_operand.vmem [shape: f32[32,128], index: 1, kind: input, shape index: {}]   ;;  %s6217_s2 = inlined_call_operand.vmem [shape: f32[1,128], index: 2, kind: input, shape index: {}]   ;;  %s6218_s3 = inlined_call_operand.vmem [shape: f32[32,32], index: 3, kind: input, shape index: {}]   ;;  %s6219_s4 = inlined_call_operand.vmem [shape: f32[1,32], index: 4, kind: input, shape index: {}]   ;;  %s6220_s5 = inlined_call_operand.vmem [shape: f32[256,256], index: 5, kind: input, shape index: {}]   ;;  %s6221_s6 = inlined_call_operand.vmem [shape: f32[512,32], index: 6, kind: output, shape index: {}]  }
   0x1 LB: > { %s3219_s22 = sadd.s32 4294967295, %s4350_s21   ;;  %p3223_p0 = scmp.ge.s32.totalorder %s4350_s21, 1  ;;  %s4350_s21 = sphi %s4391_s21, %s16_s21  }
   0x2   : > { %p213_p1 = scmp.lt.s32.totalorder %s4350_s21, 3 }
   0x4   : > { %p214_p2 = pnand %p3223_p0, %p213_p1 }
   0x6   : > { %217 = sbr.rel (%p214_p2) target bundleno = 2207 (0x89f), region = 44 }
   0xd   : > { %s3224_s23 = sshll.u32 %s3219_s22, 5  ;;  %vm287_vm0 = vcmask 261120   ;;  %s4352_s14 = smov 96  }
   0xe   : > { %p244_p3 = scmp.lt.s32.totalorder %s3224_s23, 63  ;;  %s4353_s15 = smov 64   ;;  %vm5029_vm1 = vmpackc.low %vm287_vm0, %vm287_vm0 }
   0xf   : > { %s4355_s18 = smov 32  }
  0x10   : > { %s6410_s23 = smov (!%p244_p3, %s3224_s23), 63 }
  0x11   : > { %s3225_s24 = sshll.u32 %s6410_s23, 3 }
  0x12   : > { %s4407_s27 = scalar_lea.vmem %s6215_s0, %s3225_s24  ;;  %s6114_s25 = scalar_lea.vmem %s6221_s6, %s3225_s24 }
  0x13   : > { %v4410_v0 = vld [vmem:[%s4407_s27 + $0x10] sm:$0xff]  ;;  %v4413_v1 = vld [vmem:[%s4407_s27] sm:$0xff]  ;;  %v4416_v2 = vld [vmem:[%s4407_s27 + $0x18] sm:$0xff] }
  0x14   : > { %v294_v3 = vsel %vm287_vm0, %v4410_v0, 0.0  ;;  %v288_v4 = vsel %vm287_vm0, %v4413_v1, 0.0  ;;  %v4423_v5 = vld [vmem:[%s4407_s27 + $0x8] sm:$0xff]  ;;  %v297_v6 = vsel %vm287_vm0, %v4416_v2, 0.0  ;;  %v4433_v9 = vld [vmem:[%s4407_s27 + $0x20] sm:$0xff]  ;;  %v4440_v12 = vld [vmem:[%s4407_s27 + $0x38] sm:$0xff] }
  0x15   : > { %295 = vadd.xlane.f32.xlu1 %v294_v3  ;;  %289 = vadd.xlane.f32.xlu0 %v288_v4  ;;  %v291_v7 = vsel %vm287_vm0, %v4423_v5, 0.0  ;;  %v4430_v8 = vld [vmem:[%s4407_s27 + $0x28] sm:$0xff]  ;;  %v300_v11 = vsel %vm287_vm0, %v4433_v9, 0.0  ;;  %v4443_v13 = vld [vmem:[%s4407_s27 + $0x30] sm:$0xff]  ;;  %v309_v14 = vsel %vm287_vm0, %v4440_v12, 0.0  ;;  %v4453_v17 = vld [vmem:[%s4407_s27 + $0x40] sm:$0xff] }
  0x16   : > { %v303_v10 = vsel %vm287_vm0, %v4430_v8, 0.0  ;;  %v306_v15 = vsel %vm287_vm0, %v4443_v13, 0.0  ;;  %v4450_v16 = vld [vmem:[%s4407_s27 + $0x48] sm:$0xff]  ;;  %v312_v19 = vsel %vm287_vm0, %v4453_v17, 0.0  ;;  %v4460_v20 = vld [vmem:[%s4407_s27 + $0x58] sm:$0xff]  ;;  %v4463_v21 = vld [vmem:[%s4407_s27 + $0x50] sm:$0xff] }
  0x17   : > { %v315_v18 = vsel %vm287_vm0, %v4450_v16, 0.0  ;;  %v321_v22 = vsel %vm287_vm0, %v4460_v20, 0.0  ;;  %v318_v23 = vsel %vm287_vm0, %v4463_v21, 0.0  ;;  %v4470_v24 = vld [vmem:[%s4407_s27 + $0x68] sm:$0xff]  ;;  %v4473_v25 = vld [vmem:[%s4407_s27 + $0x60] sm:$0xff]  ;;  %v4480_v28 = vld [vmem:[%s4407_s27 + $0x78] sm:$0xff] }
  0x18   : > { %v327_v26 = vsel %vm287_vm0, %v4470_v24, 0.0  ;;  %v324_v27 = vsel %vm287_vm0, %v4473_v25, 0.0  ;;  %v4483_v29 = vld [vmem:[%s4407_s27 + $0x70] sm:$0xff]  ;;  %v333_v30 = vsel %vm287_vm0, %v4480_v28, 0.0  ;;  %v4490_v32 = vld [vmem:[%s4407_s27 + $0x88] sm:$0xff]  ;;  %v4493_v33 = vld [vmem:[%s4407_s27 + $0x80] sm:$0xff] }
  0x19   : > { %298 = vadd.xlane.f32.xlu1 %v297_v6  ;;  %292 = vadd.xlane.f32.xlu0 %v291_v7  ;;  %v330_v31 = vsel %vm287_vm0, %v4483_v29, 0.0  ;;  %v339_v34 = vsel %vm287_vm0, %v4490_v32, 0.0  ;;  %v336_v35 = vsel %vm287_vm0, %v4493_v33, 0.0  ;;  %v4500_v36 = vld [vmem:[%s4407_s27 + $0x98] sm:$0xff]  ;;  %v4503_v37 = vld [vmem:[%s4407_s27 + $0x90] sm:$0xff]  ;;  %v4510_v40 = vld [vmem:[%s4407_s27 + $0xa8] sm:$0xff] }
  0x1a   : > { %v345_v38 = vsel %vm287_vm0, %v4500_v36, 0.0  ;;  %v342_v39 = vsel %vm287_vm0, %v4503_v37, 0.0  ;;  %v4513_v41 = vld [vmem:[%s4407_s27 + $0xa0] sm:$0xff]  ;;  %v351_v42 = vsel %vm287_vm0, %v4510_v40, 0.0  ;;  %v4520_v44 = vld [vmem:[%s4407_s27 + $0xb8] sm:$0xff]  ;;  %v4523_v45 = vld [vmem:[%s4407_s27 + $0xb0] sm:$0xff] }
  0x1b   : > { %v348_v43 = vsel %vm287_vm0, %v4513_v41, 0.0  ;;  %v357_v46 = vsel %vm287_vm0, %v4520_v44, 0.0  ;;  %v354_v47 = vsel %vm287_vm0, %v4523_v45, 0.0  ;;  %v4530_v48 = vld [vmem:[%s4407_s27 + $0xc8] sm:$0xff]  ;;  %v4533_v49 = vld [vmem:[%s4407_s27 + $0xc0] sm:$0xff]  ;;  %v4540_v52 = vld [vmem:[%s4407_s27 + $0xd8] sm:$0xff] }
  0x1c   : > { %v363_v50 = vsel %vm287_vm0, %v4530_v48, 0.0  ;;  %v360_v51 = vsel %vm287_vm0, %v4533_v49, 0.0  ;;  %v4543_v53 = vld [vmem:[%s4407_s27 + $0xd0] sm:$0xff]  ;;  %v369_v54 = vsel %vm287_vm0, %v4540_v52, 0.0  ;;  %v4550_v56 = vld [vmem:[%s4407_s27 + $0xe0] sm:$0xff]  ;;  %v4555_v58 = vld [vmem:[%s4407_s27 + $0xe8] sm:$0xff] }
  0x1d   : > { %304 = vadd.xlane.f32.xlu1 %v303_v10  ;;  %301 = vadd.xlane.f32.xlu0 %v300_v11  ;;  %v366_v55 = vsel %vm287_vm0, %v4543_v53, 0.0  ;;  %v372_v57 = vsel %vm287_vm0, %v4550_v56, 0.0  ;;  %v375_v59 = vsel %vm287_vm0, %v4555_v58, 0.0  ;;  %v4560_v60 = vld [vmem:[%s4407_s27 + $0xf0] sm:$0xff] }
  0x1e   : > { %v378_v61 = vsel %vm287_vm0, %v4560_v60, 0.0 }
  0x21   : > { %310 = vadd.xlane.f32.xlu1 %v309_v14  ;;  %307 = vadd.xlane.f32.xlu0 %v306_v15 }
  0x25   : > { %316 = vadd.xlane.f32.xlu1 %v315_v18  ;;  %313 = vadd.xlane.f32.xlu0 %v312_v19 }
  0x29   : > { %322 = vadd.xlane.f32.xlu1 %v321_v22  ;;  %319 = vadd.xlane.f32.xlu0 %v318_v23 }
  0x2d   : > { %328 = vadd.xlane.f32.xlu1 %v327_v26  ;;  %325 = vadd.xlane.f32.xlu0 %v324_v27 }
  0x31   : > { %334 = vadd.xlane.f32.xlu1 %v333_v30  ;;  %331 = vadd.xlane.f32.xlu0 %v330_v31 }
  0x35   : > { %340 = vadd.xlane.f32.xlu1 %v339_v34  ;;  %337 = vadd.xlane.f32.xlu0 %v336_v35  ;;  %v4584_v34 = vld [vmem:[%s4407_s27 + $0xf8] sm:$0xff] }
  0x39   : > { %346 = vadd.xlane.f32.xlu1 %v345_v38  ;;  %343 = vadd.xlane.f32.xlu0 %v342_v39 }
  0x3d   : > { %352 = vadd.xlane.f32.xlu1 %v351_v42  ;;  %349 = vadd.xlane.f32.xlu0 %v348_v43 }
  0x41   : > { %358 = vadd.xlane.f32.xlu1 %v357_v46  ;;  %355 = vadd.xlane.f32.xlu0 %v354_v47  ;;  %v381_v47 = vsel %vm287_vm0, %v4584_v34, 0.0 }
  0x45   : > { %364 = vadd.xlane.f32.xlu1 %v363_v50  ;;  %361 = vadd.xlane.f32.xlu0 %v360_v51 }
  0x49   : > { %370 = vadd.xlane.f32.xlu1 %v369_v54  ;;  %367 = vadd.xlane.f32.xlu0 %v366_v55 }
  0x4d   : > { %373 = vadd.xlane.f32.xlu1 %v372_v57 }
  0x51   : > { %376 = vadd.xlane.f32.xlu1 %v375_v59 }
  0x55   : > { %379 = vadd.xlane.f32.xlu1 %v378_v61 }
  0xa2   : > { %v296_v62 = vpop.xlane.xlu1 %295  ;;  %v290_v63 = vpop.xlane.xlu0 %289 }
  0xa3   : > { %v385_v3 = vmul.f32 0.03125, %v290_v63  ;;  %v387_v4 = vmul.f32 0.03125, %v296_v62 }
  0xa5   : > { %v4565_v6 = vsub.f32 %v4413_v1, %v385_v3  ;;  %v4570_v18 = vsub.f32 %v4410_v0, %v387_v4 }
  0xa6   : > { %v299_v7 = vpop.xlane.xlu1 %298  ;;  %v293_v10 = vpop.xlane.xlu0 %292 }
  0xa7   : > { %v388_v11 = vmul.f32 0.03125, %v299_v7  ;;  %v386_v14 = vmul.f32 0.03125, %v293_v10  ;;  %v449_v15 = vmul.f32 %v4565_v6, %v4565_v6  ;;  %v451_v38 = vmul.f32 %v4570_v18, %v4570_v18 }
  0xa9   : > { %v4573_v19 = vsub.f32 %v4416_v2, %v388_v11  ;;  %v4576_v22 = vsub.f32 %v4423_v5, %v386_v14  ;;  %v481_v1 = vsel %vm287_vm0, %v449_v15, 0.0  ;;  %v487_v54 = vsel %vm287_vm0, %v451_v38, 0.0 }
  0xaa   : > { %v305_v23 = vpop.xlane.xlu1 %304  ;;  %482 = vadd.xlane.f32.xlu0 %v481_v1  ;;  %v302_v26 = vpop.xlane.xlu0 %301 }
  0xab   : > { %v390_v27 = vmul.f32 0.03125, %v305_v23  ;;  %v452_v30 = vmul.f32 %v4573_v19, %v4573_v19  ;;  %v450_v31 = vmul.f32 %v4576_v22, %v4576_v22  ;;  %v389_v0 = vmul.f32 0.03125, %v302_v26 }
  0xad   : > { %v490_v2 = vsel %vm287_vm0, %v452_v30, 0.0  ;;  %v484_v5 = vsel %vm287_vm0, %v450_v31, 0.0  ;;  %v4589_v35 = vsub.f32 %v4433_v9, %v389_v0  ;;  %v4594_v39 = vsub.f32 %v4430_v8, %v390_v27 }
  0xae   : > { %491 = vadd.xlane.f32.xlu1 %v490_v2  ;;  %v311_v42 = vpop.xlane.xlu1 %310  ;;  %485 = vadd.xlane.f32.xlu0 %v484_v5  ;;  %v308_v43 = vpop.xlane.xlu0 %307 }
  0xaf   : > { %v392_v46 = vmul.f32 0.03125, %v311_v42  ;;  %v453_v50 = vmul.f32 %v4589_v35, %v4589_v35  ;;  %v391_v51 = vmul.f32 0.03125, %v308_v43  ;;  %v454_v57 = vmul.f32 %v4594_v39, %v4594_v39 }
  0xb1   : > { %v4601_v9 = vsub.f32 %v4440_v12, %v392_v46  ;;  %v493_v55 = vsel %vm287_vm0, %v453_v50, 0.0  ;;  %v4610_v63 = vsub.f32 %v4443_v13, %v391_v51  ;;  %v496_v10 = vsel %vm287_vm0, %v454_v57, 0.0 }
  0xb2   : > { %382 = vadd.xlane.f32.xlu1 %v381_v47  ;;  %v317_v8 = vpop.xlane.xlu1 %316  ;;  %488 = vadd.xlane.f32.xlu0 %v487_v54  ;;  %v314_v59 = vpop.xlane.xlu0 %313 }
  0xb3   : > { %v394_v61 = vmul.f32 0.03125, %v317_v8  ;;  %v456_v62 = vmul.f32 %v4601_v9, %v4601_v9  ;;  %v393_v12 = vmul.f32 0.03125, %v314_v59  ;;  %v455_v1 = vmul.f32 %v4610_v63, %v4610_v63 }
  0xb5   : > { %v4613_v3 = vsub.f32 %v4450_v16, %v394_v61  ;;  %v502_v4 = vsel %vm287_vm0, %v456_v62, 0.0  ;;  %v4618_v11 = vsub.f32 %v4453_v17, %v393_v12  ;;  %v499_v5 = vsel %vm287_vm0, %v455_v1, 0.0 }
  0xb6   : > { %503 = vadd.xlane.f32.xlu1 %v502_v4  ;;  %v323_v7 = vpop.xlane.xlu1 %322  ;;  %494 = vadd.xlane.f32.xlu0 %v493_v55  ;;  %v320_v14 = vpop.xlane.xlu0 %319 }
  0xb7   : > { %v396_v15 = vmul.f32 0.03125, %v323_v7  ;;  %v458_v13 = vmul.f32 %v4613_v3, %v4613_v3  ;;  %v395_v16 = vmul.f32 0.03125, %v320_v14  ;;  %v457_v30 = vmul.f32 %v4618_v11, %v4618_v11  ;;  %v705_v7 = vld [vmem:[%s6216_s1] sm:$0xff] }
  0xb9   : > { %v4625_v23 = vsub.f32 %v4460_v20, %v396_v15  ;;  %v508_v26 = vsel %vm287_vm0, %v458_v13, 0.0  ;;  %v4629_v17 = vsub.f32 %v4463_v21, %v395_v16  ;;  %v505_v21 = vsel %vm287_vm0, %v457_v30, 0.0 }
  0xba   : > { %509 = vadd.xlane.f32.xlu1 %v508_v26  ;;  %v329_v27 = vpop.xlane.xlu1 %328  ;;  %497 = vadd.xlane.f32.xlu0 %v496_v10  ;;  %v326_v31 = vpop.xlane.xlu0 %325  ;;  %v706_v10 = vld [vmem:[%s6216_s1 + $0x8] sm:$0xff] }
  0xbb   : > { %v398_v0 = vmul.f32 0.03125, %v329_v27  ;;  %v460_v2 = vmul.f32 %v4625_v23, %v4625_v23  ;;  %v397_v20 = vmul.f32 0.03125, %v326_v31  ;;  %v459_v46 = vmul.f32 %v4629_v17, %v4629_v17 }
  0xbc   : > { %v3672_v14 = vpack.c.bf16 %v706_v10, %v705_v7 }
  0xbd   : > { %v4637_v38 = vsub.f32 %v4470_v24, %v398_v0  ;;  %v514_v42 = vsel %vm287_vm0, %v460_v2, 0.0  ;;  %v4646_v54 = vsub.f32 %v4473_v25, %v397_v20  ;;  %v511_v59 = vsel %vm287_vm0, %v459_v46, 0.0  ;;  %v707_v0 = vld [vmem:[%s6216_s1 + $0x10] sm:$0xff] }
  0xbe   : > { %515 = vadd.xlane.f32.xlu1 %v514_v42  ;;  %v335_v43 = vpop.xlane.xlu1 %334  ;;  %500 = vadd.xlane.f32.xlu0 %v499_v5  ;;  %v332_v47 = vpop.xlane.xlu0 %331 }
  0xbf   : > { %v400_v50 = vmul.f32 0.03125, %v335_v43  ;;  %v462_v51 = vmul.f32 %v4637_v38, %v4637_v38  ;;  %v399_v24 = vmul.f32 0.03125, %v332_v47  ;;  %v461_v4 = vmul.f32 %v4646_v54, %v4646_v54  ;;  %3673 = vmatprep.subr.bf16.mxu0 %v3672_v14 }
  0xc0   : > { %3675 = vmatpush3.bf16.msra.mxu0 %v3672_v14 }
  0xc1   : > { %v4649_v8 = vsub.f32 %v4480_v28, %v400_v50  ;;  %v520_v55 = vsel %vm287_vm0, %v462_v51, 0.0  ;;  %v4654_v61 = vsub.f32 %v4483_v29, %v399_v24  ;;  %v517_v31 = vsel %vm287_vm0, %v461_v4, 0.0 }
  0xc2   : > { %521 = vadd.xlane.f32.xlu1 %v520_v55  ;;  %v341_v57 = vpop.xlane.xlu1 %340  ;;  %506 = vadd.xlane.f32.xlu0 %v505_v21  ;;  %v338_v62 = vpop.xlane.xlu0 %337 }
  0xc3   : > { %v402_v12 = vmul.f32 0.03125, %v341_v57  ;;  %v464_v25 = vmul.f32 %v4649_v8, %v4649_v8  ;;  %v401_v28 = vmul.f32 0.03125, %v338_v62  ;;  %v463_v16 = vmul.f32 %v4654_v61, %v4654_v61 }
  0xc5   : > { %v4667_v29 = vsub.f32 %v4490_v32, %v402_v12  ;;  %v526_v15 = vsel %vm287_vm0, %v464_v25, 0.0  ;;  %v4671_v1 = vsub.f32 %v4493_v33, %v401_v28  ;;  %v708_v33 = vld [vmem:[%s6216_s1 + $0x18] sm:$0xff]  ;;  %v523_v43 = vsel %vm287_vm0, %v463_v16, 0.0 }
  0xc6   : > { %527 = vadd.xlane.f32.xlu1 %v526_v15  ;;  %v347_v13 = vpop.xlane.xlu1 %346  ;;  %512 = vadd.xlane.f32.xlu0 %v511_v59  ;;  %v344_v26 = vpop.xlane.xlu0 %343  ;;  %v3676_v2 = vpack.c.bf16 %v708_v33, %v707_v0 }
  0xc7   : > { %v404_v27 = vmul.f32 0.03125, %v347_v13  ;;  %v466_v30 = vmul.f32 %v4667_v29, %v4667_v29  ;;  %v403_v32 = vmul.f32 0.03125, %v344_v26  ;;  %v465_v21 = vmul.f32 %v4671_v1, %v4671_v1 }
  0xc8   : > { %3677 = vmatprep.subr.bf16.mxu0 %v3676_v2 }
  0xc9   : > { %v4685_v5 = vsub.f32 %v4500_v36, %v404_v27  ;;  %v532_v20 = vsel %vm287_vm0, %v466_v30, 0.0  ;;  %v4694_v51 = vsub.f32 %v4503_v37, %v403_v32  ;;  %3679 = vmatpush3.bf16.msra.mxu0 %v3676_v2  ;;  %v529_v59 = vsel %vm287_vm0, %v465_v21, 0.0 }
  0xca   : > { %533 = vadd.xlane.f32.xlu1 %v532_v20  ;;  %v353_v42 = vpop.xlane.xlu1 %352  ;;  %518 = vadd.xlane.f32.xlu0 %v517_v31  ;;  %v350_v46 = vpop.xlane.xlu0 %349 }
  0xcb   : > { %v406_v47 = vmul.f32 0.03125, %v353_v42  ;;  %v468_v50 = vmul.f32 %v4685_v5, %v4685_v5  ;;  %v405_v36 = vmul.f32 0.03125, %v350_v46  ;;  %v467_v4 = vmul.f32 %v4694_v51, %v4694_v51 }
  0xcd   : > { %v4697_v24 = vsub.f32 %v4510_v40, %v406_v47  ;;  %v538_v55 = vsel %vm287_vm0, %v468_v50, 0.0  ;;  %v4702_v62 = vsub.f32 %v4513_v41, %v405_v36  ;;  %v535_v26 = vsel %vm287_vm0, %v467_v4, 0.0 }
  0xce   : > { %539 = vadd.xlane.f32.xlu1 %v538_v55  ;;  %v359_v57 = vpop.xlane.xlu1 %358  ;;  %524 = vadd.xlane.f32.xlu0 %v523_v43  ;;  %v356_v12 = vpop.xlane.xlu0 %355 }
  0xcf   : > { %v408_v25 = vmul.f32 0.03125, %v359_v57  ;;  %v470_v37 = vmul.f32 %v4697_v24, %v4697_v24  ;;  %v407_v40 = vmul.f32 0.03125, %v356_v12  ;;  %v469_v14 = vmul.f32 %v4702_v62, %v4702_v62 }
  0xd1   : > { %v4709_v28 = vsub.f32 %v4520_v44, %v408_v25  ;;  %v544_v7 = vsel %vm287_vm0, %v470_v37, 0.0  ;;  %v4713_v41 = vsub.f32 %v4523_v45, %v407_v40  ;;  %v541_v45 = vsel %vm287_vm0, %v469_v14, 0.0 }
  0xd2   : > { %545 = vadd.xlane.f32.xlu1 %v544_v7  ;;  %v365_v10 = vpop.xlane.xlu1 %364  ;;  %530 = vadd.xlane.f32.xlu0 %v529_v59  ;;  %v362_v15 = vpop.xlane.xlu0 %361 }
  0xd3   : > { %v410_v13 = vmul.f32 0.03125, %v365_v10  ;;  %v472_v16 = vmul.f32 %v4709_v28, %v4709_v28  ;;  %v409_v44 = vmul.f32 0.03125, %v362_v15  ;;  %v471_v32 = vmul.f32 %v4713_v41, %v4713_v41 }
  0xd5   : > { %v4721_v27 = vsub.f32 %v4530_v48, %v410_v13  ;;  %v550_v30 = vsel %vm287_vm0, %v472_v16, 0.0  ;;  %v4730_v20 = vsub.f32 %v4533_v49, %v409_v44  ;;  %v547_v46 = vsel %vm287_vm0, %v471_v32, 0.0 }
  0xd6   : > { %551 = vadd.xlane.f32.xlu1 %v550_v30  ;;  %v371_v31 = vpop.xlane.xlu1 %370  ;;  %536 = vadd.xlane.f32.xlu0 %v535_v26  ;;  %v368_v0 = vpop.xlane.xlu0 %367 }
  0xd7   : > { %v412_v33 = vmul.f32 0.03125, %v371_v31  ;;  %v474_v2 = vmul.f32 %v4721_v27, %v4721_v27  ;;  %v411_v48 = vmul.f32 0.03125, %v368_v0  ;;  %v473_v49 = vmul.f32 %v4730_v20, %v4730_v20 }
  0xd9   : > { %v4733_v42 = vsub.f32 %v4540_v52, %v412_v33  ;;  %v556_v43 = vsel %vm287_vm0, %v474_v2, 0.0  ;;  %v4740_v36 = vsub.f32 %v4543_v53, %v411_v48  ;;  %v553_v12 = vsel %vm287_vm0, %v473_v49, 0.0 }
  0xda   : > { %557 = vadd.xlane.f32.xlu1 %v556_v43  ;;  %v374_v21 = vpop.xlane.xlu1 %373  ;;  %542 = vadd.xlane.f32.xlu0 %v541_v45 }
  0xdb   : > { %v413_v47 = vmul.f32 0.03125, %v374_v21  ;;  %v476_v50 = vmul.f32 %v4733_v42, %v4733_v42  ;;  %v475_v25 = vmul.f32 %v4740_v36, %v4740_v36 }
  0xdd   : > { %v562_v52 = vsel %vm287_vm0, %v476_v50, 0.0  ;;  %v4746_v57 = vsub.f32 %v4550_v56, %v413_v47  ;;  %v559_v7 = vsel %vm287_vm0, %v475_v25, 0.0 }
  0xde   : > { %563 = vadd.xlane.f32.xlu1 %v562_v52  ;;  %v377_v55 = vpop.xlane.xlu1 %376  ;;  %548 = vadd.xlane.f32.xlu0 %v547_v46 }
  0xdf   : > { %v414_v59 = vmul.f32 0.03125, %v377_v55  ;;  %v477_v56 = vmul.f32 %v4746_v57, %v4746_v57 }
  0xe1   : > { %v4752_v53 = vsub.f32 %v4555_v58, %v414_v59  ;;  %v565_v58 = vsel %vm287_vm0, %v477_v56, 0.0 }
  0xe2   : > { %554 = vadd.xlane.f32.xlu0 %v553_v12  ;;  %v380_v37 = vpop.xlane.xlu1 %379 }
  0xe3   : > { %v478_v4 = vmul.f32 %v4752_v53, %v4752_v53  ;;  %v415_v40 = vmul.f32 0.03125, %v380_v37 }
  0xe5   : > { %v568_v10 = vsel %vm287_vm0, %v478_v4, 0.0  ;;  %v4761_v14 = vsub.f32 %v4560_v60, %v415_v40 }
  0xe6   : > { %569 = vadd.xlane.f32.xlu1 %v568_v10  ;;  %560 = vadd.xlane.f32.xlu0 %v559_v7 }
  0xe7   : > { %v479_v15 = vmul.f32 %v4761_v14, %v4761_v14 }
  0xe9   : > { %v571_v13 = vsel %vm287_vm0, %v479_v15, 0.0 }
  0xea   : > { %566 = vadd.xlane.f32.xlu0 %v565_v58 }
  0xee   : > { %572 = vadd.xlane.f32.xlu0 %v571_v13 }
 0x137   : > { %v483_v16 = vpop.xlane.xlu0 %482 }
 0x138   : > { %v577_v26 = vmul.f32 0.03125, %v483_v16 }
 0x13a   : > { %v609_v44 = vadd.f32 1e-05, %v577_v26 }
 0x13b   : > { %v492_v30 = vpop.xlane.xlu1 %491  ;;  %v486_v31 = vpop.xlane.xlu0 %485 }
 0x13c   : > { %3960 = vrsqrt.f32 %v609_v44  ;;  %v580_v45 = vmul.f32 0.03125, %v492_v30  ;;  %v578_v60 = vmul.f32 0.03125, %v486_v31 }
 0x13e   : > { %v610_v32 = vadd.f32 1e-05, %v578_v60  ;;  %v612_v0 = vadd.f32 1e-05, %v580_v45 }
 0x13f   : > { %v383_v33 = vpop.xlane.xlu1 %382  ;;  %v489_v2 = vpop.xlane.xlu0 %488 }
 0x140   : > { %v416_v48 = vmul.f32 0.03125, %v383_v33  ;;  %v579_v43 = vmul.f32 0.03125, %v489_v2  ;;  %3962 = vrsqrt.f32 %v610_v32 }
 0x141   : > { %3964 = vrsqrt.f32 %v612_v0 }
 0x142   : > { %v4768_v21 = vsub.f32 %v4584_v34, %v416_v48  ;;  %v611_v46 = vadd.f32 1e-05, %v579_v43 }
 0x143   : > { %v504_v47 = vpop.xlane.xlu1 %503  ;;  %v495_v50 = vpop.xlane.xlu0 %494 }
 0x144   : > { %3966 = vrsqrt.f32 %v611_v46  ;;  %v581_v49 = vmul.f32 0.03125, %v495_v50  ;;  %v480_v52 = vmul.f32 %v4768_v21, %v4768_v21  ;;  %v584_v25 = vmul.f32 0.03125, %v504_v47 }
 0x146   : > { %v3961_v55 = vpop.eup %3960  ;;  %v613_v59 = vadd.f32 1e-05, %v581_v49  ;;  %v574_v12 = vsel %vm287_vm0, %v480_v52, 0.0  ;;  %v616_v10 = vadd.f32 1e-05, %v584_v25 }
 0x147   : > { %575 = vadd.xlane.f32.xlu1 %v574_v12  ;;  %v510_v37 = vpop.xlane.xlu1 %509  ;;  %v498_v4 = vpop.xlane.xlu0 %497  ;;  %v673_v34 = vmul.f32 %v3961_v55, %v4565_v6 }
 0x148   : > { %v582_v40 = vmul.f32 0.03125, %v498_v4  ;;  %3968 = vrsqrt.f32 %v613_v59  ;;  %v586_v13 = vmul.f32 0.03125, %v510_v37 }
 0x149   : > { %3568 = vmatprep.mubr.msk.f32.mxu0 %vm287_vm0, %v673_v34 }
 0x14a   : > { %v614_v7 = vadd.f32 1e-05, %v582_v40  ;;  %v3963_v56 = vpop.eup %3962  ;;  %v618_v32 = vadd.f32 1e-05, %v586_v13 }
 0x14b   : > { %v516_v58 = vpop.xlane.xlu1 %515  ;;  %v501_v15 = vpop.xlane.xlu0 %500  ;;  %v674_v26 = vmul.f32 %v3963_v56, %v4576_v22 }
 0x14c   : > { %v583_v16 = vmul.f32 0.03125, %v501_v15  ;;  %v3965_v44 = vpop.eup %3964  ;;  %3970 = vrsqrt.f32 %v614_v7  ;;  %v588_v0 = vmul.f32 0.03125, %v516_v58 }
 0x14d   : > { %3569 = vmatmul.mubr.msk.f32.vlgmr.msra.gmra.mrb[0].mxu0 %vm287_vm0, %v674_v26  ;;  %3972 = vrsqrt.f32 %v616_v10  ;;  %v676_v2 = vmul.f32 %v3965_v44, %v4573_v19 }
 0x14e   : > { %v3967_v30 = vpop.eup %3966  ;;  %v615_v31 = vadd.f32 1e-05, %v583_v16  ;;  %v620_v50 = vadd.f32 1e-05, %v588_v0 }
 0x14f   : > { %v522_v6 = vpop.xlane.xlu1 %521  ;;  %v507_v45 = vpop.xlane.xlu0 %506  ;;  %v675_v60 = vmul.f32 %v3967_v30, %v4570_v18 }
 0x150   : > { %v585_v33 = vmul.f32 0.03125, %v507_v45  ;;  %3974 = vrsqrt.f32 %v615_v31  ;;  %v590_v43 = vmul.f32 0.03125, %v522_v6 }
 0x151   : > { %3571 = vmatprep.mubr.msk.f32.mxu0 %vm287_vm0, %v675_v60  ;;  %3976 = vrsqrt.f32 %v618_v32 }
 0x152   : > { %v617_v22 = vadd.f32 1e-05, %v585_v33  ;;  %3572 = vmatmul.mubr.msk.f32.gmra.mrb[2].mxu0 %vm287_vm0, %v676_v2  ;;  %v3969_v48 = vpop.eup %3968  ;;  %v622_v55 = vadd.f32 1e-05, %v590_v43 }
 0x153   : > { %v528_v46 = vpop.xlane.xlu1 %527  ;;  %v513_v47 = vpop.xlane.xlu0 %512  ;;  %v677_v18 = vmul.f32 %v3969_v48, %v4589_v35 }
 0x154   : > { %v587_v49 = vmul.f32 0.03125, %v513_v47  ;;  %3978 = vrsqrt.f32 %v617_v22  ;;  %v592_v25 = vmul.f32 0.03125, %v528_v46 }
 0x155   : > { %3574 = vmatprep.mubr.msk.f32.mxu0 %vm287_vm0, %v677_v18  ;;  %3980 = vrsqrt.f32 %v620_v50 }
 0x156   : > { %v619_v52 = vadd.f32 1e-05, %v587_v49  ;;  %v3971_v19 = vpop.eup %3970  ;;  %v624_v10 = vadd.f32 1e-05, %v592_v25 }
 0x157   : > { %v534_v59 = vpop.xlane.xlu1 %533  ;;  %v519_v12 = vpop.xlane.xlu0 %518  ;;  %v678_v4 = vmul.f32 %v3971_v19, %v4594_v39 }
 0x158   : > { %v589_v37 = vmul.f32 0.03125, %v519_v12  ;;  %v3973_v34 = vpop.eup %3972  ;;  %3982 = vrsqrt.f32 %v619_v52  ;;  %v594_v58 = vmul.f32 0.03125, %v534_v59 }
 0x159   : > { %3575 = vmatmul.mubr.msk.f32.gmra.mrb[4].mxu0 %vm287_vm0, %v678_v4  ;;  %3984 = vrsqrt.f32 %v622_v55  ;;  %v680_v16 = vmul.f32 %v3973_v34, %v4601_v9 }
 0x15a   : > { %v621_v40 = vadd.f32 1e-05, %v589_v37  ;;  %v3975_v7 = vpop.eup %3974  ;;  %v626_v45 = vadd.f32 1e-05, %v594_v58 }
 0x15b   : > { %v540_v35 = vpop.xlane.xlu1 %539  ;;  %v525_v56 = vpop.xlane.xlu0 %524  ;;  %v679_v13 = vmul.f32 %v3975_v7, %v4610_v63 }
 0x15c   : > { %v591_v15 = vmul.f32 0.03125, %v525_v56  ;;  %3986 = vrsqrt.f32 %v621_v40  ;;  %v3977_v26 = vpop.eup %3976  ;;  %v596_v30 = vmul.f32 0.03125, %v540_v35 }
 0x15d   : > { %3577 = vmatprep.mubr.msk.f32.mxu0 %vm287_vm0, %v679_v13  ;;  %3988 = vrsqrt.f32 %v624_v10  ;;  %v682_v63 = vmul.f32 %v3977_v26, %v4613_v3 }
 0x15e   : > { %v623_v44 = vadd.f32 1e-05, %v591_v15  ;;  %v3979_v39 = vpop.eup %3978  ;;  %3578 = vmatmul.mubr.msk.f32.gmra.mrb[6].mxu0 %vm287_vm0, %v680_v16  ;;  %v628_v2 = vadd.f32 1e-05, %v596_v30 }
 0x15f   : > { %v546_v31 = vpop.xlane.xlu1 %545  ;;  %v531_v6 = vpop.xlane.xlu0 %530  ;;  %v681_v32 = vmul.f32 %v3979_v39, %v4618_v11 }
 0x160   : > { %v593_v60 = vmul.f32 0.03125, %v531_v6  ;;  %3990 = vrsqrt.f32 %v623_v44  ;;  %v3981_v0 = vpop.eup %3980  ;;  %v598_v43 = vmul.f32 0.03125, %v546_v31 }
 0x161   : > { %3580 = vmatprep.mubr.msk.f32.mxu0 %vm287_vm0, %v681_v32  ;;  %3992 = vrsqrt.f32 %v626_v45  ;;  %v684_v11 = vmul.f32 %v3981_v0, %v4625_v23 }
 0x162   : > { %v625_v9 = vadd.f32 1e-05, %v593_v60  ;;  %v3983_v33 = vpop.eup %3982  ;;  %3581 = vmatmul.mubr.msk.f32.gmra.mrb[8].mxu0 %vm287_vm0, %v682_v63  ;;  %v630_v19 = vadd.f32 1e-05, %v598_v43 }
 0x163   : > { %v552_v22 = vpop.xlane.xlu1 %551  ;;  %v537_v48 = vpop.xlane.xlu0 %536  ;;  %v683_v47 = vmul.f32 %v3983_v33, %v4629_v17 }
 0x164   : > { %v595_v46 = vmul.f32 0.03125, %v537_v48  ;;  %v3985_v50 = vpop.eup %3984  ;;  %3994 = vrsqrt.f32 %v625_v9  ;;  %v600_v55 = vmul.f32 0.03125, %v552_v22 }
 0x165   : > { %3583 = vmatprep.mubr.msk.f32.mxu0 %vm287_vm0, %v683_v47  ;;  %3996 = vrsqrt.f32 %v628_v2  ;;  %v686_v17 = vmul.f32 %v3985_v50, %v4637_v38 }
 0x166   : > { %v627_v3 = vadd.f32 1e-05, %v595_v46  ;;  %v3987_v49 = vpop.eup %3986  ;;  %3584 = vmatmul.mubr.msk.f32.gmra.mrb[10].mxu0 %vm287_vm0, %v684_v11  ;;  %v632_v40 = vadd.f32 1e-05, %v600_v55 }
 0x167   : > { %v558_v18 = vpop.xlane.xlu1 %557  ;;  %v543_v52 = vpop.xlane.xlu0 %542  ;;  %v685_v12 = vmul.f32 %v3987_v49, %v4646_v54 }
 0x168   : > { %v597_v59 = vmul.f32 0.03125, %v543_v52  ;;  %3998 = vrsqrt.f32 %v627_v3  ;;  %v3989_v25 = vpop.eup %3988  ;;  %v602_v4 = vmul.f32 0.03125, %v558_v18 }
 0x169   : > { %3586 = vmatprep.mubr.msk.f32.mxu0 %vm287_vm0, %v685_v12  ;;  %4000 = vrsqrt.f32 %v630_v19  ;;  %v688_v54 = vmul.f32 %v3989_v25, %v4649_v8 }
 0x16a   : > { %v629_v37 = vadd.f32 1e-05, %v597_v59  ;;  %v3991_v23 = vpop.eup %3990  ;;  %3587 = vmatmul.mubr.msk.f32.gmra.mrb[12].mxu0 %vm287_vm0, %v686_v17  ;;  %v634_v15 = vadd.f32 1e-05, %v602_v4 }
 0x16b   : > { %v549_v34 = vpop.xlane.xlu0 %548  ;;  %v564_v7 = vpop.xlane.xlu1 %563  ;;  %v687_v56 = vmul.f32 %v3991_v23, %v4654_v61 }
 0x16c   : > { %v599_v35 = vmul.f32 0.03125, %v549_v34  ;;  %4002 = vrsqrt.f32 %v629_v37  ;;  %v3993_v10 = vpop.eup %3992  ;;  %v604_v13 = vmul.f32 0.03125, %v564_v7 }
 0x16d   : > { %3589 = vmatprep.mubr.msk.f32.mxu0 %vm287_vm0, %v687_v56  ;;  %4004 = vrsqrt.f32 %v632_v40  ;;  %v690_v61 = vmul.f32 %v3993_v10, %v4667_v29 }
 0x16e   : > { %v631_v38 = vadd.f32 1e-05, %v599_v35  ;;  %v3995_v58 = vpop.eup %3994  ;;  %3590 = vmatmul.mubr.msk.f32.gmra.mrb[14].mxu0 %vm287_vm0, %v688_v54  ;;  %v636_v31 = vadd.f32 1e-05, %v604_v13 }
 0x16f   : > { %v555_v16 = vpop.xlane.xlu0 %554  ;;  %v689_v44 = vmul.f32 %v3995_v58, %v4671_v1  ;;  %v3997_v39 = vpop.eup %3996 }
 0x170   : > { %v601_v26 = vmul.f32 0.03125, %v555_v16  ;;  %4006 = vrsqrt.f32 %v631_v38  ;;  %v692_v1 = vmul.f32 %v3997_v39, %v4685_v5 }
 0x171   : > { %3592 = vmatprep.mubr.msk.f32.mxu0 %vm287_vm0, %v689_v44  ;;  %4008 = vrsqrt.f32 %v634_v15 }
 0x172   : > { %v633_v30 = vadd.f32 1e-05, %v601_v26  ;;  %v3999_v8 = vpop.eup %3998  ;;  %3593 = vmatmul.mubr.msk.f32.gmra.mrb[16].mxu0 %vm287_vm0, %v690_v61 }
 0x173   : > { %v570_v6 = vpop.xlane.xlu1 %569  ;;  %v561_v45 = vpop.xlane.xlu0 %560  ;;  %v691_v63 = vmul.f32 %v3999_v8, %v4694_v51 }
 0x174   : > { %4010 = vrsqrt.f32 %v633_v30  ;;  %v606_v60 = vmul.f32 0.03125, %v570_v6  ;;  %v603_v32 = vmul.f32 0.03125, %v561_v45  ;;  %v4001_v0 = vpop.eup %4000 }
 0x175   : > { %3595 = vmatprep.mubr.msk.f32.mxu0 %vm287_vm0, %v691_v63  ;;  %4012 = vrsqrt.f32 %v636_v31  ;;  %v694_v43 = vmul.f32 %v4001_v0, %v4697_v24 }
 0x176   : > { %v635_v9 = vadd.f32 1e-05, %v603_v32  ;;  %v4003_v29 = vpop.eup %4002  ;;  %v638_v33 = vadd.f32 1e-05, %v606_v60  ;;  %3596 = vmatmul.mubr.msk.f32.gmra.mrb[18].mxu0 %vm287_vm0, %v692_v1 }
 0x177   : > { %v567_v2 = vpop.xlane.xlu0 %566  ;;  %v693_v48 = vmul.f32 %v4003_v29, %v4702_v62  ;;  %v4005_v46 = vpop.eup %4004 }
 0x178   : > { %v605_v22 = vmul.f32 0.03125, %v567_v2  ;;  %4014 = vrsqrt.f32 %v635_v9  ;;  %v696_v49 = vmul.f32 %v4005_v46, %v4709_v28 }
 0x179   : > { %3598 = vmatprep.mubr.msk.f32.mxu0 %vm287_vm0, %v693_v48  ;;  %4016 = vrsqrt.f32 %v638_v33 }
 0x17a   : > { %v637_v51 = vadd.f32 1e-05, %v605_v22  ;;  %v4007_v5 = vpop.eup %4006  ;;  %3599 = vmatmul.mubr.msk.f32.gmra.mrb[20].mxu0 %vm287_vm0, %v694_v43 }
 0x17b   : > { %v573_v47 = vpop.xlane.xlu0 %572  ;;  %v695_v11 = vmul.f32 %v4007_v5, %v4713_v41  ;;  %v4009_v3 = vpop.eup %4008 }
 0x17c   : > { %4018 = vrsqrt.f32 %v637_v51  ;;  %v607_v50 = vmul.f32 0.03125, %v573_v47  ;;  %v698_v52 = vmul.f32 %v4009_v3, %v4721_v27 }
 0x17d   : > { %3601 = vmatprep.mubr.msk.f32.mxu0 %vm287_vm0, %v695_v11 }
 0x17e   : > { %v4011_v62 = vpop.eup %4010  ;;  %v639_v18 = vadd.f32 1e-05, %v607_v50  ;;  %3602 = vmatmul.mubr.msk.f32.gmra.mrb[22].mxu0 %vm287_vm0, %v696_v49 }
 0x17f   : > { %v697_v24 = vmul.f32 %v4011_v62, %v4730_v20  ;;  %v4013_v19 = vpop.eup %4012 }
 0x180   : > { %4020 = vrsqrt.f32 %v639_v18  ;;  %v700_v59 = vmul.f32 %v4013_v19, %v4733_v42 }
 0x181   : > { %3604 = vmatprep.mubr.msk.f32.mxu0 %vm287_vm0, %v697_v24 }
 0x182   : > { %v4015_v55 = vpop.eup %4014  ;;  %3605 = vmatmul.mubr.msk.f32.gmra.mrb[24].mxu0 %vm287_vm0, %v698_v52 }
 0x183   : > { %v699_v41 = vmul.f32 %v4015_v55, %v4740_v36  ;;  %v4017_v28 = vpop.eup %4016 }
 0x184   : > { %v702_v27 = vmul.f32 %v4017_v28, %v4752_v53 }
 0x185   : > { %3607 = vmatprep.mubr.msk.f32.mxu0 %vm287_vm0, %v699_v41 }
 0x186   : > { %v4019_v12 = vpop.eup %4018  ;;  %3608 = vmatmul.mubr.msk.f32.gmra.mrb[26].mxu0 %vm287_vm0, %v700_v59 }
 0x187   : > { %v701_v20 = vmul.f32 %v4019_v12, %v4746_v57  ;;  %v4840_v57 = vld [vmem:[%s6217_s2] ss:$0 sm:$0xff] }
 0x189   : > { %3610 = vmatprep.mubr.msk.f32.mxu0 %vm287_vm0, %v701_v20 }
 0x18a   : > { %v4021_v17 = vpop.eup %4020  ;;  %3611 = vmatmul.mubr.msk.f32.gmra.mrb[28].mxu0 %vm287_vm0, %v702_v27 }
 0x18b   : > { %v703_v25 = vmul.f32 %v4021_v17, %v4761_v14 }
 0x18d   : > { %3613 = vmatprep.mubr.msk.f32.mxu0 %vm287_vm0, %v703_v25 }
 0x1d4   : > { %v576_v36 = vpop.xlane.xlu1 %575 }
 0x1d5   : > { %v608_v42 = vmul.f32 0.03125, %v576_v36 }
 0x1d7   : > { %v640_v37 = vadd.f32 1e-05, %v608_v42 }
 0x1d9   : > { %4022 = vrsqrt.f32 %v640_v37 }
 0x1e3   : > { %v4023_v23 = vpop.eup %4022 }
 0x1e4   : > { %v704_v4 = vmul.f32 %v4023_v23, %v4768_v21 }
 0x1e6   : > { %3614 = vmatmul.mubr.msk.f32.gmra.mrb[30].mxu0 %vm287_vm0, %v704_v4 }
 0x220   : > { %v3570_v53 = vpop.f32.mrb[0].mxu0 }
 0x221   : > { %v4843_v34 = vadd.f32 %v3570_v53, %v4840_v57  ;;  %v878_v14 = vpop.f32.mrb[1].mxu0 }
 0x222   : > { %v4846_v40 = vadd.f32 %v4840_v57, %v878_v14 }
 0x223   : > { %6284 = vst [vmem:[#allocation2_spill] sm:$0xff] %v4843_v34 }
 0x224   : > { %6285 = vst [vmem:[#allocation3_spill] sm:$0xff] %v4846_v40  ;;  %3460 = vmatprep.mubr.msk.f32.mxu1 %vm287_vm0, %v4846_v40  ;;  %v4852_v21 = vpack.i.bf16 %v4843_v34, %v4846_v40 }
 0x225   : > { %v3573_v7 = vpop.f32.mrb[2].mxu0 }
 0x226   : > { %v888_v35 = vpop.f32.mrb[3].mxu0  ;;  %3806 = vrot.lane.b32.xlu1 %v4852_v21, %s4352_s14  ;;  %v4879_v0 = vadd.f32 %v3573_v7, %v4840_v57 }
 0x227   : > { %v4882_v9 = vadd.f32 %v4840_v57, %v888_v35 }
 0x228   : > { %6290 = vst [vmem:[#allocation8_spill] sm:$0xff] %v4879_v0 }
 0x229   : > { %6291 = vst [vmem:[#allocation9_spill] sm:$0xff] %v4882_v9  ;;  %v3815_v5 = vpack.i.bf16 %v4879_v0, %v4882_v9 }
 0x22c   : > { %v3576_v56 = vpop.f32.mrb[4].mxu0 }
 0x22d   : > { %v898_v54 = vpop.f32.mrb[5].mxu0  ;;  %v4897_v43 = vadd.f32 %v3576_v56, %v4840_v57 }
 0x22e   : > { %v4900_v46 = vadd.f32 %v4840_v57, %v898_v54 }
 0x22f   : > { %6294 = vst [vmem:[#allocation12_spill] sm:$0xff] %v4897_v43 }
 0x230   : > { %6295 = vst [vmem:[#allocation13_spill] sm:$0xff] %v4900_v46  ;;  %v4922_v24 = vpack.i.bf16 %v4897_v43, %v4900_v46 }
 0x231   : > { %v3579_v10 = vpop.f32.mrb[6].mxu0 }
 0x232   : > { %v908_v38 = vpop.f32.mrb[7].mxu0  ;;  %v4915_v49 = vadd.f32 %v3579_v10, %v4840_v57 }
 0x233   : > { %v4918_v62 = vadd.f32 %v4840_v57, %v908_v38 }
 0x234   : > { %6298 = vst [vmem:[#allocation16_spill] sm:$0xff] %v4915_v49 }
 0x235   : > { %v3582_v58 = vpop.f32.mrb[8].mxu0  ;;  %6299 = vst [vmem:[#allocation17_spill] sm:$0xff] %v4918_v62  ;;  %v4946_v20 = vpack.i.bf16 %v4915_v49, %v4918_v62 }
 0x236   : > { %v918_v15 = vpop.f32.mrb[9].mxu0  ;;  %v4939_v28 = vadd.f32 %v3582_v58, %v4840_v57 }
 0x237   : > { %v4942_v59 = vadd.f32 %v4840_v57, %v918_v15 }
 0x238   : > { %6302 = vst [vmem:[#allocation20_spill] sm:$0xff] %v4939_v28 }
 0x239   : > { %v3585_v13 = vpop.f32.mrb[10].mxu0  ;;  %6303 = vst [vmem:[#allocation21_spill] sm:$0xff] %v4942_v59  ;;  %v3845_v4 = vpack.i.bf16 %v4939_v28, %v4942_v59 }
 0x23a   : > { %v928_v16 = vpop.f32.mrb[11].mxu0  ;;  %v4960_v42 = vadd.f32 %v3585_v13, %v4840_v57 }
 0x23b   : > { %v4963_v37 = vadd.f32 %v4840_v57, %v928_v16 }
 0x23c   : > { %6306 = vst [vmem:[#allocation24_spill] sm:$0xff] %v4960_v42 }
 0x23d   : > { %v3588_v26 = vpop.f32.mrb[12].mxu0  ;;  %6307 = vst [vmem:[#allocation25_spill] sm:$0xff] %v4963_v37  ;;  %v3855_v10 = vpack.i.bf16 %v4960_v42, %v4963_v37 }
 0x23e   : > { %v938_v44 = vpop.f32.mrb[13].mxu0  ;;  %v4981_v56 = vadd.f32 %v3588_v26, %v4840_v57 }
 0x23f   : > { %v4984_v54 = vadd.f32 %v4840_v57, %v938_v44  ;;  %v6222_v44 = vmov 0.0|0.0  }
 0x240   : > { %6310 = vst [vmem:[#allocation28_spill] sm:$0xff] %v4981_v56  ;;  %3728 = vmatprep.subr.bf16.mxu0 %v6222_v44 }
 0x241   : > { %v4856_v39 = vpop.f32.mrb[14].mxu0  ;;  %6311 = vst [vmem:[#allocation29_spill] sm:$0xff] %v4984_v54  ;;  %v3865_v13 = vpack.i.bf16 %v4981_v56, %v4984_v54 }
 0x242   : > { %v4858_v61 = vpop.f32.mrb[15].mxu0  ;;  %v4997_v58 = vadd.f32 %v4856_v39, %v4840_v57 }
 0x243   : > { %v5001_v15 = vadd.f32 %v4840_v57, %v4858_v61 }
 0x244   : > { %6312 = vst [vmem:[#allocation30_spill] sm:$0xff] %v4997_v58 }
 0x245   : > { %v3594_v30 = vpop.f32.mrb[16].mxu0  ;;  %6313 = vst [vmem:[#allocation31_spill] sm:$0xff] %v5001_v15  ;;  %v3875_v16 = vpack.i.bf16 %v4997_v58, %v5001_v15 }
 0x246   : > { %v4861_v8 = vadd.f32 %v3594_v30, %v4840_v57  ;;  %v958_v31 = vpop.f32.mrb[17].mxu0 }
 0x247   : > { %v4864_v6 = vadd.f32 %v4840_v57, %v958_v31 }
 0x248   : > { %6286 = vst [vmem:[#allocation4_spill] sm:$0xff] %v4861_v8 }
 0x249   : > { %6287 = vst [vmem:[#allocation5_spill] sm:$0xff] %v4864_v6  ;;  %v3597_v45 = vpop.f32.mrb[18].mxu0  ;;  %v4868_v60 = vpack.i.bf16 %v4861_v8, %v4864_v6 }
 0x24a   : > { %v4871_v32 = vadd.f32 %v3597_v45, %v4840_v57  ;;  %v968_v63 = vpop.f32.mrb[19].mxu0 }
 0x24b   : > { %v4874_v1 = vadd.f32 %v4840_v57, %v968_v63  ;;  %3801 = vrot.lane.b32.xlu0 %v4868_v60, %s4352_s14 }
 0x24c   : > { %6288 = vst [vmem:[#allocation6_spill] sm:$0xff] %v4871_v32 }
 0x24d   : > { %6289 = vst [vmem:[#allocation7_spill] sm:$0xff] %v4874_v1  ;;  %v3600_v29 = vpop.f32.mrb[20].mxu0  ;;  %v4886_v33 = vpack.i.bf16 %v4871_v32, %v4874_v1 }
 0x24e   : > { %v4889_v2 = vadd.f32 %v3600_v29, %v4840_v57  ;;  %v978_v22 = vpop.f32.mrb[21].mxu0 }
 0x24f   : > { %v4892_v48 = vadd.f32 %v4840_v57, %v978_v22  ;;  %3811 = vrot.lane.b32.xlu1 %v4886_v33, %s4352_s14 }
 0x250   : > { %6292 = vst [vmem:[#allocation10_spill] sm:$0xff] %v4889_v2 }
 0x251   : > { %6293 = vst [vmem:[#allocation11_spill] sm:$0xff] %v4892_v48  ;;  %v3603_v51 = vpop.f32.mrb[22].mxu0  ;;  %v3820_v47 = vpack.i.bf16 %v4889_v2, %v4892_v48 }
 0x252   : > { %v4907_v50 = vadd.f32 %v3603_v51, %v4840_v57  ;;  %v988_v11 = vpop.f32.mrb[23].mxu0 }
 0x253   : > { %v4910_v3 = vadd.f32 %v4840_v57, %v988_v11  ;;  %3816 = vrot.lane.b32.xlu1 %v3815_v5, %s4352_s14  ;;  %3821 = vrot.lane.b32.xlu0 %v3820_v47, %s4352_s14 }
 0x254   : > { %6296 = vst [vmem:[#allocation14_spill] sm:$0xff] %v4907_v50 }
 0x255   : > { %6297 = vst [vmem:[#allocation15_spill] sm:$0xff] %v4910_v3  ;;  %v3606_v18 = vpop.f32.mrb[24].mxu0  ;;  %v4926_v52 = vpack.i.bf16 %v4907_v50, %v4910_v3 }
 0x256   : > { %v4929_v19 = vadd.f32 %v3606_v18, %v4840_v57  ;;  %v998_v55 = vpop.f32.mrb[25].mxu0 }
 0x257   : > { %v4932_v41 = vadd.f32 %v4840_v57, %v998_v55  ;;  %3826 = vrot.lane.b32.xlu1 %v4922_v24, %s4352_s14  ;;  %3831 = vrot.lane.b32.xlu0 %v4926_v52, %s4352_s14 }
 0x258   : > { %6300 = vst [vmem:[#allocation18_spill] sm:$0xff] %v4929_v19 }
 0x259   : > { %6301 = vst [vmem:[#allocation19_spill] sm:$0xff] %v4932_v41  ;;  %v3609_v12 = vpop.f32.mrb[26].mxu0  ;;  %v3840_v27 = vpack.i.bf16 %v4929_v19, %v4932_v41 }
 0x25a   : > { %v4951_v17 = vadd.f32 %v3609_v12, %v4840_v57  ;;  %v1008_v25 = vpop.f32.mrb[27].mxu0 }
 0x25b   : > { %v4954_v36 = vadd.f32 %v4840_v57, %v1008_v25  ;;  %3836 = vrot.lane.b32.xlu1 %v4946_v20, %s4352_s14  ;;  %3841 = vrot.lane.b32.xlu0 %v3840_v27, %s4352_s14 }
 0x25c   : > { %6304 = vst [vmem:[#allocation22_spill] sm:$0xff] %v4951_v17 }
 0x25d   : > { %6305 = vst [vmem:[#allocation23_spill] sm:$0xff] %v4954_v36  ;;  %v3612_v23 = vpop.f32.mrb[28].mxu0  ;;  %v4969_v53 = vpack.i.bf16 %v4951_v17, %v4954_v36 }
 0x25e   : > { %v4972_v14 = vadd.f32 %v3612_v23, %v4840_v57  ;;  %v1018_v7 = vpop.f32.mrb[29].mxu0 }
 0x25f   : > { %v4975_v35 = vadd.f32 %v4840_v57, %v1018_v7  ;;  %3846 = vrot.lane.b32.xlu1 %v3845_v4, %s4352_s14  ;;  %3851 = vrot.lane.b32.xlu0 %v4969_v53, %s4352_s14 }
 0x260   : > { %6308 = vst [vmem:[#allocation26_spill] sm:$0xff] %v4972_v14 }
 0x261   : > { %6309 = vst [vmem:[#allocation27_spill] sm:$0xff] %v4975_v35  ;;  %v4990_v38 = vpack.i.bf16 %v4972_v14, %v4975_v35 }
 0x263   : > { %3856 = vrot.lane.b32.xlu1 %v3855_v10, %s4352_s14  ;;  %3861 = vrot.lane.b32.xlu0 %v4990_v38, %s4352_s14 }
 0x267   : > { %3866 = vrot.lane.b32.xlu1 %v3865_v13, %s4352_s14 }
 0x26b   : > { %3876 = vrot.lane.b32.xlu1 %v3875_v16, %s4352_s14 }
 0x26f   : > { %3886 = vrot.lane.b32.xlu1 %v3815_v5, %s4353_s15 }
 0x273   : > { %3901 = vrot.lane.b32.xlu1 %v3845_v4, %s4353_s15 }
 0x277   : > { %3916 = vrot.lane.b32.xlu1 %v3875_v16, %s4353_s15 }
 0x27b   : > { %3931 = vrot.lane.b32.xlu1 %v3820_v47, %s4353_s15 }
 0x27f   : > { %3941 = vrot.lane.b32.xlu1 %v3840_v27, %s4353_s15 }
 0x298   : > { %v3807_v30 = vpop.permute.xlu1 %3806 }
 0x299   : > { %v3809_v63 = vunpack.i.h.bf16 %v3807_v30  ;;  %v3808_v29 = vunpack.i.l.bf16 %v3807_v30 }
 0x29b   : > { %v3683_v18 = vpack.c.bf16 %v3809_v63, %v3808_v29 }
 0x2b9   : > { %v3615_v26 = vpop.f32.mrb[30].mxu0 }
 0x2ba   : > { %v5016_v39 = vadd.f32 %v3615_v26, %v4840_v57  ;;  %v1028_v61 = vpop.f32.mrb[31].mxu0 }
 0x2bb   : > { %v5019_v31 = vadd.f32 %v4840_v57, %v1028_v61 }
 0x2bc   : > { %6314 = vst [vmem:[#allocation32_spill] sm:$0xff] %v5016_v39 }
 0x2bd   : > { %6315 = vst [vmem:[#allocation33_spill] sm:$0xff] %v5019_v31  ;;  %v5023_v45 = vpack.i.bf16 %v5016_v39, %v5019_v31  ;;  %v3802_v22 = vpop.permute.xlu0 %3801 }
 0x2be   : > { %v3804_v51 = vunpack.i.h.bf16 %v3802_v22  ;;  %v3803_v5 = vunpack.i.l.bf16 %v3802_v22 }
 0x2bf   : > { %3871 = vrot.lane.b32.xlu0 %v5023_v45, %s4352_s14 }
 0x2c0   : > { %v3680_v57 = vpack.c.bf16 %v3804_v51, %v3803_v5 }
 0x2c1   : > { %v3812_v11 = vpop.permute.xlu1 %3811 }
 0x2c2   : > { %v3814_v55 = vunpack.i.h.bf16 %v3812_v11  ;;  %v3813_v12 = vunpack.i.l.bf16 %v3812_v11  ;;  %3682 = vmatprep.subr.msk.bf16.mxu1 %vm5029_vm1, %v3680_v57 }
 0x2c3   : > { %3881 = vrot.lane.b32.xlu0 %v4852_v21, %s4353_s15  ;;  %3685 = vmatpush3.bf16.xpose.msk.msra.mxu1 %vm5029_vm1, %v3683_v18 }
 0x2c4   : > { %v3686_v27 = vpack.c.bf16 %v3814_v55, %v3813_v12 }
 0x2c5   : > { %v3817_v25 = vpop.permute.xlu1 %3816  ;;  %v3822_v23 = vpop.permute.xlu0 %3821 }
 0x2c6   : > { %v3819_v4 = vunpack.i.h.bf16 %v3817_v25  ;;  %v3818_v7 = vunpack.i.l.bf16 %v3817_v25  ;;  %v3824_v16 = vunpack.i.h.bf16 %v3822_v23  ;;  %v3823_v26 = vunpack.i.l.bf16 %v3822_v23  ;;  %3688 = vmatprep.subr.msk.bf16.mxu1 %vm5029_vm1, %v3686_v27 }
 0x2c7   : > { %3891 = vrot.lane.b32.xlu0 %v4922_v24, %s4353_s15 }
 0x2c8   : > { %v3689_v61 = vpack.c.bf16 %v3819_v4, %v3818_v7  ;;  %v3692_v30 = vpack.c.bf16 %v3824_v16, %v3823_v26 }
 0x2c9   : > { %v3827_v63 = vpop.permute.xlu1 %3826  ;;  %v3832_v21 = vpop.permute.xlu0 %3831 }
 0x2ca   : > { %v3829_v29 = vunpack.i.h.bf16 %v3827_v63  ;;  %v3828_v22 = vunpack.i.l.bf16 %v3827_v63  ;;  %v3834_v51 = vunpack.i.h.bf16 %v3832_v21  ;;  %v3833_v5 = vunpack.i.l.bf16 %v3832_v21 }
 0x2cb   : > { %3896 = vrot.lane.b32.xlu0 %v4946_v20, %s4353_s15  ;;  %3691 = vmatpush3.bf16.xpose.msk.msra.mxu1 %vm5029_vm1, %v3689_v61 }
 0x2cc   : > { %3694 = vmatprep.subr.msk.bf16.mxu1 %vm5029_vm1, %v3692_v30  ;;  %v3695_v24 = vpack.c.bf16 %v3829_v29, %v3828_v22  ;;  %v3698_v57 = vpack.c.bf16 %v3834_v51, %v3833_v5 }
 0x2cd   : > { %v3837_v11 = vpop.permute.xlu1 %3836  ;;  %v3842_v18 = vpop.permute.xlu0 %3841 }
 0x2ce   : > { %v3839_v20 = vunpack.i.h.bf16 %v3837_v11  ;;  %v3838_v55 = vunpack.i.l.bf16 %v3837_v11  ;;  %v3844_v12 = vunpack.i.h.bf16 %v3842_v18  ;;  %v3843_v27 = vunpack.i.l.bf16 %v3842_v18 }
 0x2cf   : > { %3906 = vrot.lane.b32.xlu0 %v3855_v10, %s4353_s15 }
 0x2d0   : > { %v3701_v10 = vpack.c.bf16 %v3839_v20, %v3838_v55  ;;  %v3704_v25 = vpack.c.bf16 %v3844_v12, %v3843_v27 }
 0x2d1   : > { %v3847_v23 = vpop.permute.xlu1 %3846 }
 0x2d2   : > { %v3849_v4 = vunpack.i.h.bf16 %v3847_v23  ;;  %v3848_v7 = vunpack.i.l.bf16 %v3847_v23 }
 0x2d3   : > { %3911 = vrot.lane.b32.xlu0 %v3865_v13, %s4353_s15  ;;  %3697 = vmatpush3.bf16.xpose.msk.msra.mxu1 %vm5029_vm1, %v3695_v24  ;;  %v3852_v13 = vpop.permute.xlu0 %3851 }
 0x2d4   : > { %3700 = vmatprep.subr.msk.bf16.mxu1 %vm5029_vm1, %v3698_v57  ;;  %v3854_v16 = vunpack.i.h.bf16 %v3852_v13  ;;  %v3853_v26 = vunpack.i.l.bf16 %v3852_v13 }
 0x2d5   : > { %v3857_v30 = vpop.permute.xlu1 %3856 }
 0x2d6   : > { %v3710_v61 = vpack.c.bf16 %v3854_v16, %v3853_v26  ;;  %v3859_v63 = vunpack.i.h.bf16 %v3857_v30  ;;  %v3858_v21 = vunpack.i.l.bf16 %v3857_v30 }
 0x2d7   : > { %3921 = vrot.lane.b32.xlu0 %v4868_v60, %s4353_s15  ;;  %v3707_v60 = vpack.c.bf16 %v3849_v4, %v3848_v7 }
 0x2d8   : > { %v3713_v51 = vpack.c.bf16 %v3859_v63, %v3858_v21 }
 0x2db   : > { %3926 = vrot.lane.b32.xlu0 %v4886_v33, %s4353_s15  ;;  %3703 = vmatpush3.bf16.xpose.msk.msra.mxu1 %vm5029_vm1, %v3701_v10  ;;  %v3862_v33 = vpop.permute.xlu0 %3861 }
 0x2dc   : > { %3706 = vmatprep.subr.msk.bf16.mxu1 %vm5029_vm1, %v3704_v25  ;;  %v3864_v29 = vunpack.i.h.bf16 %v3862_v33  ;;  %v3863_v22 = vunpack.i.l.bf16 %v3862_v33 }
 0x2de   : > { %v3716_v5 = vpack.c.bf16 %v3864_v29, %v3863_v22 }
 0x2df   : > { %3936 = vrot.lane.b32.xlu0 %v4926_v52, %s4353_s15  ;;  %v3867_v52 = vpop.permute.xlu1 %3866 }
 0x2e0   : > { %v3868_v24 = vunpack.i.l.bf16 %v3867_v52 }
 0x2e3   : > { %3946 = vrot.lane.b32.xlu0 %v4969_v53, %s4353_s15  ;;  %3709 = vmatpush3.bf16.xpose.msk.msra.mxu1 %vm5029_vm1, %v3707_v60  ;;  %v3869_v53 = vunpack.i.h.bf16 %v3867_v52  ;;  %v3877_v11 = vpop.permute.xlu1 %3876 }
 0x2e4   : > { %3712 = vmatprep.subr.msk.bf16.mxu1 %vm5029_vm1, %v3710_v61  ;;  %v3879_v18 = vunpack.i.h.bf16 %v3877_v11  ;;  %v3878_v20 = vunpack.i.l.bf16 %v3877_v11 }
 0x2e5   : > { %v3719_v57 = vpack.c.bf16 %v3869_v53, %v3868_v24 }
 0x2e6   : > { %v3725_v25 = vpack.c.bf16 %v3879_v18, %v3878_v20 }
 0x2e7   : > { %v3887_v23 = vpop.permute.xlu1 %3886 }
 0x2e8   : > { %v3889_v16 = vunpack.i.h.bf16 %v3887_v23  ;;  %v3888_v26 = vunpack.i.l.bf16 %v3887_v23 }
 0x2ea   : > { %v3732_v30 = vpack.c.bf16 %v3889_v16, %v3888_v26 }
 0x2eb   : > { %3715 = vmatpush3.bf16.xpose.msk.msra.mxu1 %vm5029_vm1, %v3713_v51  ;;  %v3902_v51 = vpop.permute.xlu1 %3901 }
 0x2ec   : > { %3718 = vmatprep.subr.msk.bf16.mxu1 %vm5029_vm1, %v3716_v5  ;;  %v3904_v52 = vunpack.i.h.bf16 %v3902_v51  ;;  %v3903_v53 = vunpack.i.l.bf16 %v3902_v51 }
 0x2f3   : > { %3721 = vmatpush3.bf16.xpose.msk.msra.mxu1 %vm5029_vm1, %v3719_v57  ;;  %v3741_v57 = vpack.c.bf16 %v3904_v52, %v3903_v53 }
 0x331   : > { %v3872_v55 = vpop.permute.xlu0 %3871 }
 0x332   : > { %v3874_v12 = vunpack.i.h.bf16 %v3872_v55  ;;  %v3873_v27 = vunpack.i.l.bf16 %v3872_v55 }
 0x334   : > { %v3722_v10 = vpack.c.bf16 %v3874_v12, %v3873_v27 }
 0x335   : > { %v3882_v13 = vpop.permute.xlu0 %3881 }
 0x336   : > { %v3884_v4 = vunpack.i.h.bf16 %v3882_v13  ;;  %v3883_v7 = vunpack.i.l.bf16 %v3882_v13  ;;  %3724 = vmatprep.subr.msk.bf16.mxu1 %vm5029_vm1, %v3722_v10  ;;  %v3917_v10 = vpop.permute.xlu1 %3916 }
 0x337   : > { %3727 = vmatpush3.bf16.xpose.msk.msra.mxu1 %vm5029_vm1, %v3725_v25  ;;  %v3919_v23 = vunpack.i.h.bf16 %v3917_v10  ;;  %v3918_v13 = vunpack.i.l.bf16 %v3917_v10  ;;  %v1229_v10 = vld [vmem:[%s6220_s5] sm:$0xff] }
 0x338   : > { %v3729_v60 = vpack.c.bf16 %v3884_v4, %v3883_v7 }
 0x339   : > { %v3892_v61 = vpop.permute.xlu0 %3891  ;;  %v3750_v7 = vpack.c.bf16 %v3919_v23, %v3918_v13 }
 0x33a   : > { %3730 = vmatpush1.bf16.msra.mxu0 %v3729_v60  ;;  %v3894_v33 = vunpack.i.h.bf16 %v3892_v61  ;;  %v3893_v63 = vunpack.i.l.bf16 %v3892_v61 }
 0x33b   : > { %3731 = vmatprep.subr.bf16.mxu0 %v6222_v44 }
 0x33c   : > { %v3735_v47 = vpack.c.bf16 %v3894_v33, %v3893_v63  ;;  %v3932_v63 = vpop.permute.xlu1 %3931 }
 0x33d   : > { %v3897_v21 = vpop.permute.xlu0 %3896 }
 0x33e   : > { %3461 = vmatmul.mubr.msk.f32.vlgmr.msra.gmra.mrb[0].mxu1 %vm287_vm0, %v4846_v40  ;;  %3733 = vmatpush1.bf16.msra.mxu0 %v3732_v30  ;;  %v3899_v29 = vunpack.i.h.bf16 %v3897_v21  ;;  %v3898_v22 = vunpack.i.l.bf16 %v3897_v21  ;;  %v3934_v21 = vunpack.i.h.bf16 %v3932_v63 }
 0x33f   : > { %3462 = vmatprep.mubr.msk.f32.mxu1 %vm287_vm0, %v4843_v34  ;;  %3734 = vmatprep.subr.bf16.mxu0 %v6222_v44 }
 0x340   : > { %v3738_v24 = vpack.c.bf16 %v3899_v29, %v3898_v22  ;;  %v3942_v53 = vpop.permute.xlu1 %3941 }
 0x341   : > { %v3907_v5 = vpop.permute.xlu0 %3906 }
 0x342   : > { %3463 = vmatmul.mubr.msk.f32.gmra.mrb[2].mxu1 %vm287_vm0, %v4843_v34  ;;  %3736 = vmatpush1.bf16.msra.mxu0 %v3735_v47  ;;  %v3909_v11 = vunpack.i.h.bf16 %v3907_v5  ;;  %v3908_v18 = vunpack.i.l.bf16 %v3907_v5  ;;  %v3933_v47 = vunpack.i.l.bf16 %v3932_v63 }
 0x343   : > { %3464 = vmatprep.mubr.msk.f32.mxu1 %vm287_vm0, %v4882_v9  ;;  %3737 = vmatprep.subr.bf16.mxu0 %v6222_v44 }
 0x344   : > { %v3744_v55 = vpack.c.bf16 %v3909_v11, %v3908_v18  ;;  %v3759_v51 = vpack.c.bf16 %v3934_v21, %v3933_v47  ;;  %v1233_v21 = vld [vmem:[%s6220_s5 + $0x20] sm:$0xff]  ;;  %v1234_v47 = vld [vmem:[%s6220_s5 + $0x28] sm:$0xff] }
 0x345   : > { %v3912_v20 = vpop.permute.xlu0 %3911 }
 0x346   : > { %3465 = vmatmul.mubr.msk.f32.gmra.mrb[4].mxu1 %vm287_vm0, %v4882_v9  ;;  %3739 = vmatpush1.bf16.msra.mxu0 %v3738_v24  ;;  %v3914_v12 = vunpack.i.h.bf16 %v3912_v20  ;;  %v3913_v27 = vunpack.i.l.bf16 %v3912_v20  ;;  %v3944_v24 = vunpack.i.h.bf16 %v3942_v53 }
 0x347   : > { %3466 = vmatprep.mubr.msk.f32.mxu1 %vm287_vm0, %v4879_v0  ;;  %3740 = vmatprep.subr.bf16.mxu0 %v6222_v44 }
 0x348   : > { %v3747_v4 = vpack.c.bf16 %v3914_v12, %v3913_v27 }
 0x349   : > { %v3922_v25 = vpop.permute.xlu0 %3921 }
 0x34a   : > { %3467 = vmatmul.mubr.msk.f32.gmra.mrb[6].mxu1 %vm287_vm0, %v4879_v0  ;;  %3742 = vmatpush1.bf16.msra.mxu0 %v3741_v57  ;;  %v3924_v16 = vunpack.i.h.bf16 %v3922_v25  ;;  %v3923_v26 = vunpack.i.l.bf16 %v3922_v25  ;;  %v3943_v57 = vunpack.i.l.bf16 %v3942_v53  ;;  %v1230_v25 = vld [vmem:[%s6220_s5 + $0x8] sm:$0xff]  ;;  %v1235_v53 = vld [vmem:[%s6220_s5 + $0x30] sm:$0xff] }
 0x34b   : > { %3468 = vmatprep.mubr.msk.f32.mxu1 %vm287_vm0, %v4900_v46  ;;  %3743 = vmatprep.subr.bf16.mxu0 %v6222_v44 }
 0x34c   : > { %v3753_v61 = vpack.c.bf16 %v3924_v16, %v3923_v26  ;;  %v3765_v20 = vpack.c.bf16 %v3944_v24, %v3943_v57  ;;  %v1231_v16 = vld [vmem:[%s6220_s5 + $0x10] sm:$0xff]  ;;  %v1232_v26 = vld [vmem:[%s6220_s5 + $0x18] sm:$0xff] }
 0x34d   : > { %v3927_v60 = vpop.permute.xlu0 %3926  ;;  %v1236_v24 = vld [vmem:[%s6220_s5 + $0x38] sm:$0xff] }
 0x34e   : > { %3469 = vmatmul.mubr.msk.f32.gmra.mrb[8].mxu1 %vm287_vm0, %v4900_v46  ;;  %3745 = vmatpush1.bf16.msra.mxu0 %v3744_v55  ;;  %v3929_v30 = vunpack.i.h.bf16 %v3927_v60  ;;  %v3928_v33 = vunpack.i.l.bf16 %v3927_v60 }
 0x34f   : > { %3470 = vmatprep.mubr.msk.f32.mxu1 %vm287_vm0, %v4897_v43  ;;  %3746 = vmatprep.subr.bf16.mxu0 %v6222_v44 }
 0x350   : > { %v3756_v29 = vpack.c.bf16 %v3929_v30, %v3928_v33 }
 0x351   : > { %v3937_v22 = vpop.permute.xlu0 %3936 }
 0x352   : > { %3471 = vmatmul.mubr.msk.f32.gmra.mrb[10].mxu1 %vm287_vm0, %v4897_v43  ;;  %3748 = vmatpush1.bf16.msra.mxu0 %v3747_v4  ;;  %v3939_v5 = vunpack.i.h.bf16 %v3937_v22  ;;  %v3938_v52 = vunpack.i.l.bf16 %v3937_v22 }
 0x353   : > { %3472 = vmatprep.mubr.msk.f32.mxu1 %vm287_vm0, %v4918_v62  ;;  %3749 = vmatprep.subr.bf16.mxu0 %v6222_v44 }
 0x354   : > { %v3762_v11 = vpack.c.bf16 %v3939_v5, %v3938_v52 }
 0x355   : > { %v3947_v18 = vpop.permute.xlu0 %3946 }
 0x356   : > { %3473 = vmatmul.mubr.msk.f32.gmra.mrb[12].mxu1 %vm287_vm0, %v4918_v62  ;;  %3751 = vmatpush1.bf16.msra.mxu0 %v3750_v7  ;;  %v3949_v55 = vunpack.i.h.bf16 %v3947_v18  ;;  %v3948_v12 = vunpack.i.l.bf16 %v3947_v18 }
 0x357   : > { %3474 = vmatprep.mubr.msk.f32.mxu1 %vm287_vm0, %v4915_v49  ;;  %3752 = vmatprep.subr.bf16.mxu0 %v6222_v44 }
 0x358   : > { %v3768_v27 = vpack.c.bf16 %v3949_v55, %v3948_v12  ;;  %v1237_v12 = vld [vmem:[%s6220_s5 + $0x40] sm:$0xff] }
 0x35a   : > { %3475 = vmatmul.mubr.msk.f32.gmra.mrb[14].mxu1 %vm287_vm0, %v4915_v49  ;;  %3754 = vmatpush1.bf16.msra.mxu0 %v3753_v61 }
 0x35b   : > { %3476 = vmatprep.mubr.msk.f32.mxu1 %vm287_vm0, %v4942_v59  ;;  %3755 = vmatprep.subr.bf16.mxu0 %v6222_v44 }
 0x35e   : > { %3477 = vmatmul.mubr.msk.f32.gmra.mrb[16].mxu1 %vm287_vm0, %v4942_v59  ;;  %3757 = vmatpush1.bf16.msra.mxu0 %v3756_v29 }
 0x35f   : > { %3478 = vmatprep.mubr.msk.f32.mxu1 %vm287_vm0, %v4939_v28  ;;  %3758 = vmatprep.subr.bf16.mxu0 %v6222_v44 }
 0x362   : > { %3479 = vmatmul.mubr.msk.f32.gmra.mrb[18].mxu1 %vm287_vm0, %v4939_v28  ;;  %3760 = vmatpush1.bf16.msra.mxu0 %v3759_v51 }
 0x363   : > { %3480 = vmatprep.mubr.msk.f32.mxu1 %vm287_vm0, %v4963_v37  ;;  %3761 = vmatprep.subr.bf16.mxu0 %v6222_v44 }
 0x366   : > { %3481 = vmatmul.mubr.msk.f32.gmra.mrb[20].mxu1 %vm287_vm0, %v4963_v37  ;;  %3763 = vmatpush1.bf16.msra.mxu0 %v3762_v11 }
 0x367   : > { %3482 = vmatprep.mubr.msk.f32.mxu1 %vm287_vm0, %v4960_v42  ;;  %3764 = vmatprep.subr.bf16.mxu0 %v6222_v44 }
 0x36a   : > { %3483 = vmatmul.mubr.msk.f32.gmra.mrb[22].mxu1 %vm287_vm0, %v4960_v42  ;;  %3766 = vmatpush1.bf16.msra.mxu0 %v3765_v20 }
 0x36b   : > { %3484 = vmatprep.mubr.msk.f32.mxu1 %vm287_vm0, %v4984_v54  ;;  %3767 = vmatprep.subr.bf16.mxu0 %v6222_v44 }
 0x36e   : > { %3485 = vmatmul.mubr.msk.f32.gmra.mrb[24].mxu1 %vm287_vm0, %v4984_v54  ;;  %3769 = vmatpush1.bf16.msra.mxu0 %v3768_v27  ;;  %v1238_v27 = vld [vmem:[%s6220_s5 + $0x48] sm:$0xff] }
 0x36f   : > { %3486 = vmatprep.mubr.msk.f32.mxu1 %vm287_vm0, %v4981_v56  ;;  %3770 = vmatprep.subr.bf16.mxu0 %v6222_v44 }
 0x372   : > { %3487 = vmatmul.mubr.msk.f32.gmra.mrb[26].mxu1 %vm287_vm0, %v4981_v56 }
 0x373   : > { %3488 = vmatprep.mubr.msk.f32.mxu1 %vm287_vm0, %v5001_v15 }
 0x376   : > { %3489 = vmatmul.mubr.msk.f32.gmra.mrb[28].mxu1 %vm287_vm0, %v5001_v15 }
 0x377   : > { %3490 = vmatprep.mubr.msk.f32.mxu1 %vm287_vm0, %v4997_v58 }
 0x37a   : > { %3491 = vmatmul.mubr.msk.f32.gmra.mrb[30].mxu1 %vm287_vm0, %v4997_v58 }
 0x37b   : > { %3492 = vmatprep.mubr.msk.f32.mxu1 %vm287_vm0, %v4864_v6 }
 0x37e   : > { %3493 = vmatmul.mubr.msk.f32.gmra.mrb[32].mxu1 %vm287_vm0, %v4864_v6 }
 0x37f   : > { %3494 = vmatprep.mubr.msk.f32.mxu1 %vm287_vm0, %v4861_v8 }
 0x382   : > { %3495 = vmatmul.mubr.msk.f32.gmra.mrb[34].mxu1 %vm287_vm0, %v4861_v8 }
 0x383   : > { %3496 = vmatprep.mubr.msk.f32.mxu1 %vm287_vm0, %v4874_v1 }
 0x386   : > { %3497 = vmatmul.mubr.msk.f32.gmra.mrb[36].mxu1 %vm287_vm0, %v4874_v1 }
 0x387   : > { %3498 = vmatprep.mubr.msk.f32.mxu1 %vm287_vm0, %v4871_v32 }
 0x38a   : > { %3499 = vmatmul.mubr.msk.f32.gmra.mrb[38].mxu1 %vm287_vm0, %v4871_v32 }
 0x38b   : > { %3500 = vmatprep.mubr.msk.f32.mxu1 %vm287_vm0, %v4892_v48 }
 0x38e   : > { %3501 = vmatmul.mubr.msk.f32.gmra.mrb[40].mxu1 %vm287_vm0, %v4892_v48 }
 0x38f   : > { %3502 = vmatprep.mubr.msk.f32.mxu1 %vm287_vm0, %v4889_v2 }
 0x392   : > { %3503 = vmatmul.mubr.msk.f32.gmra.mrb[42].mxu1 %vm287_vm0, %v4889_v2 }
 0x393   : > { %3504 = vmatprep.mubr.msk.f32.mxu1 %vm287_vm0, %v4910_v3 }
 0x396   : > { %3505 = vmatmul.mubr.msk.f32.gmra.mrb[44].mxu1 %vm287_vm0, %v4910_v3 }
 0x397   : > { %3506 = vmatprep.mubr.msk.f32.mxu1 %vm287_vm0, %v4907_v50 }
 0x39a   : > { %3507 = vmatmul.mubr.msk.f32.gmra.mrb[46].mxu1 %vm287_vm0, %v4907_v50 }
 0x39b   : > { %3508 = vmatprep.mubr.msk.f32.mxu1 %vm287_vm0, %v4932_v41 }
 0x39e   : > { %3509 = vmatmul.mubr.msk.f32.gmra.mrb[48].mxu1 %vm287_vm0, %v4932_v41 }
 0x39f   : > { %3510 = vmatprep.mubr.msk.f32.mxu1 %vm287_vm0, %v4929_v19 }
 0x3a2   : > { %3511 = vmatmul.mubr.msk.f32.gmra.mrb[50].mxu1 %vm287_vm0, %v4929_v19 }
 0x3a3   : > { %3512 = vmatprep.mubr.msk.f32.mxu1 %vm287_vm0, %v4954_v36 }
 0x3a6   : > { %3513 = vmatmul.mubr.msk.f32.gmra.mrb[52].mxu1 %vm287_vm0, %v4954_v36 }
 0x3a7   : > { %3514 = vmatprep.mubr.msk.f32.mxu1 %vm287_vm0, %v4951_v17 }
 0x3aa   : > { %3515 = vmatmul.mubr.msk.f32.gmra.mrb[54].mxu1 %vm287_vm0, %v4951_v17 }
 0x3ab   : > { %3516 = vmatprep.mubr.msk.f32.mxu1 %vm287_vm0, %v4975_v35 }
 0x3ae   : > { %3517 = vmatmul.mubr.msk.f32.gmra.mrb[56].mxu1 %vm287_vm0, %v4975_v35 }
 0x3af   : > { %3518 = vmatprep.mubr.msk.f32.mxu1 %vm287_vm0, %v4972_v14 }
 0x3b2   : > { %3519 = vmatmul.mubr.msk.f32.gmra.mrb[58].mxu1 %vm287_vm0, %v4972_v14 }
 0x3b3   : > { %3520 = vmatprep.mubr.msk.f32.mxu1 %vm287_vm0, %v5019_v31 }
 0x3b6   : > { %3521 = vmatmul.mubr.msk.f32.gmra.mrb[60].mxu1 %vm287_vm0, %v5019_v31 }
 0x3b7   : > { %3522 = vmatprep.mubr.msk.f32.mxu1 %vm287_vm0, %v5016_v39 }
 0x3ba   : > { %3523 = vmatmul.mubr.msk.f32.gmra.mrb[62].mxu1 %vm287_vm0, %v5016_v39 }
 0x411   : > { %v1583_v23 = vpop.f32.mrb[0].mxu1 }
 0x412   : > { %v5227_v13 = vadd.f32 %v1583_v23, %v1229_v10  ;;  %v1585_v4 = vpop.f32.mrb[1].mxu1 }
 0x413   : > { %v5229_v7 = vadd.f32 %v1585_v4, %v1230_v25 }
 0x415   : > { %v1589_v60 = vpop.f32.mrb[2].mxu1  ;;  %v1774_v61 = vmax.f32 %v5227_v13, %v5229_v7 }
 0x416   : > { %v5239_v30 = vadd.f32 %v1589_v60, %v1231_v16  ;;  %v1591_v33 = vpop.f32.mrb[3].mxu1  ;;  %v1240_v60 = vld [vmem:[%s6220_s5 + $0x58] sm:$0xff] }
 0x417   : > { %v5241_v63 = vadd.f32 %v1591_v33, %v1232_v26  ;;  %1775 = vmax.xlane.f32.xlu0 %v1774_v61  ;;  %v1239_v26 = vld [vmem:[%s6220_s5 + $0x50] sm:$0xff] }
 0x419   : > { %v1595_v29 = vpop.f32.mrb[4].mxu1  ;;  %v1777_v22 = vmax.f32 %v5239_v30, %v5241_v63 }
 0x41a   : > { %v5251_v51 = vadd.f32 %v1595_v29, %v1233_v21  ;;  %v1597_v5 = vpop.f32.mrb[5].mxu1 }
 0x41b   : > { %v5253_v52 = vadd.f32 %v1597_v5, %v1234_v47  ;;  %1778 = vmax.xlane.f32.xlu1 %v1777_v22  ;;  %v1241_v22 = vld [vmem:[%s6220_s5 + $0x60] sm:$0xff]  ;;  %v1242_v5 = vld [vmem:[%s6220_s5 + $0x68] sm:$0xff] }
 0x41d   : > { %v1780_v57 = vmax.f32 %v5251_v51, %v5253_v52  ;;  %v1601_v11 = vpop.f32.mrb[6].mxu1 }
 0x41e   : > { %v5263_v18 = vadd.f32 %v1601_v11, %v1235_v53  ;;  %v1603_v20 = vpop.f32.mrb[7].mxu1 }
 0x41f   : > { %v5265_v55 = vadd.f32 %v1603_v20, %v1236_v24  ;;  %1781 = vmax.xlane.f32.xlu0 %v1780_v57 }
 0x421   : > { %v1783_v10 = vmax.f32 %v5263_v18, %v5265_v55  ;;  %v1607_v25 = vpop.f32.mrb[8].mxu1 }
 0x422   : > { %v5275_v23 = vadd.f32 %v1607_v25, %v1237_v12  ;;  %v1609_v4 = vpop.f32.mrb[9].mxu1  ;;  %v1243_v12 = vld [vmem:[%s6220_s5 + $0x70] sm:$0xff] }
 0x423   : > { %v5277_v16 = vadd.f32 %v1609_v4, %v1238_v27  ;;  %1784 = vmax.xlane.f32.xlu0 %v1783_v10  ;;  %v1244_v27 = vld [vmem:[%s6220_s5 + $0x78] sm:$0xff] }
 0x425   : > { %v1786_v61 = vmax.f32 %v5275_v23, %v5277_v16  ;;  %v1613_v33 = vpop.f32.mrb[10].mxu1 }
 0x426   : > { %v5287_v21 = vadd.f32 %v1613_v33, %v1239_v26  ;;  %v1615_v47 = vpop.f32.mrb[11].mxu1  ;;  %v1246_v33 = vld [vmem:[%s6220_s5 + $0x88] sm:$0xff] }
 0x427   : > { %v5289_v29 = vadd.f32 %v1615_v47, %v1240_v60  ;;  %1787 = vmax.xlane.f32.xlu0 %v1786_v61  ;;  %v1245_v61 = vld [vmem:[%s6220_s5 + $0x80] sm:$0xff] }
 0x429   : > { %v1619_v53 = vpop.f32.mrb[12].mxu1  ;;  %v1789_v24 = vmax.f32 %v5287_v21, %v5289_v29 }
 0x42a   : > { %v5299_v57 = vadd.f32 %v1619_v53, %v1241_v22  ;;  %v1621_v11 = vpop.f32.mrb[13].mxu1 }
 0x42b   : > { %v5301_v20 = vadd.f32 %v1621_v11, %v1242_v5  ;;  %1790 = vmax.xlane.f32.xlu1 %v1789_v24  ;;  %v1247_v11 = vld [vmem:[%s6220_s5 + $0x90] sm:$0xff] }
 0x42d   : > { %v1792_v10 = vmax.f32 %v5299_v57, %v5301_v20  ;;  %v1625_v25 = vpop.f32.mrb[14].mxu1 }
 0x42e   : > { %v5311_v4 = vadd.f32 %v1625_v25, %v1243_v12  ;;  %v1627_v26 = vpop.f32.mrb[15].mxu1  ;;  %v1248_v12 = vld [vmem:[%s6220_s5 + $0x98] sm:$0xff] }
 0x42f   : > { %v5313_v60 = vadd.f32 %v1627_v26, %v1244_v27  ;;  %1793 = vmax.xlane.f32.xlu0 %v1792_v10 }
 0x431   : > { %v1631_v47 = vpop.f32.mrb[16].mxu1  ;;  %v1795_v22 = vmax.f32 %v5311_v4, %v5313_v60 }
 0x432   : > { %v5323_v5 = vadd.f32 %v1631_v47, %v1245_v61  ;;  %v1633_v53 = vpop.f32.mrb[17].mxu1  ;;  %v1250_v47 = vld [vmem:[%s6220_s5 + $0xa8] sm:$0xff] }
 0x433   : > { %v5325_v24 = vadd.f32 %v1633_v53, %v1246_v33  ;;  %1796 = vmax.xlane.f32.xlu1 %v1795_v22  ;;  %v1249_v33 = vld [vmem:[%s6220_s5 + $0xa0] sm:$0xff] }
 0x435   : > { %v1798_v27 = vmax.f32 %v5323_v5, %v5325_v24  ;;  %v1637_v10 = vpop.f32.mrb[18].mxu1 }
 0x436   : > { %v5335_v25 = vadd.f32 %v1637_v10, %v1247_v11  ;;  %v1639_v26 = vpop.f32.mrb[19].mxu1 }
 0x437   : > { %v5337_v61 = vadd.f32 %v1639_v26, %v1248_v12  ;;  %1799 = vmax.xlane.f32.xlu0 %v1798_v27  ;;  %v1251_v12 = vld [vmem:[%s6220_s5 + $0xb0] sm:$0xff]  ;;  %v1252_v27 = vld [vmem:[%s6220_s5 + $0xb8] sm:$0xff] }
 0x439   : > { %v1801_v22 = vmax.f32 %v5335_v25, %v5337_v61  ;;  %v1643_v53 = vpop.f32.mrb[20].mxu1 }
 0x43a   : > { %v5347_v44 = vadd.f32 %v1643_v53, %v1249_v33  ;;  %v1645_v11 = vpop.f32.mrb[21].mxu1 }
 0x43b   : > { %v5349_v10 = vadd.f32 %v1645_v11, %v1250_v47  ;;  %1802 = vmax.xlane.f32.xlu1 %v1801_v22  ;;  %v1253_v47 = vld [vmem:[%s6220_s5 + $0xc0] sm:$0xff]  ;;  %v1254_v22 = vld [vmem:[%s6220_s5 + $0xc8] sm:$0xff] }
 0x43d   : > { %v1804_v26 = vmax.f32 %v5347_v44, %v5349_v10  ;;  %v1649_v39 = vpop.f32.mrb[22].mxu1 }
 0x43e   : > { %v5359_v31 = vadd.f32 %v1649_v39, %v1251_v12  ;;  %v1651_v33 = vpop.f32.mrb[23].mxu1 }
 0x43f   : > { %v5361_v53 = vadd.f32 %v1651_v33, %v1252_v27  ;;  %1805 = vmax.xlane.f32.xlu0 %v1804_v26  ;;  %v1255_v27 = vld [vmem:[%s6220_s5 + $0xd0] sm:$0xff]  ;;  %v1256_v26 = vld [vmem:[%s6220_s5 + $0xd8] sm:$0xff] }
 0x441   : > { %v1807_v11 = vmax.f32 %v5359_v31, %v5361_v53  ;;  %v1655_v14 = vpop.f32.mrb[24].mxu1 }
 0x442   : > { %v5371_v35 = vadd.f32 %v1655_v14, %v1253_v47  ;;  %v1657_v39 = vpop.f32.mrb[25].mxu1 }
 0x443   : > { %v5373_v12 = vadd.f32 %v1657_v39, %v1254_v22  ;;  %1808 = vmax.xlane.f32.xlu1 %v1807_v11  ;;  %v1257_v22 = vld [vmem:[%s6220_s5 + $0xe0] sm:$0xff]  ;;  %v1258_v11 = vld [vmem:[%s6220_s5 + $0xe8] sm:$0xff] }
 0x445   : > { %v1810_v33 = vmax.f32 %v5371_v35, %v5373_v12  ;;  %v1661_v17 = vpop.f32.mrb[26].mxu1 }
 0x446   : > { %v5383_v36 = vadd.f32 %v1661_v17, %v1255_v27  ;;  %v1663_v14 = vpop.f32.mrb[27].mxu1 }
 0x447   : > { %v5385_v47 = vadd.f32 %v1663_v14, %v1256_v26  ;;  %1811 = vmax.xlane.f32.xlu0 %v1810_v33  ;;  %v1259_v26 = vld [vmem:[%s6220_s5 + $0xf0] sm:$0xff]  ;;  %v1260_v33 = vld [vmem:[%s6220_s5 + $0xf8] sm:$0xff] }
 0x449   : > { %v1813_v39 = vmax.f32 %v5383_v36, %v5385_v47  ;;  %v1667_v19 = vpop.f32.mrb[28].mxu1 }
 0x44a   : > { %v5395_v41 = vadd.f32 %v1667_v19, %v1257_v22  ;;  %v1669_v17 = vpop.f32.mrb[29].mxu1 }
 0x44b   : > { %v5397_v27 = vadd.f32 %v1669_v17, %v1258_v11  ;;  %1814 = vmax.xlane.f32.xlu1 %v1813_v39  ;;  %v1261_v11 = vld [vmem:[%s6220_s5 + $0x100] sm:$0xff]  ;;  %v1262_v39 = vld [vmem:[%s6220_s5 + $0x108] sm:$0xff] }
 0x44d   : > { %v1816_v14 = vmax.f32 %v5395_v41, %v5397_v27  ;;  %v1673_v56 = vpop.f32.mrb[30].mxu1 }
 0x44e   : > { %v5407_v50 = vadd.f32 %v1673_v56, %v1259_v26  ;;  %v1675_v19 = vpop.f32.mrb[31].mxu1 }
 0x44f   : > { %v5409_v22 = vadd.f32 %v1675_v19, %v1260_v33  ;;  %1817 = vmax.xlane.f32.xlu1 %v1816_v14  ;;  %v1263_v33 = vld [vmem:[%s6220_s5 + $0x110] sm:$0xff]  ;;  %v1264_v14 = vld [vmem:[%s6220_s5 + $0x118] sm:$0xff] }
 0x451   : > { %v1819_v17 = vmax.f32 %v5407_v50, %v5409_v22  ;;  %v1679_v54 = vpop.f32.mrb[32].mxu1 }
 0x452   : > { %v5419_v3 = vadd.f32 %v1679_v54, %v1261_v11  ;;  %v1681_v56 = vpop.f32.mrb[33].mxu1 }
 0x453   : > { %v5421_v26 = vadd.f32 %v1681_v56, %v1262_v39  ;;  %1820 = vmax.xlane.f32.xlu1 %v1819_v17  ;;  %v1265_v39 = vld [vmem:[%s6220_s5 + $0x120] sm:$0xff]  ;;  %v1266_v17 = vld [vmem:[%s6220_s5 + $0x128] sm:$0xff] }
 0x455   : > { %v1822_v19 = vmax.f32 %v5419_v3, %v5421_v26  ;;  %v1685_v42 = vpop.f32.mrb[34].mxu1 }
 0x456   : > { %v5431_v2 = vadd.f32 %v1685_v42, %v1263_v33  ;;  %v1687_v54 = vpop.f32.mrb[35].mxu1 }
 0x457   : > { %v5433_v11 = vadd.f32 %v1687_v54, %v1264_v14  ;;  %1823 = vmax.xlane.f32.xlu0 %v1822_v19  ;;  %v1267_v14 = vld [vmem:[%s6220_s5 + $0x130] sm:$0xff]  ;;  %v1268_v19 = vld [vmem:[%s6220_s5 + $0x138] sm:$0xff] }
 0x459   : > { %v1825_v56 = vmax.f32 %v5431_v2, %v5433_v11  ;;  %v1691_v37 = vpop.f32.mrb[36].mxu1 }
 0x45a   : > { %v5443_v48 = vadd.f32 %v1691_v37, %v1265_v39  ;;  %v1693_v42 = vpop.f32.mrb[37].mxu1 }
 0x45b   : > { %v5445_v33 = vadd.f32 %v1693_v42, %v1266_v17  ;;  %1826 = vmax.xlane.f32.xlu1 %v1825_v56  ;;  %v1269_v17 = vld [vmem:[%s6220_s5 + $0x140] sm:$0xff]  ;;  %v1270_v56 = vld [vmem:[%s6220_s5 + $0x148] sm:$0xff] }
 0x45d   : > { %v1828_v54 = vmax.f32 %v5443_v48, %v5445_v33  ;;  %v1697_v28 = vpop.f32.mrb[38].mxu1 }
 0x45e   : > { %v5455_v32 = vadd.f32 %v1697_v28, %v1267_v14  ;;  %v1699_v37 = vpop.f32.mrb[39].mxu1 }
 0x45f   : > { %v5457_v39 = vadd.f32 %v1699_v37, %v1268_v19  ;;  %1829 = vmax.xlane.f32.xlu1 %v1828_v54  ;;  %v1271_v19 = vld [vmem:[%s6220_s5 + $0x150] sm:$0xff]  ;;  %v1272_v54 = vld [vmem:[%s6220_s5 + $0x158] sm:$0xff] }
 0x461   : > { %v1831_v42 = vmax.f32 %v5455_v32, %v5457_v39  ;;  %v1703_v59 = vpop.f32.mrb[40].mxu1 }
 0x462   : > { %v5467_v1 = vadd.f32 %v1703_v59, %v1269_v17  ;;  %v1705_v28 = vpop.f32.mrb[41].mxu1 }
 0x463   : > { %v5469_v14 = vadd.f32 %v1705_v28, %v1270_v56  ;;  %1832 = vmax.xlane.f32.xlu0 %v1831_v42  ;;  %v1273_v56 = vld [vmem:[%s6220_s5 + $0x160] sm:$0xff]  ;;  %v1274_v42 = vld [vmem:[%s6220_s5 + $0x168] sm:$0xff] }
 0x465   : > { %v1834_v37 = vmax.f32 %v5467_v1, %v5469_v14  ;;  %v1709_v49 = vpop.f32.mrb[42].mxu1 }
 0x466   : > { %v5479_v8 = vadd.f32 %v1709_v49, %v1271_v19  ;;  %v1711_v59 = vpop.f32.mrb[43].mxu1 }
 0x467   : > { %v5481_v17 = vadd.f32 %v1711_v59, %v1272_v54  ;;  %1835 = vmax.xlane.f32.xlu1 %v1834_v37  ;;  %v1275_v54 = vld [vmem:[%s6220_s5 + $0x170] sm:$0xff]  ;;  %v1276_v37 = vld [vmem:[%s6220_s5 + $0x178] sm:$0xff] }
 0x468   : > { %6318 = vst [vmem:[#allocation34_spill] sm:$0xff] %v5479_v8 }
 0x469   : > { %6319 = vst [vmem:[#allocation35_spill] sm:$0xff] %v5481_v17  ;;  %v1837_v28 = vmax.f32 %v5479_v8, %v5481_v17  ;;  %v1715_v62 = vpop.f32.mrb[44].mxu1 }
 0x46a   : > { %v5491_v6 = vadd.f32 %v1715_v62, %v1273_v56  ;;  %v1717_v49 = vpop.f32.mrb[45].mxu1 }
 0x46b   : > { %v5493_v19 = vadd.f32 %v1717_v49, %v1274_v42  ;;  %1838 = vmax.xlane.f32.xlu1 %v1837_v28  ;;  %v1277_v42 = vld [vmem:[%s6220_s5 + $0x180] sm:$0xff]  ;;  %v1278_v28 = vld [vmem:[%s6220_s5 + $0x188] sm:$0xff] }
 0x46c   : > { %6320 = vst [vmem:[#allocation36_spill] sm:$0xff] %v5491_v6 }
 0x46d   : > { %6321 = vst [vmem:[#allocation37_spill] sm:$0xff] %v5493_v19  ;;  %v1840_v59 = vmax.f32 %v5491_v6, %v5493_v19  ;;  %v1721_v58 = vpop.f32.mrb[46].mxu1 }
 0x46e   : > { %v5503_v15 = vadd.f32 %v1721_v58, %v1275_v54  ;;  %v1723_v62 = vpop.f32.mrb[47].mxu1 }
 0x46f   : > { %v5505_v56 = vadd.f32 %v1723_v62, %v1276_v37  ;;  %1841 = vmax.xlane.f32.xlu0 %v1840_v59  ;;  %v1279_v37 = vld [vmem:[%s6220_s5 + $0x190] sm:$0xff]  ;;  %v1280_v59 = vld [vmem:[%s6220_s5 + $0x198] sm:$0xff] }
 0x470   : > { %6322 = vst [vmem:[#allocation38_spill] sm:$0xff] %v5503_v15 }
 0x471   : > { %6323 = vst [vmem:[#allocation39_spill] sm:$0xff] %v5505_v56  ;;  %v1843_v49 = vmax.f32 %v5503_v15, %v5505_v56  ;;  %v1727_v43 = vpop.f32.mrb[48].mxu1 }
 0x472   : > { %v5515_v46 = vadd.f32 %v1727_v43, %v1277_v42  ;;  %v1729_v58 = vpop.f32.mrb[49].mxu1 }
 0x473   : > { %v5517_v54 = vadd.f32 %v1729_v58, %v1278_v28  ;;  %1844 = vmax.xlane.f32.xlu1 %v1843_v49  ;;  %v1281_v28 = vld [vmem:[%s6220_s5 + $0x1a0] sm:$0xff]  ;;  %v1282_v49 = vld [vmem:[%s6220_s5 + $0x1a8] sm:$0xff] }
 0x474   : > { %6324 = vst [vmem:[#allocation40_spill] sm:$0xff] %v5515_v46 }
 0x475   : > { %6325 = vst [vmem:[#allocation41_spill] sm:$0xff] %v5517_v54  ;;  %v1846_v62 = vmax.f32 %v5515_v46, %v5517_v54  ;;  %v1733_v0 = vpop.f32.mrb[50].mxu1 }
 0x476   : > { %v5527_v9 = vadd.f32 %v1733_v0, %v1279_v37  ;;  %v1735_v43 = vpop.f32.mrb[51].mxu1 }
 0x477   : > { %v5529_v42 = vadd.f32 %v1735_v43, %v1280_v59  ;;  %1847 = vmax.xlane.f32.xlu1 %v1846_v62  ;;  %v1283_v59 = vld [vmem:[%s6220_s5 + $0x1b0] sm:$0xff]  ;;  %v1284_v62 = vld [vmem:[%s6220_s5 + $0x1b8] sm:$0xff] }
 0x478   : > { %6326 = vst [vmem:[#allocation42_spill] sm:$0xff] %v5527_v9 }
 0x479   : > { %6327 = vst [vmem:[#allocation43_spill] sm:$0xff] %v5529_v42  ;;  %v1849_v58 = vmax.f32 %v5527_v9, %v5529_v42  ;;  %v1739_v34 = vpop.f32.mrb[52].mxu1 }
 0x47a   : > { %v5539_v40 = vadd.f32 %v1739_v34, %v1281_v28  ;;  %v1741_v0 = vpop.f32.mrb[53].mxu1 }
 0x47b   : > { %v5541_v37 = vadd.f32 %v1741_v0, %v1282_v49  ;;  %1850 = vmax.xlane.f32.xlu1 %v1849_v58 }
 0x47c   : > { %6328 = vst [vmem:[#allocation44_spill] sm:$0xff] %v5539_v40 }
 0x47d   : > { %6329 = vst [vmem:[#allocation45_spill] sm:$0xff] %v5541_v37  ;;  %v1852_v43 = vmax.f32 %v5539_v40, %v5541_v37  ;;  %v1745_v54 = vpop.f32.mrb[54].mxu1 }
 0x47e   : > { %v5551_v42 = vadd.f32 %v1745_v54, %v1283_v59  ;;  %v1747_v34 = vpop.f32.mrb[55].mxu1 }
 0x47f   : > { %v5553_v28 = vadd.f32 %v1747_v34, %v1284_v62  ;;  %1853 = vmax.xlane.f32.xlu1 %v1852_v43 }
 0x480   : > { %6330 = vst [vmem:[#allocation46_spill] sm:$0xff] %v5551_v42 }
 0x481   : > { %6331 = vst [vmem:[#allocation47_spill] sm:$0xff] %v5553_v28  ;;  %v1855_v49 = vmax.f32 %v5551_v42, %v5553_v28  ;;  %v1751_v58 = vpop.f32.mrb[56].mxu1 }
 0x482   : > { %v1753_v0 = vpop.f32.mrb[57].mxu1 }
 0x483   : > { %1856 = vmax.xlane.f32.xlu1 %v1855_v49 }
 0x485   : > { %v1757_v9 = vpop.f32.mrb[58].mxu1  ;;  %3951 = vrot.lane.b32.xlu0 %v4990_v38, %s4353_s15 }
 0x486   : > { %v1759_v46 = vpop.f32.mrb[59].mxu1 }
 0x489   : > { %v5559_v56 = vpop.f32.mrb[60].mxu1 }
 0x48a   : > { %v5561_v37 = vpop.f32.mrb[61].mxu1 }
 0x48d   : > { %v5563_v54 = vpop.f32.mrb[62].mxu1 }
 0x48e   : > { %v5565_v59 = vpop.f32.mrb[63].mxu1 }
 0x4a4   : > { %v1776_v62 = vpop.xlane.xlu0 %1775 }
 0x4a5   : > { %v1870_v43 = vsub.f32 %v5227_v13, %v1776_v62  ;;  %v1871_v34 = vsub.f32 %v5229_v7, %v1776_v62 }
 0x4a7   : > { %v1934_v28 = vmul.f32 1.442695, %v1870_v43  ;;  %v1936_v49 = vmul.f32 1.442695, %v1871_v34 }
 0x4a8   : > { %v1779_v42 = vpop.xlane.xlu1 %1778 }
 0x4a9   : > { %4024 = vpow2.f32 %v1934_v28  ;;  %v1872_v38 = vsub.f32 %v5239_v30, %v1779_v42  ;;  %v1873_v40 = vsub.f32 %v5241_v63, %v1779_v42 }
 0x4aa   : > { %4026 = vpow2.f32 %v1936_v49 }
 0x4ab   : > { %v1938_v15 = vmul.f32 1.442695, %v1872_v38  ;;  %v1940_v19 = vmul.f32 1.442695, %v1873_v40 }
 0x4ac   : > { %v1782_v6 = vpop.xlane.xlu0 %1781 }
 0x4ad   : > { %4028 = vpow2.f32 %v1938_v15  ;;  %v1874_v17 = vsub.f32 %v5251_v51, %v1782_v6  ;;  %v1875_v8 = vsub.f32 %v5253_v52, %v1782_v6  ;;  %v1286_v15 = vld [vmem:[%s6220_s5 + $0x1c8] sm:$0xff] }
 0x4ae   : > { %4030 = vpow2.f32 %v1940_v19 }
 0x4af   : > { %v1942_v13 = vmul.f32 1.442695, %v1874_v17  ;;  %v1944_v7 = vmul.f32 1.442695, %v1875_v8  ;;  %v1285_v8 = vld [vmem:[%s6220_s5 + $0x1c0] sm:$0xff] }
 0x4b0   : > { %v1785_v62 = vpop.xlane.xlu0 %1784 }
 0x4b1   : > { %4032 = vpow2.f32 %v1942_v13  ;;  %v1876_v28 = vsub.f32 %v5263_v18, %v1785_v62  ;;  %v1877_v30 = vsub.f32 %v5265_v55, %v1785_v62  ;;  %v5591_v18 = vadd.f32 %v1751_v58, %v1285_v8  ;;  %v1287_v58 = vld [vmem:[%s6220_s5 + $0x1d0] sm:$0xff]  ;;  %v1289_v8 = vld [vmem:[%s6220_s5 + $0x1e0] sm:$0xff] }
 0x4b2   : > { %4034 = vpow2.f32 %v1944_v7  ;;  %v5593_v55 = vadd.f32 %v1753_v0, %v1286_v15  ;;  %v1288_v7 = vld [vmem:[%s6220_s5 + $0x1d8] sm:$0xff]  ;;  %v1290_v15 = vld [vmem:[%s6220_s5 + $0x1e8] sm:$0xff] }
 0x4b3   : > { %v5575_v63 = vpop.eup %4024  ;;  %v1946_v42 = vmul.f32 1.442695, %v1876_v28  ;;  %v1948_v40 = vmul.f32 1.442695, %v1877_v30  ;;  %v5619_v30 = vadd.f32 %v1757_v9, %v1287_v58 }
 0x4b4   : > { %v5577_v43 = vpop.eup %4026  ;;  %v5601_v49 = vpop.xlane.xlu0 %1787  ;;  %v1858_v13 = vmax.f32 %v5591_v18, %v5593_v55 }
 0x4b5   : > { %4036 = vpow2.f32 %v1946_v42  ;;  %v2062_v6 = vadd.f32 %v5577_v43, %v5575_v63 }
 0x4b6   : > { %4038 = vpow2.f32 %v1948_v40 }
 0x4b7   : > { %v5587_v51 = vpop.eup %4028  ;;  %2063 = vadd.xlane.f32.xlu1 %v2062_v6  ;;  %v5623_v6 = vadd.f32 %v1759_v46, %v1288_v7  ;;  %v5636_v46 = vadd.f32 %v5559_v56, %v1289_v8  ;;  %v5639_v7 = vadd.f32 %v5561_v37, %v1290_v15  ;;  %v1292_v56 = vld [vmem:[%s6220_s5 + $0x1f8] sm:$0xff] }
 0x4b8   : > { %v5589_v52 = vpop.eup %4030  ;;  %v5603_v38 = vpop.xlane.xlu1 %1790 }
 0x4b9   : > { %v2065_v17 = vadd.f32 %v5589_v52, %v5587_v51  ;;  %v1864_v15 = vmax.f32 %v5636_v46, %v5639_v7 }
 0x4bb   : > { %v5597_v19 = vpop.eup %4032  ;;  %2066 = vadd.xlane.f32.xlu0 %v2065_v17 }
 0x4bc   : > { %6332 = vst [vmem:[#allocation48_spill] sm:$0xff] %v5597_v19  ;;  %v5599_v34 = vpop.eup %4034  ;;  %v5621_v42 = vpop.xlane.xlu0 %1793 }
 0x4bd   : > { %6333 = vst [vmem:[#allocation49_spill] sm:$0xff] %v5599_v34  ;;  %v2068_v0 = vadd.f32 %v5599_v34, %v5597_v19  ;;  %v1861_v34 = vmax.f32 %v5619_v30, %v5623_v6 }
 0x4bf   : > { %v5615_v62 = vpop.eup %4036  ;;  %1859 = vmax.xlane.f32.xlu0 %v1858_v13  ;;  %2069 = vadd.xlane.f32.xlu1 %v2068_v0 }
 0x4c0   : > { %v5617_v28 = vpop.eup %4038  ;;  %v1797_v40 = vpop.xlane.xlu1 %1796 }
 0x4c1   : > { %v1884_v17 = vsub.f32 %v5311_v4, %v1797_v40  ;;  %v1885_v13 = vsub.f32 %v5313_v60, %v1797_v40  ;;  %v2071_v9 = vadd.f32 %v5617_v28, %v5615_v62  ;;  %v1291_v4 = vld [vmem:[%s6220_s5 + $0x1f0] sm:$0xff] }
 0x4c3   : > { %v1962_v58 = vmul.f32 1.442695, %v1884_v17  ;;  %v1964_v0 = vmul.f32 1.442695, %v1885_v13  ;;  %2072 = vadd.xlane.f32.xlu0 %v2071_v9  ;;  %v5654_v17 = vadd.f32 %v5563_v54, %v1291_v4  ;;  %v5657_v9 = vadd.f32 %v5565_v59, %v1292_v56 }
 0x4c4   : > { %v1800_v19 = vpop.xlane.xlu0 %1799 }
 0x4c5   : > { %4040 = vpow2.f32 %v1962_v58  ;;  %v1886_v60 = vsub.f32 %v5323_v5, %v1800_v19  ;;  %v1887_v40 = vsub.f32 %v5325_v24, %v1800_v19 }
 0x4c6   : > { %4042 = vpow2.f32 %v1964_v0  ;;  %v1867_v0 = vmax.f32 %v5654_v17, %v5657_v9 }
 0x4c7   : > { %v1966_v37 = vmul.f32 1.442695, %v1886_v60  ;;  %v1968_v8 = vmul.f32 1.442695, %v1887_v40  ;;  %1862 = vmax.xlane.f32.xlu0 %v1861_v34 }
 0x4c8   : > { %v1803_v13 = vpop.xlane.xlu1 %1802 }
 0x4c9   : > { %4044 = vpow2.f32 %v1966_v37  ;;  %v1888_v5 = vsub.f32 %v5335_v25, %v1803_v13  ;;  %v1889_v24 = vsub.f32 %v5337_v61, %v1803_v13 }
 0x4ca   : > { %4046 = vpow2.f32 %v1968_v8 }
 0x4cb   : > { %v1970_v19 = vmul.f32 1.442695, %v1888_v5  ;;  %v1972_v58 = vmul.f32 1.442695, %v1889_v24  ;;  %1865 = vmax.xlane.f32.xlu0 %v1864_v15 }
 0x4cc   : > { %v1806_v34 = vpop.xlane.xlu0 %1805 }
 0x4cd   : > { %4048 = vpow2.f32 %v1970_v19  ;;  %v1890_v54 = vsub.f32 %v5347_v44, %v1806_v34  ;;  %v1891_v4 = vsub.f32 %v5349_v10, %v1806_v34 }
 0x4ce   : > { %4050 = vpow2.f32 %v1972_v58 }
 0x4cf   : > { %v5665_v59 = vpop.eup %4040  ;;  %v1974_v60 = vmul.f32 1.442695, %v1890_v54  ;;  %v1976_v25 = vmul.f32 1.442695, %v1891_v4  ;;  %1868 = vmax.xlane.f32.xlu0 %v1867_v0  ;;  %v1879_v54 = vsub.f32 %v5277_v16, %v5601_v49 }
 0x4d0   : > { %v5667_v61 = vpop.eup %4042  ;;  %3956 = vrot.lane.b32.xlu1 %v5023_v45, %s4353_s15  ;;  %v1809_v10 = vpop.xlane.xlu1 %1808 }
 0x4d1   : > { %4052 = vpow2.f32 %v1974_v60  ;;  %v2083_v40 = vadd.f32 %v5667_v61, %v5665_v59 }
 0x4d2   : > { %4054 = vpow2.f32 %v1976_v25 }
 0x4d3   : > { %v5673_v56 = vpop.eup %4044  ;;  %2084 = vadd.xlane.f32.xlu0 %v2083_v40 }
 0x4d4   : > { %v5675_v44 = vpop.eup %4046  ;;  %v1812_v37 = vpop.xlane.xlu0 %1811 }
 0x4d5   : > { %v1894_v8 = vsub.f32 %v5371_v35, %v1812_v37  ;;  %v1895_v15 = vsub.f32 %v5373_v12, %v1812_v37  ;;  %v2086_v13 = vadd.f32 %v5675_v44, %v5673_v56  ;;  %v1878_v12 = vsub.f32 %v5275_v23, %v5601_v49 }
 0x4d7   : > { %v5681_v45 = vpop.eup %4048  ;;  %v1982_v5 = vmul.f32 1.442695, %v1894_v8  ;;  %v1984_v24 = vmul.f32 1.442695, %v1895_v15  ;;  %2087 = vadd.xlane.f32.xlu0 %v2086_v13  ;;  %v1950_v37 = vmul.f32 1.442695, %v1878_v12  ;;  %v1880_v8 = vsub.f32 %v5287_v21, %v5603_v38 }
 0x4d8   : > { %v5683_v19 = vpop.eup %4050  ;;  %v5685_v58 = vpop.xlane.xlu1 %1814  ;;  %v1952_v13 = vmul.f32 1.442695, %v1879_v54  ;;  %v1882_v21 = vsub.f32 %v5299_v57, %v5621_v42  ;;  %v1883_v12 = vsub.f32 %v5301_v20, %v5621_v42 }
 0x4d9   : > { %4056 = vpow2.f32 %v1982_v5  ;;  %v2089_v34 = vadd.f32 %v5683_v19, %v5681_v45  ;;  %v1881_v5 = vsub.f32 %v5289_v29, %v5603_v38 }
 0x4da   : > { %4058 = vpow2.f32 %v1984_v24  ;;  %v1958_v57 = vmul.f32 1.442695, %v1882_v21 }
 0x4db   : > { %v5689_v35 = vpop.eup %4052  ;;  %2090 = vadd.xlane.f32.xlu0 %v2089_v34  ;;  %v1956_v49 = vmul.f32 1.442695, %v1881_v5 }
 0x4dc   : > { %v5693_v0 = vpop.eup %4054  ;;  %v1818_v4 = vpop.xlane.xlu1 %1817 }
 0x4dd   : > { %v1898_v60 = vsub.f32 %v5395_v41, %v1818_v4  ;;  %v1899_v25 = vsub.f32 %v5397_v27, %v1818_v4  ;;  %v2092_v40 = vadd.f32 %v5693_v0, %v5689_v35  ;;  %v1954_v41 = vmul.f32 1.442695, %v1880_v8 }
 0x4de   : > { %v1892_v4 = vsub.f32 %v5359_v31, %v1809_v10  ;;  %v1960_v8 = vmul.f32 1.442695, %v1883_v12 }
 0x4df   : > { %v1990_v15 = vmul.f32 1.442695, %v1898_v60  ;;  %v1992_v23 = vmul.f32 1.442695, %v1899_v25  ;;  %2093 = vadd.xlane.f32.xlu0 %v2092_v40  ;;  %v1893_v40 = vsub.f32 %v5361_v53, %v1809_v10 }
 0x4e0   : > { %v1821_v24 = vpop.xlane.xlu1 %1820  ;;  %v1978_v20 = vmul.f32 1.442695, %v1892_v4 }
 0x4e1   : > { %4060 = vpow2.f32 %v1990_v15  ;;  %v1980_v31 = vmul.f32 1.442695, %v1893_v40  ;;  %v1897_v15 = vsub.f32 %v5385_v47, %v5685_v58 }
 0x4e2   : > { %4062 = vpow2.f32 %v1992_v23 }
 0x4e3   : > { %v5705_v16 = vpop.eup %4056  ;;  %4064 = vpow2.f32 %v1950_v37  ;;  %v1988_v47 = vmul.f32 1.442695, %v1897_v15 }
 0x4e4   : > { %v5707_v27 = vpop.eup %4058  ;;  %4066 = vpow2.f32 %v1952_v13  ;;  %v1824_v34 = vpop.xlane.xlu0 %1823 }
 0x4e5   : > { %v1902_v29 = vsub.f32 %v5419_v3, %v1824_v34  ;;  %v1903_v38 = vsub.f32 %v5421_v26, %v1824_v34  ;;  %v2098_v54 = vadd.f32 %v5707_v27, %v5705_v16  ;;  %4068 = vpow2.f32 %v1954_v41 }
 0x4e6   : > { %4070 = vpow2.f32 %v1956_v49  ;;  %v1896_v26 = vsub.f32 %v5383_v36, %v5685_v58  ;;  %v1900_v49 = vsub.f32 %v5407_v50, %v1821_v24  ;;  %v1901_v58 = vsub.f32 %v5409_v22, %v1821_v24 }
 0x4e7   : > { %v1998_v60 = vmul.f32 1.442695, %v1902_v29  ;;  %v2000_v25 = vmul.f32 1.442695, %v1903_v38  ;;  %2099 = vadd.xlane.f32.xlu0 %v2098_v54 }
 0x4e8   : > { %v1827_v37 = vpop.xlane.xlu1 %1826  ;;  %v1986_v36 = vmul.f32 1.442695, %v1896_v26  ;;  %v1994_v50 = vmul.f32 1.442695, %v1900_v49  ;;  %v1996_v54 = vmul.f32 1.442695, %v1901_v58 }
 0x4e9   : > { %4072 = vpow2.f32 %v1998_v60  ;;  %v1904_v4 = vsub.f32 %v5431_v2, %v1827_v37  ;;  %v1905_v60 = vsub.f32 %v5433_v11, %v1827_v37 }
 0x4ea   : > { %4074 = vpow2.f32 %v2000_v25 }
 0x4eb   : > { %v5719_v3 = vpop.eup %4060  ;;  %4076 = vpow2.f32 %v1958_v57  ;;  %v2004_v37 = vmul.f32 1.442695, %v1905_v60 }
 0x4ec   : > { %v5723_v42 = vpop.eup %4062  ;;  %v1830_v23 = vpop.xlane.xlu1 %1829  ;;  %4078 = vpow2.f32 %v1960_v8 }
 0x4ed   : > { %v5727_v13 = vpop.eup %4064  ;;  %v1906_v53 = vsub.f32 %v5443_v48, %v1830_v23  ;;  %v1907_v10 = vsub.f32 %v5445_v33, %v1830_v23  ;;  %v2104_v5 = vadd.f32 %v5723_v42, %v5719_v3  ;;  %4080 = vpow2.f32 %v1978_v20 }
 0x4ee   : > { %v5733_v41 = vpop.eup %4066  ;;  %4082 = vpow2.f32 %v1980_v31 }
 0x4ef   : > { %v2006_v21 = vmul.f32 1.442695, %v1906_v53  ;;  %v2008_v34 = vmul.f32 1.442695, %v1907_v10  ;;  %2105 = vadd.xlane.f32.xlu0 %v2104_v5  ;;  %v5737_v12 = vpop.eup %4068  ;;  %v2074_v33 = vadd.f32 %v5733_v41, %v5727_v13 }
 0x4f0   : > { %v5739_v48 = vpop.eup %4070  ;;  %v1833_v22 = vpop.xlane.xlu0 %1832 }
 0x4f1   : > { %4084 = vpow2.f32 %v2006_v21  ;;  %v2077_v20 = vadd.f32 %v5739_v48, %v5737_v12  ;;  %v1908_v2 = vsub.f32 %v5455_v32, %v1833_v22  ;;  %v6334_v21 = vld [vmem:[#allocation34_spill] sm:$0xff] }
 0x4f2   : > { %4086 = vpow2.f32 %v2008_v34 }
 0x4f3   : > { %v5743_v29 = vpop.eup %4072  ;;  %4088 = vpow2.f32 %v1986_v36  ;;  %v2010_v5 = vmul.f32 1.442695, %v1908_v2 }
 0x4f4   : > { %v5745_v38 = vpop.eup %4074  ;;  %4090 = vpow2.f32 %v1988_v47  ;;  %2075 = vadd.xlane.f32.xlu1 %v2074_v33  ;;  %v1836_v24 = vpop.xlane.xlu1 %1835 }
 0x4f5   : > { %v1910_v25 = vsub.f32 %v5467_v1, %v1836_v24  ;;  %v1911_v57 = vsub.f32 %v5469_v14, %v1836_v24  ;;  %v2110_v40 = vadd.f32 %v5745_v38, %v5743_v29  ;;  %v5753_v8 = vpop.eup %4076  ;;  %4092 = vpow2.f32 %v1994_v50  ;;  %v6336_v50 = vld [vmem:[#allocation36_spill] sm:$0xff] }
 0x4f6   : > { %v5757_v26 = vpop.eup %4078  ;;  %4094 = vpow2.f32 %v1996_v54  ;;  %v2002_v1 = vmul.f32 1.442695, %v1904_v4  ;;  %v1909_v14 = vsub.f32 %v5457_v39, %v1833_v22  ;;  %v6335_v39 = vld [vmem:[#allocation35_spill] sm:$0xff]  ;;  %v6337_v4 = vld [vmem:[#allocation37_spill] sm:$0xff] }
 0x4f7   : > { %v2014_v31 = vmul.f32 1.442695, %v1910_v25  ;;  %v2016_v15 = vmul.f32 1.442695, %v1911_v57  ;;  %2111 = vadd.xlane.f32.xlu0 %v2110_v40  ;;  %v5760_v11 = vpop.eup %4080  ;;  %v2080_v10 = vadd.f32 %v5757_v26, %v5753_v8 }
 0x4f8   : > { %2078 = vadd.xlane.f32.xlu1 %v2077_v20  ;;  %v1839_v23 = vpop.xlane.xlu1 %1838  ;;  %v5763_v53 = vpop.eup %4082  ;;  %v2012_v49 = vmul.f32 1.442695, %v1909_v14  ;;  %v6338_v14 = vld [vmem:[#allocation38_spill] sm:$0xff] }
 0x4f9   : > { %4096 = vpow2.f32 %v2014_v31  ;;  %v1912_v34 = vsub.f32 %v6334_v21, %v1839_v23  ;;  %v1913_v47 = vsub.f32 %v6335_v39, %v1839_v23  ;;  %v2095_v25 = vadd.f32 %v5763_v53, %v5760_v11  ;;  %v6339_v23 = vld [vmem:[#allocation39_spill] sm:$0xff] }
 0x4fa   : > { %4098 = vpow2.f32 %v2016_v15 }
 0x4fb   : > { %v5767_v32 = vpop.eup %4084  ;;  %4100 = vpow2.f32 %v2002_v1  ;;  %v2018_v20 = vmul.f32 1.442695, %v1912_v34  ;;  %v2020_v2 = vmul.f32 1.442695, %v1913_v47 }
 0x4fc   : > { %v5769_v36 = vpop.eup %4086  ;;  %2081 = vadd.xlane.f32.xlu1 %v2080_v10  ;;  %v1842_v58 = vpop.xlane.xlu0 %1841  ;;  %4102 = vpow2.f32 %v2004_v37 }
 0x4fd   : > { %v5773_v33 = vpop.eup %4088  ;;  %v1914_v54 = vsub.f32 %v6336_v50, %v1842_v58  ;;  %v1915_v22 = vsub.f32 %v6337_v4, %v1842_v58  ;;  %v2116_v24 = vadd.f32 %v5769_v36, %v5767_v32  ;;  %4104 = vpow2.f32 %v2010_v5 }
 0x4fe   : > { %v5779_v60 = vpop.eup %4090  ;;  %4106 = vpow2.f32 %v2012_v49 }
 0x4ff   : > { %v2022_v57 = vmul.f32 1.442695, %v1914_v54  ;;  %v2024_v40 = vmul.f32 1.442695, %v1915_v22  ;;  %2117 = vadd.xlane.f32.xlu0 %v2116_v24  ;;  %v5783_v1 = vpop.eup %4092  ;;  %v2101_v49 = vadd.f32 %v5779_v60, %v5773_v33  ;;  %v6341_v22 = vld [vmem:[#allocation40_spill] sm:$0xff] }
 0x500   : > { %2096 = vadd.xlane.f32.xlu1 %v2095_v25  ;;  %v1845_v31 = vpop.xlane.xlu1 %1844  ;;  %v3952_v15 = vpop.permute.xlu0 %3951  ;;  %v6342_v25 = vld [vmem:[#allocation41_spill] sm:$0xff] }
 0x501   : > { %4108 = vpow2.f32 %v2022_v57  ;;  %v1916_v37 = vsub.f32 %v6338_v14, %v1845_v31  ;;  %v1917_v10 = vsub.f32 %v6339_v23, %v1845_v31  ;;  %v3954_v21 = vunpack.i.h.bf16 %v3952_v15  ;;  %v5787_v39 = vpop.eup %4094 }
 0x502   : > { %4110 = vpow2.f32 %v2024_v40  ;;  %v3953_v5 = vunpack.i.l.bf16 %v3952_v15  ;;  %v2107_v15 = vadd.f32 %v5787_v39, %v5783_v1 }
 0x503   : > { %v5791_v34 = vpop.eup %4096  ;;  %v2026_v47 = vmul.f32 1.442695, %v1916_v37  ;;  %4112 = vpow2.f32 %v2018_v20  ;;  %v2028_v50 = vmul.f32 1.442695, %v1917_v10 }
 0x504   : > { %6340 = vst [vmem:[#allocation34_spill] sm:$0xff] %v5791_v34  ;;  %v5793_v58 = vpop.eup %4098  ;;  %v3771_v54 = vpack.c.bf16 %v3954_v21, %v3953_v5  ;;  %2102 = vadd.xlane.f32.xlu1 %v2101_v49  ;;  %v1848_v4 = vpop.xlane.xlu1 %1847  ;;  %4114 = vpow2.f32 %v2020_v2  ;;  %v6343_v2 = vmov 0.0|0.0   ;;  %v6344_v21 = vld [vmem:[#allocation42_spill] sm:$0xff]  ;;  %v6345_v49 = vld [vmem:[#allocation43_spill] sm:$0xff] }
 0x505   : > { %v1918_v24 = vsub.f32 %v6341_v22, %v1848_v4  ;;  %v1919_v57 = vsub.f32 %v6342_v25, %v1848_v4  ;;  %v2122_v40 = vadd.f32 %v5793_v58, %v5791_v34  ;;  %v5799_v31 = vpop.eup %4100  ;;  %4116 = vpow2.f32 %v2026_v47 }
 0x506   : > { %3772 = vmatpush1.bf16.msra.mxu0 %v3771_v54  ;;  %v5803_v14 = vpop.eup %4102  ;;  %4118 = vpow2.f32 %v2028_v50 }
 0x507   : > { %v2030_v20 = vmul.f32 1.442695, %v1918_v24  ;;  %v2032_v37 = vmul.f32 1.442695, %v1919_v57  ;;  %2123 = vadd.xlane.f32.xlu0 %v2122_v40  ;;  %3773 = vmatprep.subr.bf16.mxu0 %v6343_v2  ;;  %v5806_v10 = vpop.eup %4104  ;;  %v2113_v47 = vadd.f32 %v5803_v14, %v5799_v31  ;;  %v6348_v40 = vld [vmem:[#allocation44_spill] sm:$0xff] }
 0x508   : > { %2108 = vadd.xlane.f32.xlu1 %v2107_v15  ;;  %v1851_v23 = vpop.xlane.xlu1 %1850  ;;  %v5810_v4 = vpop.eup %4106 }
 0x509   : > { %4120 = vpow2.f32 %v2030_v20  ;;  %v1920_v5 = vsub.f32 %v6344_v21, %v1851_v23  ;;  %v1921_v54 = vsub.f32 %v6345_v49, %v1851_v23  ;;  %v6349_v20 = vld [vmem:[#allocation45_spill] sm:$0xff]  ;;  %v2119_v21 = vadd.f32 %v5810_v4, %v5806_v10 }
 0x50a   : > { %4122 = vpow2.f32 %v2032_v37 }
 0x50b   : > { %v5814_v22 = vpop.eup %4108  ;;  %v2034_v24 = vmul.f32 1.442695, %v1920_v5  ;;  %v2036_v25 = vmul.f32 1.442695, %v1921_v54 }
 0x50c   : > { %6346 = vst [vmem:[#allocation35_spill] sm:$0xff] %v5814_v22  ;;  %v5816_v50 = vpop.eup %4110  ;;  %2114 = vadd.xlane.f32.xlu1 %v2113_v47  ;;  %v1854_v57 = vpop.xlane.xlu1 %1853 }
 0x50d   : > { %6347 = vst [vmem:[#allocation36_spill] sm:$0xff] %v5816_v50  ;;  %4124 = vpow2.f32 %v2034_v24  ;;  %v1922_v15 = vsub.f32 %v6348_v40, %v1854_v57  ;;  %v1923_v2 = vsub.f32 %v6349_v20, %v1854_v57  ;;  %v2128_v23 = vadd.f32 %v5816_v50, %v5814_v22  ;;  %v5822_v37 = vpop.eup %4112  ;;  %v6351_v57 = vld [vmem:[#allocation46_spill] sm:$0xff]  ;;  %v6352_v20 = vld [vmem:[#allocation47_spill] sm:$0xff] }
 0x50e   : > { %4126 = vpow2.f32 %v2036_v25  ;;  %v5826_v5 = vpop.eup %4114 }
 0x50f   : > { %v2038_v49 = vmul.f32 1.442695, %v1922_v15  ;;  %v2040_v54 = vmul.f32 1.442695, %v1923_v2  ;;  %2129 = vadd.xlane.f32.xlu0 %v2128_v23  ;;  %v5828_v24 = vpop.eup %4116  ;;  %v2125_v25 = vadd.f32 %v5826_v5, %v5822_v37 }
 0x510   : > { %2120 = vadd.xlane.f32.xlu1 %v2119_v21  ;;  %v1857_v47 = vpop.xlane.xlu1 %1856  ;;  %6350 = vst [vmem:[#allocation37_spill] sm:$0xff] %v5828_v24  ;;  %v5832_v50 = vpop.eup %4118 }
 0x511   : > { %4128 = vpow2.f32 %v2038_v49  ;;  %v1924_v40 = vsub.f32 %v6351_v57, %v1857_v47  ;;  %v1925_v22 = vsub.f32 %v6352_v20, %v1857_v47  ;;  %6353 = vst [vmem:[#allocation38_spill] sm:$0xff] %v5832_v50  ;;  %v2131_v49 = vadd.f32 %v5832_v50, %v5828_v24 }
 0x512   : > { %4130 = vpow2.f32 %v2040_v54 }
 0x513   : > { %v5836_v34 = vpop.eup %4120  ;;  %v2042_v15 = vmul.f32 1.442695, %v1924_v40  ;;  %v2044_v2 = vmul.f32 1.442695, %v1925_v22 }
 0x514   : > { %6354 = vst [vmem:[#allocation39_spill] sm:$0xff] %v5836_v34  ;;  %v5838_v23 = vpop.eup %4122  ;;  %2126 = vadd.xlane.f32.xlu1 %v2125_v25 }
 0x515   : > { %6355 = vst [vmem:[#allocation40_spill] sm:$0xff] %v5838_v23  ;;  %4132 = vpow2.f32 %v2042_v15  ;;  %v2134_v21 = vadd.f32 %v5838_v23, %v5836_v34 }
 0x516   : > { %4134 = vpow2.f32 %v2044_v2 }
 0x517   : > { %v5844_v47 = vpop.eup %4124  ;;  %2135 = vadd.xlane.f32.xlu0 %v2134_v21 }
 0x518   : > { %6356 = vst [vmem:[#allocation41_spill] sm:$0xff] %v5844_v47  ;;  %v5846_v54 = vpop.eup %4126  ;;  %2132 = vadd.xlane.f32.xlu1 %v2131_v49 }
 0x519   : > { %6357 = vst [vmem:[#allocation42_spill] sm:$0xff] %v5846_v54  ;;  %v2137_v22 = vadd.f32 %v5846_v54, %v5844_v47 }
 0x51b   : > { %v5850_v57 = vpop.eup %4128 }
 0x51c   : > { %6358 = vst [vmem:[#allocation43_spill] sm:$0xff] %v5850_v57  ;;  %v5852_v40 = vpop.eup %4130  ;;  %2138 = vadd.xlane.f32.xlu1 %v2137_v22 }
 0x51d   : > { %6359 = vst [vmem:[#allocation44_spill] sm:$0xff] %v5852_v40  ;;  %v2140_v20 = vadd.f32 %v5852_v40, %v5850_v57 }
 0x51f   : > { %v5856_v25 = vpop.eup %4132  ;;  %2141 = vadd.xlane.f32.xlu0 %v2140_v20 }
 0x520   : > { %6360 = vst [vmem:[#allocation45_spill] sm:$0xff] %v5856_v25  ;;  %v5858_v15 = vpop.eup %4134 }
 0x521   : > { %6361 = vst [vmem:[#allocation46_spill] sm:$0xff] %v5858_v15  ;;  %v2143_v2 = vadd.f32 %v5858_v15, %v5856_v25 }
 0x523   : > { %2144 = vadd.xlane.f32.xlu1 %v2143_v2 }
 0x544   : > { %v2064_v21 = vpop.xlane.xlu1 %2063 }
 0x545   : > { %4136 = vrcp.f32 %v2064_v21 }
 0x548   : > { %v2067_v49 = vpop.xlane.xlu0 %2066 }
 0x549   : > { %4138 = vrcp.f32 %v2067_v49 }
 0x54c   : > { %v2070_v47 = vpop.xlane.xlu1 %2069  ;;  %v1860_v54 = vpop.xlane.xlu0 %1859 }
 0x54d   : > { %v1926_v22 = vsub.f32 %v5591_v18, %v1860_v54  ;;  %v1927_v34 = vsub.f32 %v5593_v55, %v1860_v54  ;;  %4140 = vrcp.f32 %v2070_v47 }
 0x54f   : > { %v4137_v57 = vpop.eup %4136  ;;  %v2046_v40 = vmul.f32 1.442695, %v1926_v22  ;;  %v2048_v20 = vmul.f32 1.442695, %v1927_v34 }
 0x550   : > { %v3957_v23 = vpop.permute.xlu1 %3956  ;;  %v2073_v24 = vpop.xlane.xlu0 %2072  ;;  %v2191_v50 = vmul.f32 %v4137_v57, %v5577_v43  ;;  %v2190_v34 = vmul.f32 %v4137_v57, %v5575_v63  ;;  %v6362_v57 = vld [vmem:[#allocation49_spill] sm:$0xff] }
 0x551   : > { %4142 = vpow2.f32 %v2046_v40  ;;  %v3959_v2 = vunpack.i.h.bf16 %v3957_v23  ;;  %v3958_v25 = vunpack.i.l.bf16 %v3957_v23 }
 0x552   : > { %4144 = vpow2.f32 %v2048_v20  ;;  %2414 = vmatprep.mubr.f32.mxu0 %v2191_v50 }
 0x553   : > { %v3774_v21 = vpack.c.bf16 %v3959_v2, %v3958_v25  ;;  %4146 = vrcp.f32 %v2073_v24  ;;  %v4139_v49 = vpop.eup %4138  ;;  %v6363_v2 = vld [vmem:[#allocation48_spill] sm:$0xff] }
 0x554   : > { %v1863_v15 = vpop.xlane.xlu0 %1862  ;;  %v2193_v43 = vmul.f32 %v4139_v49, %v5589_v52 }
 0x555   : > { %v1928_v18 = vsub.f32 %v5619_v30, %v1863_v15  ;;  %v1929_v55 = vsub.f32 %v5623_v6, %v1863_v15  ;;  %3775 = vmatpush1.bf16.msra.mxu0 %v3774_v21  ;;  %v2192_v30 = vmul.f32 %v4139_v49, %v5587_v51 }
 0x557   : > { %v2050_v47 = vmul.f32 1.442695, %v1928_v18  ;;  %v2052_v54 = vmul.f32 1.442695, %v1929_v55  ;;  %v4141_v40 = vpop.eup %4140 }
 0x558   : > { %v1866_v22 = vpop.xlane.xlu0 %1865  ;;  %2415 = vmatmul.mubr.f32.vlgmr.msra.gmra.mrb[32].mxu0 %v2190_v34  ;;  %v2195_v25 = vmul.f32 %v4141_v40, %v6362_v57  ;;  %v2194_v21 = vmul.f32 %v4141_v40, %v6363_v2 }
 0x559   : > { %4148 = vpow2.f32 %v2050_v47  ;;  %v1930_v50 = vsub.f32 %v5636_v46, %v1866_v22  ;;  %v1931_v24 = vsub.f32 %v5639_v7, %v1866_v22  ;;  %2419 = vmatprep.mubr.f32.mxu0 %v2193_v43 }
 0x55a   : > { %4150 = vpow2.f32 %v2052_v54 }
 0x55b   : > { %v5872_v6 = vpop.eup %4142  ;;  %v2054_v23 = vmul.f32 1.442695, %v1930_v50  ;;  %v2056_v63 = vmul.f32 1.442695, %v1931_v24 }
 0x55c   : > { %v5875_v15 = vpop.eup %4144  ;;  %v1869_v52 = vpop.xlane.xlu0 %1868  ;;  %2420 = vmatmul.mubr.f32.gmra.mrb[34].mxu0 %v2192_v30 }
 0x55d   : > { %v4147_v20 = vpop.eup %4146  ;;  %4152 = vpow2.f32 %v2054_v23  ;;  %v1932_v46 = vsub.f32 %v5654_v17, %v1869_v52  ;;  %v1933_v7 = vsub.f32 %v5657_v9, %v1869_v52  ;;  %2424 = vmatprep.mubr.f32.mxu0 %v2195_v25  ;;  %v2146_v51 = vadd.f32 %v5875_v15, %v5872_v6 }
 0x55e   : > { %4154 = vpow2.f32 %v2056_v63  ;;  %v2197_v55 = vmul.f32 %v4147_v20, %v5617_v28  ;;  %v2196_v17 = vmul.f32 %v4147_v20, %v5615_v62 }
 0x55f   : > { %v2058_v49 = vmul.f32 1.442695, %v1932_v46  ;;  %v2060_v18 = vmul.f32 1.442695, %v1933_v7  ;;  %2147 = vadd.xlane.f32.xlu0 %v2146_v51 }
 0x560   : > { %2425 = vmatmul.mubr.f32.gmra.mrb[36].mxu0 %v2194_v21  ;;  %v2085_v50 = vpop.xlane.xlu0 %2084 }
 0x561   : > { %4156 = vpow2.f32 %v2058_v49  ;;  %2429 = vmatprep.mubr.f32.mxu0 %v2197_v55 }
 0x562   : > { %4158 = vpow2.f32 %v2060_v18 }
 0x563   : > { %v5884_v34 = vpop.eup %4148 }
 0x564   : > { %v5886_v9 = vpop.eup %4150  ;;  %2430 = vmatmul.mubr.f32.gmra.mrb[38].mxu0 %v2196_v17  ;;  %v2088_v23 = vpop.xlane.xlu0 %2087 }
 0x565   : > { %v2149_v47 = vadd.f32 %v5886_v9, %v5884_v34 }
 0x567   : > { %v5890_v54 = vpop.eup %4152  ;;  %2150 = vadd.xlane.f32.xlu1 %v2149_v47 }
 0x568   : > { %v5892_v43 = vpop.eup %4154  ;;  %v2091_v25 = vpop.xlane.xlu0 %2090 }
 0x569   : > { %v2152_v28 = vadd.f32 %v5892_v43, %v5890_v54 }
 0x56b   : > { %v5896_v40 = vpop.eup %4156  ;;  %2153 = vadd.xlane.f32.xlu0 %v2152_v28 }
 0x56c   : > { %v5898_v62 = vpop.eup %4158  ;;  %v2094_v21 = vpop.xlane.xlu0 %2093 }
 0x56d   : > { %v2155_v22 = vadd.f32 %v5898_v62, %v5896_v40 }
 0x56f   : > { %2156 = vadd.xlane.f32.xlu1 %v2155_v22 }
 0x581   : > { %v2076_v24 = vpop.xlane.xlu1 %2075 }
 0x582   : > { %4160 = vrcp.f32 %v2076_v24 }
 0x585   : > { %v2079_v30 = vpop.xlane.xlu1 %2078 }
 0x586   : > { %4162 = vrcp.f32 %v2079_v30 }
 0x587   : > { %4164 = vrcp.f32 %v2085_v50 }
 0x589   : > { %v2082_v63 = vpop.xlane.xlu1 %2081 }
 0x58a   : > { %4166 = vrcp.f32 %v2082_v63 }
 0x58b   : > { %4168 = vrcp.f32 %v2088_v23 }
 0x58c   : > { %v4161_v57 = vpop.eup %4160  ;;  %4170 = vrcp.f32 %v2091_v25 }
 0x58d   : > { %v2199_v52 = vmul.f32 %v4161_v57, %v5733_v41  ;;  %v2198_v20 = vmul.f32 %v4161_v57, %v5727_v13  ;;  %4172 = vrcp.f32 %v2094_v21  ;;  %v2097_v13 = vpop.xlane.xlu1 %2096 }
 0x58e   : > { %4174 = vrcp.f32 %v2097_v13 }
 0x58f   : > { %2434 = vmatprep.mubr.f32.mxu0 %v2199_v52 }
 0x590   : > { %v4163_v46 = vpop.eup %4162  ;;  %2435 = vmatmul.mubr.f32.gmra.mrb[40].mxu0 %v2198_v20 }
 0x591   : > { %v2201_v7 = vmul.f32 %v4163_v46, %v5739_v48  ;;  %v2200_v51 = vmul.f32 %v4163_v46, %v5737_v12  ;;  %v4165_v2 = vpop.eup %4164  ;;  %v2100_v48 = vpop.xlane.xlu0 %2099 }
 0x592   : > { %v2205_v55 = vmul.f32 %v4165_v2, %v5667_v61  ;;  %v2204_v12 = vmul.f32 %v4165_v2, %v5665_v59  ;;  %4176 = vrcp.f32 %v2100_v48 }
 0x593   : > { %2439 = vmatprep.mubr.f32.mxu0 %v2201_v7 }
 0x594   : > { %v4167_v49 = vpop.eup %4166  ;;  %2440 = vmatmul.mubr.f32.gmra.mrb[42].mxu0 %v2200_v51 }
 0x595   : > { %v2203_v18 = vmul.f32 %v4167_v49, %v5757_v26  ;;  %v2202_v41 = vmul.f32 %v4167_v49, %v5753_v8  ;;  %v4169_v17 = vpop.eup %4168  ;;  %v2103_v26 = vpop.xlane.xlu1 %2102 }
 0x596   : > { %v2207_v47 = vmul.f32 %v4169_v17, %v5675_v44  ;;  %v4171_v28 = vpop.eup %4170  ;;  %v2206_v8 = vmul.f32 %v4169_v17, %v5673_v56  ;;  %4178 = vrcp.f32 %v2103_v26  ;;  %v2106_v24 = vpop.xlane.xlu0 %2105 }
 0x597   : > { %2444 = vmatprep.mubr.f32.mxu0 %v2203_v18  ;;  %v2209_v22 = vmul.f32 %v4171_v28, %v5683_v19  ;;  %v4173_v50 = vpop.eup %4172  ;;  %v2208_v61 = vmul.f32 %v4171_v28, %v5681_v45  ;;  %4180 = vrcp.f32 %v2106_v24 }
 0x598   : > { %2445 = vmatmul.mubr.f32.gmra.mrb[44].mxu0 %v2202_v41  ;;  %v2211_v59 = vmul.f32 %v4173_v50, %v5693_v0  ;;  %v4175_v30 = vpop.eup %4174  ;;  %v2210_v44 = vmul.f32 %v4173_v50, %v5689_v35 }
 0x599   : > { %2449 = vmatprep.mubr.f32.mxu0 %v2205_v55  ;;  %v2109_v23 = vpop.xlane.xlu1 %2108  ;;  %v2213_v56 = vmul.f32 %v4175_v30, %v5763_v53  ;;  %v2212_v19 = vmul.f32 %v4175_v30, %v5760_v11  ;;  %v6367_v30 = vld [vmem:[#allocation38_spill] sm:$0xff] }
 0x59a   : > { %4182 = vrcp.f32 %v2109_v23  ;;  %v2112_v57 = vpop.xlane.xlu0 %2111 }
 0x59b   : > { %4184 = vrcp.f32 %v2112_v57  ;;  %v6370_v57 = vld [vmem:[#allocation39_spill] sm:$0xff] }
 0x59c   : > { %2450 = vmatmul.mubr.f32.gmra.mrb[46].mxu0 %v2204_v12  ;;  %v4177_v63 = vpop.eup %4176 }
 0x59d   : > { %2454 = vmatprep.mubr.f32.mxu0 %v2207_v47  ;;  %v2215_v45 = vmul.f32 %v4177_v63, %v5707_v27  ;;  %v2214_v0 = vmul.f32 %v4177_v63, %v5705_v16  ;;  %v2115_v52 = vpop.xlane.xlu1 %2114  ;;  %v6369_v63 = vld [vmem:[#allocation40_spill] sm:$0xff] }
 0x59e   : > { %4186 = vrcp.f32 %v2115_v52  ;;  %v2118_v46 = vpop.xlane.xlu0 %2117 }
 0x59f   : > { %4188 = vrcp.f32 %v2118_v46 }
 0x5a0   : > { %2455 = vmatmul.mubr.f32.gmra.mrb[48].mxu0 %v2206_v8  ;;  %v4179_v25 = vpop.eup %4178 }
 0x5a1   : > { %2459 = vmatprep.mubr.f32.mxu0 %v2209_v22  ;;  %v2217_v35 = vmul.f32 %v4179_v25, %v5779_v60  ;;  %v4181_v20 = vpop.eup %4180  ;;  %v2216_v53 = vmul.f32 %v4179_v25, %v5773_v33  ;;  %v2121_v51 = vpop.xlane.xlu1 %2120  ;;  %v6371_v25 = vld [vmem:[#allocation42_spill] sm:$0xff] }
 0x5a2   : > { %v2219_v11 = vmul.f32 %v4181_v20, %v5723_v42  ;;  %v2218_v27 = vmul.f32 %v4181_v20, %v5719_v3  ;;  %4190 = vrcp.f32 %v2121_v51  ;;  %v2124_v21 = vpop.xlane.xlu0 %2123  ;;  %v6375_v51 = vld [vmem:[#allocation46_spill] sm:$0xff] }
 0x5a3   : > { %4192 = vrcp.f32 %v2124_v21 }
 0x5a4   : > { %2460 = vmatmul.mubr.f32.gmra.mrb[50].mxu0 %v2208_v61  ;;  %v4183_v7 = vpop.eup %4182 }
 0x5a5   : > { %2464 = vmatprep.mubr.f32.mxu0 %v2211_v59  ;;  %v2221_v16 = vmul.f32 %v4183_v7, %v5787_v39  ;;  %v4185_v2 = vpop.eup %4184  ;;  %v2220_v60 = vmul.f32 %v4183_v7, %v5783_v1  ;;  %v2127_v18 = vpop.xlane.xlu1 %2126  ;;  %v6374_v7 = vld [vmem:[#allocation43_spill] sm:$0xff] }
 0x5a6   : > { %v2223_v33 = vmul.f32 %v4185_v2, %v5745_v38  ;;  %v2222_v42 = vmul.f32 %v4185_v2, %v5743_v29  ;;  %4194 = vrcp.f32 %v2127_v18  ;;  %v2130_v13 = vpop.xlane.xlu0 %2129  ;;  %v6376_v2 = vld [vmem:[#allocation45_spill] sm:$0xff] }
 0x5a7   : > { %4196 = vrcp.f32 %v2130_v13 }
 0x5a8   : > { %2465 = vmatmul.mubr.f32.gmra.mrb[52].mxu0 %v2210_v44  ;;  %v4187_v49 = vpop.eup %4186 }
 0x5a9   : > { %2469 = vmatprep.mubr.f32.mxu0 %v2213_v56  ;;  %v2225_v3 = vmul.f32 %v4187_v49, %v5803_v14  ;;  %v4189_v41 = vpop.eup %4188  ;;  %v2224_v39 = vmul.f32 %v4187_v49, %v5799_v31  ;;  %v2133_v17 = vpop.xlane.xlu1 %2132 }
 0x5aa   : > { %v2227_v1 = vmul.f32 %v4189_v41, %v5769_v36  ;;  %v2226_v38 = vmul.f32 %v4189_v41, %v5767_v32  ;;  %4198 = vrcp.f32 %v2133_v17  ;;  %v2136_v48 = vpop.xlane.xlu0 %2135  ;;  %v6364_v36 = vld [vmem:[#allocation34_spill] sm:$0xff] }
 0x5ab   : > { %4200 = vrcp.f32 %v2136_v48 }
 0x5ac   : > { %2470 = vmatmul.mubr.f32.gmra.mrb[54].mxu0 %v2212_v19  ;;  %v4191_v55 = vpop.eup %4190 }
 0x5ad   : > { %2474 = vmatprep.mubr.f32.mxu0 %v2215_v45  ;;  %v2229_v29 = vmul.f32 %v4191_v55, %v5810_v4  ;;  %v4193_v12 = vpop.eup %4192  ;;  %v2228_v14 = vmul.f32 %v4191_v55, %v5806_v10  ;;  %v2139_v8 = vpop.xlane.xlu1 %2138  ;;  %v6365_v10 = vld [vmem:[#allocation36_spill] sm:$0xff] }
 0x5ae   : > { %v2231_v31 = vmul.f32 %v4193_v12, %v5793_v58  ;;  %v2230_v28 = vmul.f32 %v4193_v12, %v6364_v36  ;;  %4202 = vrcp.f32 %v2139_v8  ;;  %v2142_v22 = vpop.xlane.xlu0 %2141  ;;  %v6366_v58 = vld [vmem:[#allocation35_spill] sm:$0xff] }
 0x5af   : > { %4204 = vrcp.f32 %v2142_v22 }
 0x5b0   : > { %2475 = vmatmul.mubr.f32.gmra.mrb[56].mxu0 %v2214_v0  ;;  %v4195_v47 = vpop.eup %4194 }
 0x5b1   : > { %2479 = vmatprep.mubr.f32.mxu0 %v2217_v35  ;;  %v2233_v32 = vmul.f32 %v4195_v47, %v5826_v5  ;;  %v4197_v26 = vpop.eup %4196  ;;  %v2232_v4 = vmul.f32 %v4195_v47, %v5822_v37  ;;  %v2145_v59 = vpop.xlane.xlu1 %2144  ;;  %v6368_v5 = vld [vmem:[#allocation37_spill] sm:$0xff] }
 0x5b2   : > { %v2235_v50 = vmul.f32 %v4197_v26, %v6365_v10  ;;  %v2234_v24 = vmul.f32 %v4197_v26, %v6366_v58  ;;  %4206 = vrcp.f32 %v2145_v59  ;;  %v6372_v35 = vld [vmem:[#allocation41_spill] sm:$0xff] }
 0x5b4   : > { %2480 = vmatmul.mubr.f32.gmra.mrb[58].mxu0 %v2216_v53  ;;  %v4199_v61 = vpop.eup %4198  ;;  %v6373_v53 = vld [vmem:[#allocation44_spill] sm:$0xff] }
 0x5b5   : > { %2484 = vmatprep.mubr.f32.mxu0 %v2219_v11  ;;  %v2237_v44 = vmul.f32 %v4199_v61, %v6367_v30  ;;  %v4201_v23 = vpop.eup %4200  ;;  %v2236_v56 = vmul.f32 %v4199_v61, %v6368_v5 }
 0x5b6   : > { %v2239_v37 = vmul.f32 %v4201_v23, %v6369_v63  ;;  %v2238_v45 = vmul.f32 %v4201_v23, %v6370_v57 }
 0x5b8   : > { %2485 = vmatmul.mubr.f32.gmra.mrb[60].mxu0 %v2218_v27  ;;  %v4203_v19 = vpop.eup %4202 }
 0x5b9   : > { %2489 = vmatprep.mubr.f32.mxu0 %v2221_v16  ;;  %v2241_v0 = vmul.f32 %v4203_v19, %v6371_v25  ;;  %v4205_v52 = vpop.eup %4204  ;;  %v2240_v20 = vmul.f32 %v4203_v19, %v6372_v35  ;;  %v6378_v25 = vld [vmem:[#allocation2_spill] sm:$0xff] }
 0x5ba   : > { %v2243_v46 = vmul.f32 %v4205_v52, %v6373_v53  ;;  %v2242_v27 = vmul.f32 %v4205_v52, %v6374_v7  ;;  %v6380_v7 = vld [vmem:[#allocation8_spill] sm:$0xff] }
 0x5bc   : > { %2490 = vmatmul.mubr.f32.gmra.mrb[62].mxu0 %v2220_v60  ;;  %v4207_v11 = vpop.eup %4206 }
 0x5bd   : > { %2494 = vmatprep.mubr.f32.mxu0 %v2223_v33  ;;  %v2245_v16 = vmul.f32 %v4207_v11, %v6375_v51  ;;  %v2244_v60 = vmul.f32 %v4207_v11, %v6376_v2 }
 0x5c0   : > { %2495 = vmatmul.mubr.f32.gmra.mrb[64].mxu0 %v2222_v42 }
 0x5c1   : > { %2499 = vmatprep.mubr.f32.mxu0 %v2225_v3 }
 0x5c4   : > { %2500 = vmatmul.mubr.f32.gmra.mrb[66].mxu0 %v2224_v39 }
 0x5c5   : > { %2504 = vmatprep.mubr.f32.mxu0 %v2227_v1 }
 0x5c8   : > { %2505 = vmatmul.mubr.f32.gmra.mrb[68].mxu0 %v2226_v38 }
 0x5c9   : > { %2509 = vmatprep.mubr.f32.mxu0 %v2229_v29 }
 0x5cc   : > { %2510 = vmatmul.mubr.f32.gmra.mrb[70].mxu0 %v2228_v14 }
 0x5cd   : > { %2514 = vmatprep.mubr.f32.mxu0 %v2231_v31 }
 0x5d0   : > { %2515 = vmatmul.mubr.f32.gmra.mrb[72].mxu0 %v2230_v28 }
 0x5d1   : > { %2519 = vmatprep.mubr.f32.mxu0 %v2233_v32 }
 0x5d4   : > { %2520 = vmatmul.mubr.f32.gmra.mrb[74].mxu0 %v2232_v4 }
 0x5d5   : > { %2524 = vmatprep.mubr.f32.mxu0 %v2235_v50 }
 0x5d8   : > { %2525 = vmatmul.mubr.f32.gmra.mrb[76].mxu0 %v2234_v24 }
 0x5d9   : > { %2529 = vmatprep.mubr.f32.mxu0 %v2237_v44 }
 0x5dc   : > { %2530 = vmatmul.mubr.f32.gmra.mrb[78].mxu0 %v2236_v56 }
 0x5dd   : > { %2534 = vmatprep.mubr.f32.mxu0 %v2239_v37  ;;  %v6377_v37 = vld [vmem:[#allocation3_spill] sm:$0xff] }
 0x5de   : > { %v3261_v19 = vmul.f32 -1.442695, %v6377_v37 }
 0x5e0   : > { %2535 = vmatmul.mubr.f32.gmra.mrb[80].mxu0 %v2238_v45 }
 0x5e1   : > { %2539 = vmatprep.mubr.f32.mxu0 %v2241_v0  ;;  %v3262_v0 = vmul.f32 -1.442695, %v6378_v25 }
 0x5e4   : > { %2540 = vmatmul.mubr.f32.gmra.mrb[82].mxu0 %v2240_v20  ;;  %v6379_v20 = vld [vmem:[#allocation9_spill] sm:$0xff] }
 0x5e5   : > { %2544 = vmatprep.mubr.f32.mxu0 %v2243_v46  ;;  %v3263_v53 = vmul.f32 -1.442695, %v6379_v20 }
 0x5e8   : > { %2545 = vmatmul.mubr.f32.gmra.mrb[84].mxu0 %v2242_v27  ;;  %v3264_v27 = vmul.f32 -1.442695, %v6380_v7 }
 0x5e9   : > { %2549 = vmatprep.mubr.f32.mxu0 %v2245_v16 }
 0x5ec   : > { %v2148_v21 = vpop.xlane.xlu0 %2147  ;;  %2550 = vmatmul.mubr.f32.gmra.mrb[86].mxu0 %v2244_v60 }
 0x5ed   : > { %4208 = vrcp.f32 %v2148_v21 }
 0x5f4   : > { %v2151_v33 = vpop.xlane.xlu1 %2150 }
 0x5f5   : > { %4210 = vrcp.f32 %v2151_v33  ;;  %v2735_v33 = vld [vmem:[%s6218_s3] sm:$0xff] }
 0x5f7   : > { %v4209_v49 = vpop.eup %4208 }
 0x5f8   : > { %v2154_v42 = vpop.xlane.xlu0 %2153  ;;  %v2247_v18 = vmul.f32 %v4209_v49, %v5875_v15  ;;  %v2246_v3 = vmul.f32 %v4209_v49, %v5872_v6  ;;  %v2736_v49 = vld [vmem:[%s6218_s3 + $0x8] sm:$0xff] }
 0x5f9   : > { %4212 = vrcp.f32 %v2154_v42 }
 0x5fa   : > { %2554 = vmatprep.mubr.f32.mxu0 %v2247_v18 }
 0x5fb   : > { %2555 = vmatmul.mubr.f32.gmra.mrb[88].mxu0 %v2246_v3  ;;  %v3776_v3 = vpack.c.bf16 %v2736_v49, %v2735_v33  ;;  %v6384_v49 = vld [vmem:[#allocation30_spill] sm:$0xff] }
 0x5fc   : > { %v2157_v41 = vpop.xlane.xlu1 %2156 }
 0x5fd   : > { %4214 = vrcp.f32 %v2157_v41  ;;  %3777 = vmatprep.subr.bf16.mxu0 %v3776_v3  ;;  %3784 = vmatprep.subr.bf16.mxu1 %v3776_v3 }
 0x5fe   : > { %4216 = vpow2.f32 %v3261_v19  ;;  %3779 = vmatpush3.bf16.msra.mxu0 %v3776_v3  ;;  %3786 = vmatpush3.bf16.msra.mxu1 %v3776_v3 }
 0x5ff   : > { %v4211_v39 = vpop.eup %4210  ;;  %4218 = vpow2.f32 %v3262_v0 }
 0x600   : > { %v2249_v13 = vmul.f32 %v4211_v39, %v5886_v9  ;;  %v2248_v1 = vmul.f32 %v4211_v39, %v5884_v34  ;;  %4220 = vpow2.f32 %v3263_v53 }
 0x601   : > { %4222 = vpow2.f32 %v3264_v27 }
 0x602   : > { %2559 = vmatprep.mubr.f32.mxu0 %v2249_v13  ;;  %v2737_v13 = vld [vmem:[%s6218_s3 + $0x10] sm:$0xff] }
 0x603   : > { %v4213_v55 = vpop.eup %4212  ;;  %2560 = vmatmul.mubr.f32.gmra.mrb[90].mxu0 %v2248_v1  ;;  %v2738_v1 = vld [vmem:[%s6218_s3 + $0x18] sm:$0xff] }
 0x604   : > { %v2251_v38 = vmul.f32 %v4213_v55, %v5892_v43  ;;  %v2250_v17 = vmul.f32 %v4213_v55, %v5890_v54 }
 0x606   : > { %2564 = vmatprep.mubr.f32.mxu0 %v2251_v38 }
 0x607   : > { %v4215_v15 = vpop.eup %4214  ;;  %2565 = vmatmul.mubr.f32.gmra.mrb[92].mxu0 %v2250_v17  ;;  %v3780_v17 = vpack.c.bf16 %v2738_v1, %v2737_v13  ;;  %v6387_v13 = vld [vmem:[#allocation4_spill] sm:$0xff] }
 0x608   : > { %v2253_v6 = vmul.f32 %v4215_v15, %v5898_v62  ;;  %v2252_v29 = vmul.f32 %v4215_v15, %v5896_v40  ;;  %v4217_v16 = vpop.eup %4216  ;;  %v3278_v1 = vmul.f32 -1.442695, %v6387_v13 }
 0x609   : > { %v1133_v60 = vadd.f32 1.0, %v4217_v16  ;;  %v4219_v42 = vpop.eup %4218  ;;  %3781 = vmatprep.subr.bf16.mxu0 %v3780_v17  ;;  %3785 = vmatprep.subr.bf16.mxu1 %v3780_v17 }
 0x60a   : > { %2569 = vmatprep.mubr.f32.mxu0 %v2253_v6  ;;  %v1134_v41 = vadd.f32 1.0, %v4219_v42  ;;  %v4221_v55 = vpop.eup %4220  ;;  %3783 = vmatpush3.bf16.msra.mxu0 %v3780_v17  ;;  %v3276_v42 = vmul.f32 -1.442695, %v6384_v49 }
 0x60b   : > { %2570 = vmatmul.mubr.f32.gmra.mrb[94].mxu0 %v2252_v29  ;;  %4224 = vrcp.f32 %v1133_v60  ;;  %v1135_v6 = vadd.f32 1.0, %v4221_v55  ;;  %3787 = vmatpush3.bf16.msra.mxu1 %v3780_v17  ;;  %v6383_v60 = vld [vmem:[#allocation31_spill] sm:$0xff] }
 0x60c   : > { %4226 = vrcp.f32 %v1134_v41  ;;  %v6386_v41 = vld [vmem:[#allocation17_spill] sm:$0xff] }
 0x60d   : > { %4228 = vrcp.f32 %v1135_v6 }
 0x62b   : > { %v2416_v12 = vpop.f32.mrb[32].mxu0 }
 0x62c   : > { %2607 = vrot.lane.b32.xlu0 %v2416_v12, %s4352_s14  ;;  %v2418_v34 = vpop.f32.mrb[33].mxu0  ;;  %v4223_v12 = vpop.eup %4222 }
 0x62f   : > { %v2421_v9 = vpop.f32.mrb[34].mxu0 }
 0x630   : > { %2609 = vrot.lane.b32.xlu0 %v2421_v9, %s4352_s14  ;;  %v2423_v14 = vpop.f32.mrb[35].mxu0 }
 0x631   : > { %v1136_v14 = vadd.f32 1.0, %v4223_v12 }
 0x633   : > { %v2426_v43 = vpop.f32.mrb[36].mxu0  ;;  %4230 = vrcp.f32 %v1136_v14  ;;  %v6391_v14 = vld [vmem:[#allocation6_spill] sm:$0xff] }
 0x634   : > { %2611 = vrot.lane.b32.xlu0 %v2426_v43, %s4352_s14  ;;  %v2428_v54 = vpop.f32.mrb[37].mxu0 }
 0x637   : > { %v2431_v48 = vpop.f32.mrb[38].mxu0 }
 0x638   : > { %2613 = vrot.lane.b32.xlu0 %v2431_v48, %s4352_s14  ;;  %v2433_v62 = vpop.f32.mrb[39].mxu0  ;;  %v4225_v48 = vpop.eup %4224 }
 0x663   : > { %v2436_v31 = vpop.f32.mrb[40].mxu0 }
 0x664   : > { %2615 = vrot.lane.b32.xlu0 %v2436_v31, %s4352_s14  ;;  %v2438_v40 = vpop.f32.mrb[41].mxu0 }
 0x667   : > { %v2441_v47 = vpop.f32.mrb[42].mxu0 }
 0x668   : > { %2617 = vrot.lane.b32.xlu0 %v2441_v47, %s4352_s14  ;;  %v2443_v36 = vpop.f32.mrb[43].mxu0  ;;  %v4227_v47 = vpop.eup %4226 }
 0x66b   : > { %v2446_v28 = vpop.f32.mrb[44].mxu0 }
 0x66c   : > { %v2448_v8 = vpop.f32.mrb[45].mxu0 }
 0x66f   : > { %v2451_v32 = vpop.f32.mrb[46].mxu0 }
 0x670   : > { %v2453_v26 = vpop.f32.mrb[47].mxu0 }
 0x671   : > { %v4229_v26 = vpop.eup %4228 }
 0x673   : > { %v2456_v4 = vpop.f32.mrb[48].mxu0 }
 0x674   : > { %v2458_v22 = vpop.f32.mrb[49].mxu0 }
 0x675   : > { %v6381_v22 = vld [vmem:[#allocation13_spill] sm:$0xff] }
 0x677   : > { %v2461_v10 = vpop.f32.mrb[50].mxu0 }
 0x678   : > { %v2463_v50 = vpop.f32.mrb[51].mxu0 }
 0x67b   : > { %v2466_v61 = vpop.f32.mrb[52].mxu0 }
 0x67c   : > { %v2468_v58 = vpop.f32.mrb[53].mxu0 }
 0x67f   : > { %v2471_v24 = vpop.f32.mrb[54].mxu0 }
 0x680   : > { %v2473_v59 = vpop.f32.mrb[55].mxu0 }
 0x683   : > { %v5964_v30 = vpop.f32.mrb[56].mxu0 }
 0x684   : > { %v2478_v44 = vpop.f32.mrb[57].mxu0 }
 0x687   : > { %v5966_v23 = vpop.f32.mrb[58].mxu0 }
 0x688   : > { %v2483_v5 = vpop.f32.mrb[59].mxu0 }
 0x68b   : > { %v2486_v56 = vpop.f32.mrb[60].mxu0 }
 0x68c   : > { %2635 = vrot.lane.b32.xlu0 %v2486_v56, %s4352_s14  ;;  %v2488_v63 = vpop.f32.mrb[61].mxu0 }
 0x68f   : > { %v2491_v57 = vpop.f32.mrb[62].mxu0 }
 0x690   : > { %2619 = vrot.lane.b32.xlu0 %v2446_v28, %s4352_s14  ;;  %2637 = vrot.lane.b32.xlu1 %v2491_v57, %s4352_s14  ;;  %v2493_v45 = vpop.f32.mrb[63].mxu0 }
 0x693   : > { %v2496_v52 = vpop.f32.mrb[64].mxu0 }
 0x694   : > { %2621 = vrot.lane.b32.xlu0 %v2451_v32, %s4352_s14  ;;  %2639 = vrot.lane.b32.xlu1 %v2496_v52, %s4352_s14  ;;  %v2498_v35 = vpop.f32.mrb[65].mxu0 }
 0x697   : > { %v2501_v46 = vpop.f32.mrb[66].mxu0 }
 0x698   : > { %2623 = vrot.lane.b32.xlu0 %v2456_v4, %s4352_s14  ;;  %2641 = vrot.lane.b32.xlu1 %v2501_v46, %s4352_s14  ;;  %v2503_v11 = vpop.f32.mrb[67].mxu0 }
 0x69b   : > { %v2506_v51 = vpop.f32.mrb[68].mxu0 }
 0x69c   : > { %2625 = vrot.lane.b32.xlu0 %v2461_v10, %s4352_s14  ;;  %2643 = vrot.lane.b32.xlu1 %v2506_v51, %s4352_s14  ;;  %v2508_v2 = vpop.f32.mrb[69].mxu0  ;;  %v3265_v10 = vmul.f32 -1.442695, %v6381_v22 }
 0x69e   : > { %v2608_v15 = vpop.permute.xlu0 %2607  ;;  %4232 = vpow2.f32 %v3265_v10  ;;  %v6395_v10 = vld [vmem:[#allocation10_spill] sm:$0xff] }
 0x69f   : > { %v2511_v21 = vpop.f32.mrb[70].mxu0  ;;  %v2703_v62 = vmul.f32 %v4225_v48, %v2608_v15  ;;  %v6389_v15 = vld [vmem:[#allocation7_spill] sm:$0xff] }
 0x6a0   : > { %2627 = vrot.lane.b32.xlu0 %v2466_v61, %s4352_s14  ;;  %2645 = vrot.lane.b32.xlu1 %v2511_v21, %s4352_s14  ;;  %v2513_v18 = vpop.f32.mrb[71].mxu0  ;;  %v3275_v21 = vmul.f32 -1.442695, %v6383_v60  ;;  %v3279_v6 = vmul.f32 -1.442695, %v6389_v15 }
 0x6a1   : > { %v6385_v18 = vld [vmem:[#allocation5_spill] sm:$0xff] }
 0x6a2   : > { %v2610_v9 = vpop.permute.xlu0 %2609  ;;  %v3277_v3 = vmul.f32 -1.442695, %v6385_v18  ;;  %v6401_v18 = vld [vmem:[#allocation19_spill] sm:$0xff] }
 0x6a3   : > { %v2516_v39 = vpop.f32.mrb[72].mxu0  ;;  %v2704_v28 = vmul.f32 %v4227_v47, %v2610_v9  ;;  %v6393_v47 = vld [vmem:[#allocation11_spill] sm:$0xff] }
 0x6a4   : > { %2629 = vrot.lane.b32.xlu0 %v2471_v24, %s4352_s14  ;;  %2647 = vrot.lane.b32.xlu1 %v2516_v39, %s4352_s14  ;;  %v2518_v38 = vpop.f32.mrb[73].mxu0  ;;  %v4231_v24 = vpop.eup %4230  ;;  %v3267_v39 = vmul.f32 -1.442695, %v6386_v41 }
 0x6a5   : > { %v6388_v38 = vld [vmem:[#allocation16_spill] sm:$0xff] }
 0x6a6   : > { %v2612_v36 = vpop.permute.xlu0 %2611  ;;  %v3268_v17 = vmul.f32 -1.442695, %v6388_v38 }
 0x6a7   : > { %v2521_v29 = vpop.f32.mrb[74].mxu0  ;;  %v2705_v4 = vmul.f32 %v4229_v26, %v2612_v36  ;;  %v3281_v36 = vmul.f32 -1.442695, %v6393_v47 }
 0x6a8   : > { %2631 = vrot.lane.b32.xlu0 %v5964_v30, %s4352_s14  ;;  %2649 = vrot.lane.b32.xlu1 %v2521_v29, %s4352_s14  ;;  %v2523_v34 = vpop.f32.mrb[75].mxu0  ;;  %v6382_v30 = vld [vmem:[#allocation12_spill] sm:$0xff]  ;;  %v4233_v37 = vpop.eup %4232 }
 0x6a9   : > { %v3266_v44 = vmul.f32 -1.442695, %v6382_v30  ;;  %v1137_v19 = vadd.f32 1.0, %v4233_v37  ;;  %v6390_v34 = vld [vmem:[#allocation21_spill] sm:$0xff] }
 0x6aa   : > { %v2614_v50 = vpop.permute.xlu0 %2613  ;;  %v3269_v9 = vmul.f32 -1.442695, %v6390_v34 }
 0x6ab   : > { %v2526_v43 = vpop.f32.mrb[76].mxu0  ;;  %v2706_v59 = vmul.f32 %v4231_v24, %v2614_v50  ;;  %4234 = vpow2.f32 %v3266_v44  ;;  %v3282_v50 = vmul.f32 -1.442695, %v6395_v10  ;;  %v6396_v24 = vld [vmem:[#allocation24_spill] sm:$0xff] }
 0x6ac   : > { %2633 = vrot.lane.b32.xlu0 %v5966_v23, %s4352_s14  ;;  %2651 = vrot.lane.b32.xlu1 %v2526_v43, %s4352_s14  ;;  %v2528_v54 = vpop.f32.mrb[77].mxu0  ;;  %4236 = vrcp.f32 %v1137_v19  ;;  %v3280_v43 = vmul.f32 -1.442695, %v6391_v14 }
 0x6af   : > { %v2531_v31 = vpop.f32.mrb[78].mxu0 }
 0x6b0   : > { %2778 = vrot.lane.b32.xlu0 %v2703_v62, %s4355_s18  ;;  %2653 = vrot.lane.b32.xlu1 %v2531_v31, %s4352_s14  ;;  %v2533_v40 = vpop.f32.mrb[79].mxu0  ;;  %v6392_v62 = vld [vmem:[#allocation20_spill] sm:$0xff] }
 0x6b1   : > { %v3270_v31 = vmul.f32 -1.442695, %v6392_v62 }
 0x6b3   : > { %v2536_v8 = vpop.f32.mrb[80].mxu0 }
 0x6b4   : > { %2780 = vrot.lane.b32.xlu0 %v2704_v28, %s4355_s18  ;;  %2655 = vrot.lane.b32.xlu1 %v2536_v8, %s4352_s14  ;;  %v2538_v32 = vpop.f32.mrb[81].mxu0 }
 0x6b5   : > { %v4235_v57 = vpop.eup %4234  ;;  %v6394_v32 = vld [vmem:[#allocation25_spill] sm:$0xff] }
 0x6b6   : > { %v1138_v45 = vadd.f32 1.0, %v4235_v57  ;;  %v4237_v52 = vpop.eup %4236  ;;  %v3271_v26 = vmul.f32 -1.442695, %v6394_v32 }
 0x6b7   : > { %v2541_v61 = vpop.f32.mrb[82].mxu0 }
 0x6b8   : > { %2782 = vrot.lane.b32.xlu0 %v2705_v4, %s4355_s18  ;;  %2657 = vrot.lane.b32.xlu1 %v2541_v61, %s4352_s14  ;;  %v2543_v58 = vpop.f32.mrb[83].mxu0  ;;  %4238 = vrcp.f32 %v1138_v45  ;;  %v6398_v45 = vld [vmem:[#allocation29_spill] sm:$0xff] }
 0x6b9   : > { %4240 = vpow2.f32 %v3275_v21 }
 0x6ba   : > { %4242 = vpow2.f32 %v3276_v42 }
 0x6bb   : > { %v2546_v23 = vpop.f32.mrb[84].mxu0  ;;  %4244 = vpow2.f32 %v3277_v3  ;;  %v3285_v3 = vmul.f32 -1.442695, %v6401_v18 }
 0x6bc   : > { %2784 = vrot.lane.b32.xlu0 %v2706_v59, %s4355_s18  ;;  %2659 = vrot.lane.b32.xlu1 %v2546_v23, %s4352_s14  ;;  %v2548_v5 = vpop.f32.mrb[85].mxu0  ;;  %4246 = vpow2.f32 %v3267_v39  ;;  %v3272_v59 = vmul.f32 -1.442695, %v6396_v24 }
 0x6bd   : > { %4248 = vpow2.f32 %v3278_v1 }
 0x6be   : > { %4250 = vpow2.f32 %v3268_v17 }
 0x6bf   : > { %v2551_v56 = vpop.f32.mrb[86].mxu0  ;;  %4252 = vpow2.f32 %v3279_v6 }
 0x6c0   : > { %2661 = vrot.lane.b32.xlu1 %v2551_v56, %s4352_s14  ;;  %v2553_v63 = vpop.f32.mrb[87].mxu0  ;;  %v6397_v56 = vld [vmem:[#allocation15_spill] sm:$0xff] }
 0x6c1   : > { %v3283_v63 = vmul.f32 -1.442695, %v6397_v56 }
 0x6c2   : > { %v4239_v11 = vpop.eup %4238 }
 0x6c3   : > { %v4241_v55 = vpop.eup %4240 }
 0x6c4   : > { %v1147_v29 = vadd.f32 1.0, %v4241_v55  ;;  %v4243_v12 = vpop.eup %4242 }
 0x6c5   : > { %v1148_v54 = vadd.f32 1.0, %v4243_v12  ;;  %v4245_v48 = vpop.eup %4244 }
 0x6c6   : > { %4254 = vrcp.f32 %v1147_v29  ;;  %v4247_v40 = vpop.eup %4246  ;;  %v1149_v28 = vadd.f32 1.0, %v4245_v48  ;;  %v6402_v29 = vld [vmem:[#allocation18_spill] sm:$0xff] }
 0x6c7   : > { %4256 = vpow2.f32 %v3269_v9  ;;  %v4249_v8 = vpop.eup %4248  ;;  %v1139_v4 = vadd.f32 1.0, %v4247_v40  ;;  %v3286_v12 = vmul.f32 -1.442695, %v6402_v29 }
 0x6c8   : > { %4258 = vpow2.f32 %v3280_v43  ;;  %v4251_v22 = vpop.eup %4250  ;;  %v1150_v61 = vadd.f32 1.0, %v4249_v8 }
 0x6c9   : > { %4260 = vrcp.f32 %v1148_v54  ;;  %v4253_v58 = vpop.eup %4252  ;;  %v1140_v23 = vadd.f32 1.0, %v4251_v22 }
 0x6ca   : > { %4262 = vpow2.f32 %v3270_v31  ;;  %v1151_v19 = vadd.f32 1.0, %v4253_v58 }
 0x6cb   : > { %4264 = vpow2.f32 %v3281_v36  ;;  %v6403_v36 = vld [vmem:[#allocation23_spill] sm:$0xff] }
 0x6cc   : > { %4266 = vrcp.f32 %v1149_v28  ;;  %v3287_v28 = vmul.f32 -1.442695, %v6403_v36 }
 0x6cd   : > { %4268 = vpow2.f32 %v3271_v26 }
 0x6ce   : > { %v2556_v25 = vpop.f32.mrb[88].mxu0  ;;  %4270 = vrcp.f32 %v1139_v4 }
 0x6cf   : > { %2663 = vrot.lane.b32.xlu1 %v2556_v25, %s4352_s14  ;;  %v2558_v0 = vpop.f32.mrb[89].mxu0  ;;  %4272 = vpow2.f32 %v3282_v50  ;;  %v3273_v25 = vmul.f32 -1.442695, %v6398_v45 }
 0x6d0   : > { %v4255_v30 = vpop.eup %4254  ;;  %4274 = vrcp.f32 %v1150_v61 }
 0x6d1   : > { %v4257_v5 = vpop.eup %4256  ;;  %4276 = vpow2.f32 %v3272_v59  ;;  %v6404_v59 = vld [vmem:[#allocation22_spill] sm:$0xff] }
 0x6d2   : > { %v4259_v57 = vpop.eup %4258  ;;  %4278 = vrcp.f32 %v1140_v23 }
 0x6d3   : > { %v4261_v0 = vpop.eup %4260  ;;  %4280 = vpow2.f32 %v3283_v63 }
 0x6d4   : > { %4282 = vrcp.f32 %v1151_v19 }
 0x6d5   : > { %4284 = vpow2.f32 %v3273_v25 }
 0x6d6   : > { %v2561_v35 = vpop.f32.mrb[90].mxu0  ;;  %v2616_v20 = vpop.permute.xlu0 %2615 }
 0x6d7   : > { %v2707_v53 = vmul.f32 %v4237_v52, %v2616_v20  ;;  %2665 = vrot.lane.b32.xlu1 %v2561_v35, %s4352_s14  ;;  %v2563_v46 = vpop.f32.mrb[91].mxu0  ;;  %v1141_v20 = vadd.f32 1.0, %v4257_v5 }
 0x6d8   : > { %v6399_v46 = vld [vmem:[#allocation14_spill] sm:$0xff] }
 0x6d9   : > { %2786 = vrot.lane.b32.xlu0 %v2707_v53, %s4355_s18  ;;  %v4263_v53 = vpop.eup %4262  ;;  %4286 = vrcp.f32 %v1141_v20 }
 0x6da   : > { %v2566_v7 = vpop.f32.mrb[92].mxu0  ;;  %v2618_v27 = vpop.permute.xlu0 %2617  ;;  %v1142_v49 = vadd.f32 1.0, %v4263_v53 }
 0x6db   : > { %v2708_v51 = vmul.f32 %v4239_v11, %v2618_v27  ;;  %2667 = vrot.lane.b32.xlu1 %v2566_v7, %s4352_s14  ;;  %v2568_v16 = vpop.f32.mrb[93].mxu0  ;;  %v3284_v11 = vmul.f32 -1.442695, %v6399_v46  ;;  %v1152_v27 = vadd.f32 1.0, %v4259_v57 }
 0x6dc   : > { %v6400_v16 = vld [vmem:[#allocation28_spill] sm:$0xff] }
 0x6dd   : > { %2788 = vrot.lane.b32.xlu0 %v2708_v51, %s4355_s18  ;;  %v4265_v51 = vpop.eup %4264  ;;  %4288 = vpow2.f32 %v3284_v11 }
 0x6de   : > { %v2571_v2 = vpop.f32.mrb[94].mxu0  ;;  %v4267_v60 = vpop.eup %4266  ;;  %4290 = vrcp.f32 %v1152_v27  ;;  %v1153_v13 = vadd.f32 1.0, %v4265_v51 }
 0x6df   : > { %2669 = vrot.lane.b32.xlu1 %v2571_v2, %s4352_s14  ;;  %v2573_v33 = vpop.f32.mrb[95].mxu0  ;;  %v3274_v2 = vmul.f32 -1.442695, %v6400_v16  ;;  %v4269_v42 = vpop.eup %4268 }
 0x6e0   : > { %v4271_v39 = vpop.eup %4270  ;;  %v1143_v15 = vadd.f32 1.0, %v4269_v42 }
 0x6e1   : > { %v4273_v1 = vpop.eup %4272  ;;  %4292 = vpow2.f32 %v3274_v2 }
 0x6e2   : > { %v4275_v55 = vpop.eup %4274  ;;  %4294 = vrcp.f32 %v1142_v49  ;;  %v1154_v43 = vadd.f32 1.0, %v4273_v1 }
 0x6e3   : > { %v4277_v6 = vpop.eup %4276  ;;  %4296 = vpow2.f32 %v3285_v3 }
 0x6e4   : > { %v4279_v14 = vpop.eup %4278  ;;  %4298 = vrcp.f32 %v1153_v13  ;;  %v1144_v40 = vadd.f32 1.0, %v4277_v6  ;;  %v6405_v13 = vld [vmem:[#allocation27_spill] sm:$0xff] }
 0x6e5   : > { %v4281_v54 = vpop.eup %4280  ;;  %4300 = vrcp.f32 %v1143_v15  ;;  %v3289_v1 = vmul.f32 -1.442695, %v6405_v13 }
 0x6e6   : > { %v4283_v48 = vpop.eup %4282  ;;  %4302 = vpow2.f32 %v3286_v12  ;;  %v1155_v4 = vadd.f32 1.0, %v4281_v54 }
 0x6e7   : > { %v4285_v47 = vpop.eup %4284  ;;  %4304 = vrcp.f32 %v1154_v43 }
 0x6e8   : > { %v4287_v26 = vpop.eup %4286  ;;  %4306 = vrcp.f32 %v1144_v40  ;;  %v1145_v58 = vadd.f32 1.0, %v4285_v47 }
 0x6e9   : > { %v4289_v22 = vpop.eup %4288  ;;  %4308 = vpow2.f32 %v3287_v28  ;;  %v6407_v28 = vld [vmem:[#allocation33_spill] sm:$0xff] }
 0x6ea   : > { %v4291_v10 = vpop.eup %4290  ;;  %4310 = vrcp.f32 %v1155_v4  ;;  %v1156_v56 = vadd.f32 1.0, %v4289_v22 }
 0x6eb   : > { %v4293_v24 = vpop.eup %4292  ;;  %4312 = vrcp.f32 %v1145_v58 }
 0x6ec   : > { %v4295_v5 = vpop.eup %4294 }
 0x6ed   : > { %v4297_v63 = vpop.eup %4296 }
 0x6fe   : > { %v2636_v44 = vpop.permute.xlu0 %2635 }
 0x6ff   : > { %v2717_v37 = vmul.f32 %v4255_v30, %v2636_v44  ;;  %v3288_v30 = vmul.f32 -1.442695, %v6404_v59 }
 0x701   : > { %2806 = vrot.lane.b32.xlu0 %v2717_v37, %s4355_s18  ;;  %v4299_v37 = vpop.eup %4298  ;;  %4314 = vpow2.f32 %v3288_v30 }
 0x702   : > { %v2620_v52 = vpop.permute.xlu0 %2619  ;;  %v2638_v35 = vpop.permute.xlu1 %2637  ;;  %4316 = vrcp.f32 %v1156_v56 }
 0x703   : > { %v2718_v7 = vmul.f32 %v4261_v0, %v2638_v35  ;;  %v2709_v34 = vmul.f32 %v4271_v39, %v2620_v52  ;;  %v1146_v0 = vadd.f32 1.0, %v4293_v24  ;;  %v4301_v52 = vpop.eup %4300  ;;  %v1157_v35 = vadd.f32 1.0, %v4297_v63 }
 0x704   : > { %v4303_v20 = vpop.eup %4302 }
 0x705   : > { %2808 = vrot.lane.b32.xlu1 %v2718_v7, %s4355_s18  ;;  %v4305_v53 = vpop.eup %4304  ;;  %4318 = vrcp.f32 %v1146_v0  ;;  %v1158_v16 = vadd.f32 1.0, %v4303_v20 }
 0x706   : > { %v2622_v21 = vpop.permute.xlu0 %2621  ;;  %v2640_v33 = vpop.permute.xlu1 %2639  ;;  %4320 = vrcp.f32 %v1157_v35 }
 0x707   : > { %v2719_v41 = vmul.f32 %v4267_v60, %v2640_v33  ;;  %v2710_v8 = vmul.f32 %v4279_v14, %v2622_v21  ;;  %v4307_v51 = vpop.eup %4306  ;;  %4322 = vrcp.f32 %v1158_v16 }
 0x708   : > { %v4309_v2 = vpop.eup %4308 }
 0x709   : > { %2810 = vrot.lane.b32.xlu0 %v2719_v41, %s4355_s18  ;;  %v4311_v60 = vpop.eup %4310  ;;  %v1159_v3 = vadd.f32 1.0, %v4309_v2 }
 0x70a   : > { %v2624_v38 = vpop.permute.xlu0 %2623  ;;  %v2642_v17 = vpop.permute.xlu1 %2641 }
 0x70b   : > { %v2720_v9 = vmul.f32 %v4275_v55, %v2642_v17  ;;  %v2711_v44 = vmul.f32 %v4287_v26, %v2624_v38  ;;  %v4313_v18 = vpop.eup %4312  ;;  %4324 = vrcp.f32 %v1159_v3 }
 0x70c   : > { %v4315_v41 = vpop.eup %4314  ;;  %4326 = vpow2.f32 %v3289_v1 }
 0x70d   : > { %2790 = vrot.lane.b32.xlu0 %v2709_v34, %s4355_s18  ;;  %2812 = vrot.lane.b32.xlu1 %v2720_v9, %s4355_s18  ;;  %v4317_v39 = vpop.eup %4316  ;;  %v1160_v6 = vadd.f32 1.0, %v4315_v41 }
 0x70e   : > { %v2626_v62 = vpop.permute.xlu0 %2625  ;;  %v2644_v31 = vpop.permute.xlu1 %2643 }
 0x70f   : > { %v2721_v32 = vmul.f32 %v4283_v48, %v2644_v31  ;;  %v2712_v45 = vmul.f32 %v4295_v5, %v2626_v62  ;;  %v4319_v29 = vpop.eup %4318  ;;  %4328 = vrcp.f32 %v1160_v6  ;;  %v6406_v48 = vld [vmem:[#allocation26_spill] sm:$0xff] }
 0x710   : > { %v4321_v12 = vpop.eup %4320  ;;  %v3290_v62 = vmul.f32 -1.442695, %v6406_v48  ;;  %v6107_v48 = vld [vmem:[%s6219_s4] ss:$0 sm:$0xff] }
 0x711   : > { %2792 = vrot.lane.b32.xlu0 %v2710_v8, %s4355_s18  ;;  %2814 = vrot.lane.b32.xlu1 %v2721_v32, %s4355_s18  ;;  %v4323_v54 = vpop.eup %4322  ;;  %v3291_v8 = vmul.f32 -1.442695, %v6407_v28 }
 0x712   : > { %v2628_v50 = vpop.permute.xlu0 %2627  ;;  %v2646_v61 = vpop.permute.xlu1 %2645  ;;  %4330 = vpow2.f32 %v3290_v62 }
 0x713   : > { %v2722_v23 = vmul.f32 %v4291_v10, %v2646_v61  ;;  %v2713_v7 = vmul.f32 %v4301_v52, %v2628_v50  ;;  %v6408_v50 = vld [vmem:[#allocation32_spill] sm:$0xff]  ;;  %4332 = vpow2.f32 %v3291_v8 }
 0x714   : > { %v3292_v61 = vmul.f32 -1.442695, %v6408_v50 }
 0x715   : > { %2794 = vrot.lane.b32.xlu0 %v2711_v44, %s4355_s18  ;;  %2816 = vrot.lane.b32.xlu1 %v2722_v23, %s4355_s18  ;;  %v4325_v36 = vpop.eup %4324 }
 0x716   : > { %v2630_v19 = vpop.permute.xlu0 %2629  ;;  %v2648_v57 = vpop.permute.xlu1 %2647  ;;  %4334 = vpow2.f32 %v3292_v61 }
 0x717   : > { %v2723_v25 = vmul.f32 %v4299_v37, %v2648_v57  ;;  %v2714_v49 = vmul.f32 %v4307_v51, %v2630_v19  ;;  %v4327_v22 = vpop.eup %4326 }
 0x718   : > { %v1161_v59 = vadd.f32 1.0, %v4327_v22 }
 0x719   : > { %2796 = vrot.lane.b32.xlu0 %v2712_v45, %s4355_s18  ;;  %2818 = vrot.lane.b32.xlu1 %v2723_v25, %s4355_s18  ;;  %v4329_v10 = vpop.eup %4328 }
 0x71a   : > { %v2632_v46 = vpop.permute.xlu0 %2631  ;;  %v2650_v11 = vpop.permute.xlu1 %2649  ;;  %4336 = vrcp.f32 %v1161_v59 }
 0x71b   : > { %v2724_v27 = vmul.f32 %v4305_v53, %v2650_v11  ;;  %v2715_v17 = vmul.f32 %v4313_v18, %v2632_v46 }
 0x71c   : > { %v4331_v30 = vpop.eup %4330 }
 0x71d   : > { %2798 = vrot.lane.b32.xlu0 %v2713_v7, %s4355_s18  ;;  %2820 = vrot.lane.b32.xlu1 %v2724_v27, %s4355_s18  ;;  %v1162_v44 = vadd.f32 1.0, %v4331_v30  ;;  %v4333_v23 = vpop.eup %4332 }
 0x71e   : > { %v2634_v21 = vpop.permute.xlu0 %2633  ;;  %v2652_v33 = vpop.permute.xlu1 %2651  ;;  %v1163_v5 = vadd.f32 1.0, %v4333_v23 }
 0x71f   : > { %v2725_v42 = vmul.f32 %v4311_v60, %v2652_v33  ;;  %v2716_v14 = vmul.f32 %v4319_v29, %v2634_v21  ;;  %4338 = vrcp.f32 %v1162_v44 }
 0x720   : > { %v4335_v56 = vpop.eup %4334  ;;  %4340 = vrcp.f32 %v1163_v5 }
 0x721   : > { %2800 = vrot.lane.b32.xlu0 %v2714_v49, %s4355_s18  ;;  %2822 = vrot.lane.b32.xlu1 %v2725_v42, %s4355_s18  ;;  %v1164_v57 = vadd.f32 1.0, %v4335_v56 }
 0x722   : > { %v2779_v55 = vpop.permute.xlu0 %2778  ;;  %v2654_v38 = vpop.permute.xlu1 %2653 }
 0x723   : > { %v2726_v15 = vmul.f32 %v4317_v39, %v2654_v38  ;;  %3624 = vmatprep.mubr.msk.f32.mxu0 %vm287_vm0, %v2779_v55  ;;  %4342 = vrcp.f32 %v1164_v57 }
 0x724   : > { %v4337_v63 = vpop.eup %4336 }
 0x725   : > { %2802 = vrot.lane.b32.xlu0 %v2715_v17, %s4355_s18  ;;  %2824 = vrot.lane.b32.xlu1 %v2726_v15, %s4355_s18 }
 0x726   : > { %v2781_v34 = vpop.permute.xlu0 %2780  ;;  %v2656_v9 = vpop.permute.xlu1 %2655 }
 0x727   : > { %v2727_v43 = vmul.f32 %v4321_v12, %v2656_v9  ;;  %3625 = vmatmul.mubr.msk.f32.vlgmr.msra.gmra.mrb[96].mxu0 %vm287_vm0, %v2781_v34 }
 0x729   : > { %2804 = vrot.lane.b32.xlu0 %v2716_v14, %s4355_s18  ;;  %2826 = vrot.lane.b32.xlu1 %v2727_v43, %s4355_s18  ;;  %v4339_v45 = vpop.eup %4338 }
 0x72a   : > { %v2783_v31 = vpop.permute.xlu0 %2782  ;;  %v2658_v40 = vpop.permute.xlu1 %2657 }
 0x72b   : > { %v2728_v47 = vmul.f32 %v4323_v54, %v2658_v40  ;;  %3627 = vmatprep.mubr.msk.f32.mxu0 %vm287_vm0, %v2783_v31  ;;  %v4341_v35 = vpop.eup %4340 }
 0x72d   : > { %2828 = vrot.lane.b32.xlu1 %v2728_v47, %s4355_s18  ;;  %v4343_v11 = vpop.eup %4342 }
 0x72e   : > { %v2785_v32 = vpop.permute.xlu0 %2784  ;;  %v2660_v26 = vpop.permute.xlu1 %2659 }
 0x72f   : > { %v2729_v4 = vmul.f32 %v4325_v36, %v2660_v26  ;;  %3628 = vmatmul.mubr.msk.f32.gmra.mrb[98].mxu0 %vm287_vm0, %v2785_v32 }
 0x731   : > { %2830 = vrot.lane.b32.xlu1 %v2729_v4, %s4355_s18 }
 0x732   : > { %v2662_v58 = vpop.permute.xlu1 %2661 }
 0x733   : > { %v2730_v24 = vmul.f32 %v4329_v10, %v2662_v58 }
 0x735   : > { %2832 = vrot.lane.b32.xlu1 %v2730_v24, %s4355_s18 }
 0x741   : > { %v2664_v37 = vpop.permute.xlu1 %2663 }
 0x742   : > { %v2731_v19 = vmul.f32 %v4337_v63, %v2664_v37 }
 0x744   : > { %2834 = vrot.lane.b32.xlu1 %v2731_v19, %s4355_s18 }
 0x749   : > { %v2666_v25 = vpop.permute.xlu1 %2665 }
 0x74a   : > { %v2732_v0 = vmul.f32 %v4339_v45, %v2666_v25 }
 0x74b   : > { %v2787_v52 = vpop.permute.xlu0 %2786 }
 0x74c   : > { %2836 = vrot.lane.b32.xlu1 %v2732_v0, %s4355_s18  ;;  %3630 = vmatprep.mubr.msk.f32.mxu0 %vm287_vm0, %v2787_v52 }
 0x74d   : > { %v2668_v20 = vpop.permute.xlu1 %2667 }
 0x74e   : > { %v2733_v53 = vmul.f32 %v4341_v35, %v2668_v20 }
 0x74f   : > { %v2789_v46 = vpop.permute.xlu0 %2788 }
 0x750   : > { %2838 = vrot.lane.b32.xlu1 %v2733_v53, %s4355_s18  ;;  %3631 = vmatmul.mubr.msk.f32.gmra.mrb[100].mxu0 %vm287_vm0, %v2789_v46 }
 0x751   : > { %v2670_v7 = vpop.permute.xlu1 %2669 }
 0x752   : > { %v2734_v27 = vmul.f32 %v4343_v11, %v2670_v7 }
 0x754   : > { %2840 = vrot.lane.b32.xlu1 %v2734_v27, %s4355_s18 }
 0x773   : > { %v2807_v51 = vpop.permute.xlu0 %2806 }
 0x774   : > { %3645 = vmatprep.mubr.msk.f32.mxu1 %vm287_vm0, %v2807_v51 }
 0x777   : > { %v2809_v16 = vpop.permute.xlu1 %2808 }
 0x778   : > { %3646 = vmatmul.mubr.msk.f32.vlgmr.msra.gmra.mrb[64].mxu1 %vm287_vm0, %v2809_v16 }
 0x77b   : > { %v2811_v2 = vpop.permute.xlu0 %2810 }
 0x77c   : > { %3648 = vmatprep.mubr.msk.f32.mxu1 %vm287_vm0, %v2811_v2 }
 0x77f   : > { %v2791_v60 = vpop.permute.xlu0 %2790  ;;  %v2813_v21 = vpop.permute.xlu1 %2812 }
 0x780   : > { %3633 = vmatprep.mubr.msk.f32.mxu0 %vm287_vm0, %v2791_v60  ;;  %3649 = vmatmul.mubr.msk.f32.gmra.mrb[66].mxu1 %vm287_vm0, %v2813_v21 }
 0x783   : > { %v2793_v33 = vpop.permute.xlu0 %2792  ;;  %v2815_v49 = vpop.permute.xlu1 %2814 }
 0x784   : > { %3634 = vmatmul.mubr.msk.f32.gmra.mrb[102].mxu0 %vm287_vm0, %v2793_v33  ;;  %3651 = vmatprep.mubr.msk.f32.mxu1 %vm287_vm0, %v2815_v49 }
 0x787   : > { %v2795_v42 = vpop.permute.xlu0 %2794  ;;  %v2817_v18 = vpop.permute.xlu1 %2816 }
 0x788   : > { %3636 = vmatprep.mubr.msk.f32.mxu0 %vm287_vm0, %v2795_v42  ;;  %3652 = vmatmul.mubr.msk.f32.gmra.mrb[68].mxu1 %vm287_vm0, %v2817_v18 }
 0x78b   : > { %v2797_v3 = vpop.permute.xlu0 %2796  ;;  %v2819_v41 = vpop.permute.xlu1 %2818 }
 0x78c   : > { %3637 = vmatmul.mubr.msk.f32.gmra.mrb[104].mxu0 %vm287_vm0, %v2797_v3  ;;  %3654 = vmatprep.mubr.msk.f32.mxu1 %vm287_vm0, %v2819_v41 }
 0x78f   : > { %v2799_v39 = vpop.permute.xlu0 %2798  ;;  %v2821_v13 = vpop.permute.xlu1 %2820 }
 0x790   : > { %3639 = vmatprep.mubr.msk.f32.mxu0 %vm287_vm0, %v2799_v39  ;;  %3655 = vmatmul.mubr.msk.f32.gmra.mrb[70].mxu1 %vm287_vm0, %v2821_v13 }
 0x793   : > { %v2801_v1 = vpop.permute.xlu0 %2800  ;;  %v2823_v55 = vpop.permute.xlu1 %2822 }
 0x794   : > { %3640 = vmatmul.mubr.msk.f32.gmra.mrb[106].mxu0 %vm287_vm0, %v2801_v1  ;;  %3657 = vmatprep.mubr.msk.f32.mxu1 %vm287_vm0, %v2823_v55 }
 0x797   : > { %v2803_v38 = vpop.permute.xlu0 %2802  ;;  %v2825_v17 = vpop.permute.xlu1 %2824 }
 0x798   : > { %3642 = vmatprep.mubr.msk.f32.mxu0 %vm287_vm0, %v2803_v38  ;;  %3658 = vmatmul.mubr.msk.f32.gmra.mrb[72].mxu1 %vm287_vm0, %v2825_v17 }
 0x79b   : > { %v2805_v15 = vpop.permute.xlu0 %2804  ;;  %v2827_v6 = vpop.permute.xlu1 %2826 }
 0x79c   : > { %3643 = vmatmul.mubr.msk.f32.gmra.mrb[108].mxu0 %vm287_vm0, %v2805_v15  ;;  %3660 = vmatprep.mubr.msk.f32.mxu1 %vm287_vm0, %v2827_v6 }
 0x79f   : > { %v2829_v29 = vpop.permute.xlu1 %2828 }
 0x7a0   : > { %3661 = vmatmul.mubr.msk.f32.gmra.mrb[74].mxu1 %vm287_vm0, %v2829_v29 }
 0x7a3   : > { %v2831_v12 = vpop.permute.xlu1 %2830 }
 0x7a4   : > { %3663 = vmatprep.mubr.msk.f32.mxu1 %vm287_vm0, %v2831_v12 }
 0x7a7   : > { %v2833_v34 = vpop.permute.xlu1 %2832 }
 0x7a8   : > { %3664 = vmatmul.mubr.msk.f32.gmra.mrb[76].mxu1 %vm287_vm0, %v2833_v34 }
 0x7b6   : > { %v2835_v9 = vpop.permute.xlu1 %2834 }
 0x7b7   : > { %3666 = vmatprep.mubr.msk.f32.mxu1 %vm287_vm0, %v2835_v9 }
 0x7be   : > { %v2837_v14 = vpop.permute.xlu1 %2836 }
 0x7bf   : > { %3667 = vmatmul.mubr.msk.f32.gmra.mrb[78].mxu1 %vm287_vm0, %v2837_v14 }
 0x7c2   : > { %v2839_v43 = vpop.permute.xlu1 %2838 }
 0x7c3   : > { %3669 = vmatprep.mubr.msk.f32.mxu1 %vm287_vm0, %v2839_v43 }
 0x7c6   : > { %v2841_v54 = vpop.permute.xlu1 %2840 }
 0x7c7   : > { %3670 = vmatmul.mubr.msk.f32.gmra.mrb[80].mxu1 %vm287_vm0, %v2841_v54 }
 0x7fa   : > { %v3626_v62 = vpop.f32.mrb[96].mxu0 }
 0x7fb   : > { %v2978_v31 = vadd.f32 %v3626_v62, %v6107_v48  ;;  %v2972_v40 = vpop.f32.mrb[97].mxu0 }
 0x7fc   : > { %v2973_v47 = vadd.f32 %v6107_v48, %v2972_v40 }
 0x7fd   : > { %3132 = vst.msk [vmem:[%s6114_s25 + $0x8] sm:$0xff] %vm287_vm0, %v2978_v31 }
 0x7fe   : > { %3131 = vst.msk [vmem:[%s6114_s25] sm:$0xff] %vm287_vm0, %v2973_v47 }
 0x802   : > { %v3629_v36 = vpop.f32.mrb[98].mxu0 }
 0x803   : > { %v2988_v28 = vadd.f32 %v3629_v36, %v6107_v48  ;;  %v2982_v8 = vpop.f32.mrb[99].mxu0 }
 0x804   : > { %v2983_v32 = vadd.f32 %v6107_v48, %v2982_v8 }
 0x805   : > { %3134 = vst.msk [vmem:[%s6114_s25 + $0x18] sm:$0xff] %vm287_vm0, %v2988_v28 }
 0x806   : > { %3133 = vst.msk [vmem:[%s6114_s25 + $0x10] sm:$0xff] %vm287_vm0, %v2983_v32 }
 0x823   : > { %v3632_v26 = vpop.f32.mrb[100].mxu0 }
 0x824   : > { %v2998_v4 = vadd.f32 %v3632_v26, %v6107_v48  ;;  %v2992_v22 = vpop.f32.mrb[101].mxu0 }
 0x825   : > { %v2993_v10 = vadd.f32 %v6107_v48, %v2992_v22 }
 0x826   : > { %3136 = vst.msk [vmem:[%s6114_s25 + $0x28] sm:$0xff] %vm287_vm0, %v2998_v4 }
 0x827   : > { %3135 = vst.msk [vmem:[%s6114_s25 + $0x20] sm:$0xff] %vm287_vm0, %v2993_v10 }
 0x84b   : > { %v3647_v50 = vpop.f32.mrb[64].mxu1 }
 0x84c   : > { %v3048_v61 = vadd.f32 %v3647_v50, %v6107_v48  ;;  %v3042_v58 = vpop.f32.mrb[65].mxu1 }
 0x84d   : > { %v3043_v24 = vadd.f32 %v6107_v48, %v3042_v58 }
 0x84e   : > { %3146 = vst.msk [vmem:[%s6114_s25 + $0x78] sm:$0xff] %vm287_vm0, %v3048_v61 }
 0x84f   : > { %3145 = vst.msk [vmem:[%s6114_s25 + $0x70] sm:$0xff] %vm287_vm0, %v3043_v24 }
 0x853   : > { %v3650_v59 = vpop.f32.mrb[66].mxu1 }
 0x854   : > { %v3058_v30 = vadd.f32 %v3650_v59, %v6107_v48  ;;  %v3052_v44 = vpop.f32.mrb[67].mxu1 }
 0x855   : > { %v3053_v23 = vadd.f32 %v6107_v48, %v3052_v44 }
 0x856   : > { %3148 = vst.msk [vmem:[%s6114_s25 + $0x88] sm:$0xff] %vm287_vm0, %v3058_v30 }
 0x857   : > { %3147 = vst.msk [vmem:[%s6114_s25 + $0x80] sm:$0xff] %vm287_vm0, %v3053_v23  ;;  %v3635_v5 = vpop.f32.mrb[102].mxu0 }
 0x858   : > { %v3008_v56 = vadd.f32 %v3635_v5, %v6107_v48  ;;  %v3002_v63 = vpop.f32.mrb[103].mxu0 }
 0x859   : > { %v3003_v37 = vadd.f32 %v6107_v48, %v3002_v63 }
 0x85a   : > { %3138 = vst.msk [vmem:[%s6114_s25 + $0x38] sm:$0xff] %vm287_vm0, %v3008_v56 }
 0x85b   : > { %3137 = vst.msk [vmem:[%s6114_s25 + $0x30] sm:$0xff] %vm287_vm0, %v3003_v37  ;;  %v3653_v19 = vpop.f32.mrb[68].mxu1 }
 0x85c   : > { %v3068_v57 = vadd.f32 %v3653_v19, %v6107_v48  ;;  %v3062_v45 = vpop.f32.mrb[69].mxu1 }
 0x85d   : > { %v3063_v25 = vadd.f32 %v6107_v48, %v3062_v45 }
 0x85e   : > { %3150 = vst.msk [vmem:[%s6114_s25 + $0x98] sm:$0xff] %vm287_vm0, %v3068_v57 }
 0x85f   : > { %3149 = vst.msk [vmem:[%s6114_s25 + $0x90] sm:$0xff] %vm287_vm0, %v3063_v25  ;;  %v3638_v0 = vpop.f32.mrb[104].mxu0 }
 0x860   : > { %v3018_v52 = vadd.f32 %v3638_v0, %v6107_v48  ;;  %v3012_v35 = vpop.f32.mrb[105].mxu0 }
 0x861   : > { %v3013_v20 = vadd.f32 %v6107_v48, %v3012_v35 }
 0x862   : > { %3140 = vst.msk [vmem:[%s6114_s25 + $0x48] sm:$0xff] %vm287_vm0, %v3018_v52 }
 0x863   : > { %3139 = vst.msk [vmem:[%s6114_s25 + $0x40] sm:$0xff] %vm287_vm0, %v3013_v20  ;;  %v3656_v53 = vpop.f32.mrb[70].mxu1 }
 0x864   : > { %v3078_v46 = vadd.f32 %v3656_v53, %v6107_v48  ;;  %v3072_v11 = vpop.f32.mrb[71].mxu1 }
 0x865   : > { %v3073_v7 = vadd.f32 %v6107_v48, %v3072_v11 }
 0x866   : > { %3152 = vst.msk [vmem:[%s6114_s25 + $0xa8] sm:$0xff] %vm287_vm0, %v3078_v46 }
 0x867   : > { %3151 = vst.msk [vmem:[%s6114_s25 + $0xa0] sm:$0xff] %vm287_vm0, %v3073_v7  ;;  %v3641_v27 = vpop.f32.mrb[106].mxu0 }
 0x868   : > { %v3028_v51 = vadd.f32 %v3641_v27, %v6107_v48  ;;  %v3022_v16 = vpop.f32.mrb[107].mxu0 }
 0x869   : > { %v3023_v2 = vadd.f32 %v6107_v48, %v3022_v16 }
 0x86a   : > { %3142 = vst.msk [vmem:[%s6114_s25 + $0x58] sm:$0xff] %vm287_vm0, %v3028_v51 }
 0x86b   : > { %3141 = vst.msk [vmem:[%s6114_s25 + $0x50] sm:$0xff] %vm287_vm0, %v3023_v2  ;;  %v3659_v60 = vpop.f32.mrb[72].mxu1 }
 0x86c   : > { %v3088_v21 = vadd.f32 %v3659_v60, %v6107_v48  ;;  %v3082_v33 = vpop.f32.mrb[73].mxu1 }
 0x86d   : > { %v3083_v49 = vadd.f32 %v6107_v48, %v3082_v33 }
 0x86e   : > { %3154 = vst.msk [vmem:[%s6114_s25 + $0xb8] sm:$0xff] %vm287_vm0, %v3088_v21 }
 0x86f   : > { %3153 = vst.msk [vmem:[%s6114_s25 + $0xb0] sm:$0xff] %vm287_vm0, %v3083_v49  ;;  %v3644_v42 = vpop.f32.mrb[108].mxu0 }
 0x870   : > { %v3038_v18 = vadd.f32 %v3644_v42, %v6107_v48  ;;  %v3032_v3 = vpop.f32.mrb[109].mxu0 }
 0x871   : > { %v3033_v41 = vadd.f32 %v6107_v48, %v3032_v3 }
 0x872   : > { %3144 = vst.msk [vmem:[%s6114_s25 + $0x68] sm:$0xff] %vm287_vm0, %v3038_v18 }
 0x873   : > { %3143 = vst.msk [vmem:[%s6114_s25 + $0x60] sm:$0xff] %vm287_vm0, %v3033_v41  ;;  %v3662_v39 = vpop.f32.mrb[74].mxu1 }
 0x874   : > { %v3098_v13 = vadd.f32 %v3662_v39, %v6107_v48  ;;  %v3092_v1 = vpop.f32.mrb[75].mxu1 }
 0x875   : > { %v3093_v55 = vadd.f32 %v6107_v48, %v3092_v1 }
 0x876   : > { %3156 = vst.msk [vmem:[%s6114_s25 + $0xc8] sm:$0xff] %vm287_vm0, %v3098_v13 }
 0x877   : > { %3155 = vst.msk [vmem:[%s6114_s25 + $0xc0] sm:$0xff] %vm287_vm0, %v3093_v55 }
 0x87b   : > { %v3665_v38 = vpop.f32.mrb[76].mxu1 }
 0x87c   : > { %v3108_v17 = vadd.f32 %v3665_v38, %v6107_v48  ;;  %v3102_v15 = vpop.f32.mrb[77].mxu1 }
 0x87d   : > { %v3103_v6 = vadd.f32 %v6107_v48, %v3102_v15 }
 0x87e   : > { %3158 = vst.msk [vmem:[%s6114_s25 + $0xd8] sm:$0xff] %vm287_vm0, %v3108_v17 }
 0x87f   : > { %3157 = vst.msk [vmem:[%s6114_s25 + $0xd0] sm:$0xff] %vm287_vm0, %v3103_v6 }
 0x892   : > { %v3668_v29 = vpop.f32.mrb[78].mxu1 }
 0x893   : > { %v3118_v12 = vadd.f32 %v3668_v29, %v6107_v48  ;;  %v3112_v34 = vpop.f32.mrb[79].mxu1 }
 0x894   : > { %v3113_v9 = vadd.f32 %v6107_v48, %v3112_v34 }
 0x895   : > { %3160 = vst.msk [vmem:[%s6114_s25 + $0xe8] sm:$0xff] %vm287_vm0, %v3118_v12 }
 0x896   : > { %3159 = vst.msk [vmem:[%s6114_s25 + $0xe0] sm:$0xff] %vm287_vm0, %v3113_v9 }
 0x89a   : > { %v3671_v14 = vpop.f32.mrb[80].mxu1 }
 0x89b   : > { %v3128_v43 = vadd.f32 %v3671_v14, %v6107_v48  ;;  %v3122_v54 = vpop.f32.mrb[81].mxu1 }
 0x89c   : > { %v3123_v62 = vadd.f32 %v6107_v48, %v3122_v54 }
 0x89d   : > { %3162 = vst.msk [vmem:[%s6114_s25 + $0xf8] sm:$0xff] %vm287_vm0, %v3128_v43 }
 0x89e   : > { %3161 = vst.msk [vmem:[%s6114_s25 + $0xf0] sm:$0xff] %vm287_vm0, %v3123_v62 }
 0x89f PF: > { %s16_s21 = sadd.s32 1, %s4350_s21  }
 0x8a0   : > { %p13_p4 = scmp.ge.s32.totalorder %s16_s21, 4  }
 0x8a2   :  { %15 = sbr.rel (!%p13_p4) target bundleno = 1 (0x1), region = 74 }

</bundles_post_ra>
